<compile_context>
chip_gen: v7x
topology: tpu7x:2x2x1
jax: 0.10.0
libtpu: 0.0.40
codegen_flags: <defaults>
</compile_context>

<pallas_src>
import functools

import jax
import jax.numpy as jnp
from jax.experimental import pallas as pl
from jax.experimental.pallas import tpu as pltpu


# ----------------------------------------------------------------------------
# Tiling helpers
# ----------------------------------------------------------------------------
def _pick_row_tile(m, target=512):
    """Largest multiple-of-8 divisor of m that is <= target, preferring an
    even (>= 2) number of grid steps so megacore gets both halves."""
    if m <= 8:
        return m
    cands = [t for t in range(8, min(m, target) + 1, 8) if m % t == 0]
    if not cands:
        return m
    even = [t for t in cands if (m // t) % 2 == 0]
    return max(even) if even else max(cands)


def _pick_lane_tile(k, target=2048):
    """Largest multiple-of-128 divisor of k that is <= target (else full k)."""
    if k <= target:
        return k
    for t in range(target - target % 128, 127, -128):
        if k % t == 0:
            return t
    return k


# ----------------------------------------------------------------------------
# Pallas kernels
# ----------------------------------------------------------------------------
def _conv_relu_pool_kernel(p_ref, w_ref, b_ref, o_ref, *, n_groups, cout):
    """Fused conv(3x3, pad 1) + bias + ReLU + 2x2 maxpool via block-diag taps.

    p_ref: (T, TILE_M, Kg) pool-tap-grouped im2col patches (bf16), where each
           group packs `n_groups` taps along the feature axis.
    w_ref: (Kg, n_groups*cout) block-diagonal weight (bf16).
    b_ref: (1, cout) f32.   o_ref: (TILE_M, cout) bf16.
    max_i relu(p_i @ W + b) == relu(max_i(p_i @ W) + b)  (relu/+bias monotone).
    """
    w = w_ref[...]
    m = jnp.dot(p_ref[0], w, preferred_element_type=jnp.float32)
    for t in range(1, p_ref.shape[0]):
        m = jnp.maximum(m, jnp.dot(p_ref[t], w,
                                   preferred_element_type=jnp.float32))
    # Reduce-max over the n_groups column groups (one per packed tap).
    r = m[:, 0:cout]
    for g in range(1, n_groups):
        r = jnp.maximum(r, m[:, g * cout:(g + 1) * cout])
    o_ref[...] = jnp.maximum(r + b_ref[...], 0.0).astype(o_ref.dtype)


def _mlp_head_kernel(x_ref, w1_ref, b1_ref, w2_ref, b2_ref, o_ref, acc_ref):
    """K-accumulated fc1 with fc2 fused into the finalize branch.

    Grid = (M tiles, K tiles).  acc_ref is a resident (TILE_M, 128) f32 scratch.
    o = (relu(x @ w1 + b1)) @ w2 + b2
    """
    k = pl.program_id(1)

    @pl.when(k == 0)
    def _():
        acc_ref[...] = jnp.zeros_like(acc_ref)

    acc_ref[...] += jnp.dot(x_ref[...], w1_ref[...],
                            preferred_element_type=jnp.float32)

    @pl.when(k == pl.num_programs(1) - 1)
    def _():
        h = jnp.maximum(acc_ref[...] + b1_ref[...], 0.0)
        # TODO(synk): dropout(p=0.5) is identity at inference (eval semantics).
        logits = jnp.dot(h.astype(w2_ref.dtype), w2_ref[...],
                         preferred_element_type=jnp.float32) + b2_ref[...]
        o_ref[...] = logits.astype(o_ref.dtype)


# ----------------------------------------------------------------------------
# Pallas wrappers
# ----------------------------------------------------------------------------
def _pool_tap_patches(x_nhwc, group_size):
    """(B,H,W,C) -> (4//g, B*Ho*Wo, g*9*C) pool-tap-grouped im2col patches.

    Tap order is (dy,dx) in ((0,0),(0,1),(1,0),(1,1)); within each tap the
    feature order is (kh, kw, cin), matching conv_weight_to_matrix.  Groups of
    `group_size` consecutive taps are concatenated along the feature axis so
    they can be consumed by one block-diagonal matmul.
    """
    B, H, W, C = x_nhwc.shape
    Ho, Wo = H // 2, W // 2
    xp = jnp.pad(x_nhwc, ((0, 0), (1, 1), (1, 1), (0, 0)))
    cols = [xp[:, kh:kh + H, kw:kw + W, :] for kh in range(3) for kw in range(3)]
    patches = jnp.concatenate(cols, axis=-1)                   # (B, H, W, 9C)
    taps = [patches[:, dy::2, dx::2, :].reshape(B * Ho * Wo, 9 * C)
            for dy in (0, 1) for dx in (0, 1)]
    g = group_size
    groups = [jnp.concatenate(taps[t * g:(t + 1) * g], axis=-1)
              for t in range(4 // g)]
    return jnp.stack(groups, axis=0)                           # (T, rows, g*9C)


def conv3x3_relu_pool(x_nhwc, w_diag, b, *, group_size, cout, tile_m=512):
    """Fused 3x3 conv (pad 1) + bias + ReLU + 2x2 maxpool.  NHWC in/out (bf16)."""
    B, H, W, Cin = x_nhwc.shape
    Ho, Wo = H // 2, W // 2
    rows = B * Ho * Wo
    Kg = group_size * 9 * Cin
    T = 4 // group_size
    assert w_diag.shape == (Kg, group_size * cout), w_diag.shape
    P = _pool_tap_patches(x_nhwc.astype(jnp.bfloat16), group_size)
    tm = _pick_row_tile(rows, tile_m)
    kernel = functools.partial(_conv_relu_pool_kernel,
                               n_groups=group_size, cout=cout)
    out = pl.pallas_call(
        kernel,
        out_shape=jax.ShapeDtypeStruct((rows, cout), jnp.bfloat16),
        grid=(rows // tm,),
        in_specs=[
            pl.BlockSpec((T, tm, Kg), lambda i: (0, i, 0)),
            pl.BlockSpec((Kg, group_size * cout), lambda i: (0, 0)),
            pl.BlockSpec((1, cout), lambda i: (0, 0)),
        ],
        out_specs=pl.BlockSpec((tm, cout), lambda i: (i, 0)),
        compiler_params=pltpu.CompilerParams(
            dimension_semantics=("parallel",)),
    )(P, w_diag, b.reshape(1, cout).astype(jnp.float32))
    return out.reshape(B, Ho, Wo, cout)


def mlp_head(x, w1, b1, w2, b2, *, tile_m=512, tile_k=2048):
    """logits = relu(x @ w1 + b1) @ w2 + b2 with K-tiled streaming of w1."""
    M, K = x.shape
    K1, Hd = w1.shape
    Hd2, N = w2.shape
    assert K == K1 and Hd == Hd2
    tm = _pick_row_tile(M, tile_m)
    tk = _pick_lane_tile(K, tile_k)
    grid = (M // tm, K // tk)
    return pl.pallas_call(
        _mlp_head_kernel,
        out_shape=jax.ShapeDtypeStruct((M, N), jnp.float32),
        grid=grid,
        in_specs=[
            pl.BlockSpec((tm, tk), lambda i, k: (i, k)),
            pl.BlockSpec((tk, Hd), lambda i, k: (k, 0)),
            pl.BlockSpec((1, Hd), lambda i, k: (0, 0)),
            pl.BlockSpec((Hd, N), lambda i, k: (0, 0)),
            pl.BlockSpec((1, N), lambda i, k: (0, 0)),
        ],
        out_specs=pl.BlockSpec((tm, N), lambda i, k: (i, 0)),
        scratch_shapes=[pltpu.VMEM((tm, Hd), jnp.float32)],
        compiler_params=pltpu.CompilerParams(
            dimension_semantics=("parallel", "arbitrary")),
    )(x, w1, b1.reshape(1, Hd).astype(jnp.float32),
      w2, b2.reshape(1, N).astype(jnp.float32))


# ----------------------------------------------------------------------------
# Parameter preparation (one-time, outside the forward pass)
# ----------------------------------------------------------------------------
def conv_weight_to_matrix(w_pt):
    """PyTorch conv weight (Cout, Cin, 3, 3) -> im2col matrix (9*Cin, Cout)."""
    cout, cin, _, _ = w_pt.shape
    return jnp.transpose(w_pt, (2, 3, 1, 0)).reshape(9 * cin, cout)


def _blockdiag(w, g):
    """(K, C) -> (g*K, g*C) block-diagonal stack of g copies of w."""
    K, C = w.shape
    out = jnp.zeros((g * K, g * C), w.dtype)
    for i in range(g):
        out = out.at[i * K:(i + 1) * K, i * C:(i + 1) * C].set(w)
    return out


def prepare_params(pt_params):
    """Convert PyTorch-layout params to kernel layouts (and bf16) once."""
    # fc1: PyTorch expects NCHW flatten order (c, h, w) of a (64, 12, 12) map.
    # We feed the NHWC flatten order (h, w, c), so permute fc1's input dim
    # offline; the forward then flattens y2 directly with no transpose.
    w1 = pt_params["fc1_w"].reshape(128, 64, 12, 12)            # (out, c, h, w)
    w1 = jnp.transpose(w1, (2, 3, 1, 0)).reshape(12 * 12 * 64, 128)
    c1 = conv_weight_to_matrix(pt_params["conv1_w"])            # (9, 32)
    c2 = conv_weight_to_matrix(pt_params["conv2_w"])            # (288, 64)
    return {
        "conv1_w": _blockdiag(c1, 4).astype(jnp.bfloat16),      # (36, 128)
        "conv1_b": pt_params["conv1_b"].astype(jnp.float32),
        "conv2_w": _blockdiag(c2, 2).astype(jnp.bfloat16),      # (576, 128)
        "conv2_b": pt_params["conv2_b"].astype(jnp.float32),
        "fc1_w": w1.astype(jnp.bfloat16),                       # (9216, 128)
        "fc1_b": pt_params["fc1_b"].astype(jnp.float32),
        "fc2_w": jnp.transpose(pt_params["fc2_w"]).astype(jnp.bfloat16),  # (128, 7)
        "fc2_b": pt_params["fc2_b"].astype(jnp.float32),
    }


def init_params(key):
    """Random params in PyTorch layouts: conv (Cout,Cin,kh,kw), linear (out,in)."""
    ks = jax.random.split(key, 8)

    def nrm(k, shape, fan_in):
        return (jax.random.normal(k, shape, jnp.float32)
                * jnp.sqrt(2.0 / fan_in)).astype(jnp.float32)

    return {
        "conv1_w": nrm(ks[0], (32, 1, 3, 3), 1 * 9),
        "conv1_b": nrm(ks[1], (32,), 1 * 9),
        "conv2_w": nrm(ks[2], (64, 32, 3, 3), 32 * 9),
        "conv2_b": nrm(ks[3], (64,), 32 * 9),
        "fc1_w": nrm(ks[4], (128, 64 * 12 * 12), 64 * 12 * 12),
        "fc1_b": nrm(ks[5], (128,), 64 * 12 * 12),
        "fc2_w": nrm(ks[6], (7, 128), 128),
        "fc2_b": nrm(ks[7], (7,), 128),
    }


# ----------------------------------------------------------------------------
# Forward pass
# ----------------------------------------------------------------------------
def emotion_cnn_forward(prepared, x_nchw):
    B = x_nchw.shape[0]
    x = jnp.transpose(x_nchw, (0, 2, 3, 1)).astype(jnp.bfloat16)   # NHWC

    # conv1(1->32, 3x3, pad 1) + ReLU + 2x2 maxpool   -> (B, 24, 24, 32)
    y1 = conv3x3_relu_pool(x, prepared["conv1_w"], prepared["conv1_b"],
                           group_size=4, cout=32)

    # conv2(32->64, 3x3, pad 1) + ReLU + 2x2 maxpool  -> (B, 12, 12, 64)
    y2 = conv3x3_relu_pool(y1, prepared["conv2_w"], prepared["conv2_b"],
                           group_size=2, cout=64)

    # Flatten in NHWC order (fc1 rows permuted offline to match PyTorch's
    # NCHW .view ordering), then fused fc1 + ReLU + (dropout=id) + fc2.
    flat = y2.reshape(B, -1)
    return mlp_head(flat, prepared["fc1_w"], prepared["fc1_b"],
                    prepared["fc2_w"], prepared["fc2_b"])


# ----------------------------------------------------------------------------
# Pure-JAX reference (for a correctness check against the PyTorch semantics)
# ----------------------------------------------------------------------------
def reference_forward(pt_params, x_nchw):
    x = x_nchw.astype(jnp.float32)

    def conv(z, w, b):
        y = jax.lax.conv_general_dilated(
            z, w, window_strides=(1, 1), padding=((1, 1), (1, 1)),
            dimension_numbers=("NCHW", "OIHW", "NCHW"))
        return jax.nn.relu(y + b[None, :, None, None])

    def pool(z):
        B, C, H, W = z.shape
        return jnp.max(z.reshape(B, C, H // 2, 2, W // 2, 2), axis=(3, 5))

    y = pool(conv(x, pt_params["conv1_w"], pt_params["conv1_b"]))
    y = pool(conv(y, pt_params["conv2_w"], pt_params["conv2_b"]))
    flat = y.reshape(x.shape[0], -1)                      # NCHW .view order
    h = jax.nn.relu(flat @ pt_params["fc1_w"].T + pt_params["fc1_b"])
    return h @ pt_params["fc2_w"].T + pt_params["fc2_b"]


if __name__ == "__main__":
    key = jax.random.PRNGKey(0)
    pkey, xkey = jax.random.split(key)
    pt_params = init_params(pkey)
    prepared = prepare_params(pt_params)

    # input implied by fc1 (64*12*12): single-channel 48x48 images, batch=2
    x = jax.random.normal(xkey, (2, 1, 48, 48), jnp.float32)

    fwd = jax.jit(emotion_cnn_forward)
    logits = jax.block_until_ready(fwd(prepared, x))

    assert logits.shape == (2, 7), logits.shape
    assert bool(jnp.all(jnp.isfinite(logits)))

    ref = jax.block_until_ready(reference_forward(pt_params, x))
    err = float(jnp.max(jnp.abs(logits - ref)))
    scale = float(jnp.max(jnp.abs(ref)))
    # 3e-2 relative tolerance accounts for bf16 matmul operands (f32 accum).
    assert err <= 3e-2 * max(scale, 1.0), (err, scale)

    print("KERNEL_OK")
</pallas_src>

<mosaic_0001>
module attributes {stable_mosaic.version = 11 : i64} {
  func.func @_conv_relu_pool_kernel(%arg0: i32, %arg1: memref<1x288x36xbf16, #tpu.memory_space<vmem>>, %arg2: memref<36x128xbf16, #tpu.memory_space<vmem>>, %arg3: memref<1x32xf32, #tpu.memory_space<vmem>>, %arg4: memref<288x32xbf16, #tpu.memory_space<vmem>>) attributes {dimension_semantics = [#tpu.dimension_semantics<parallel>], iteration_bounds = array<i64: 4>, scalar_prefetch = 0 : i64, scratch_operands = 0 : i64, tpu.core_type = #tpu.core_type<tc>, window_params = [{transform_indices = @transform_0, window_bounds = array<i64: 1, 288, 36>}, {pipeline_mode = #tpu.pipeline_mode<synchronous>, transform_indices = @transform_1, window_bounds = array<i64: 36, 128>}, {pipeline_mode = #tpu.pipeline_mode<synchronous>, transform_indices = @transform_2, window_bounds = array<i64: 1, 32>}, {transform_indices = @transform_3, window_bounds = array<i64: 288, 32>}]} {
    %c0 = arith.constant 0 : index
    %c0_0 = arith.constant 0 : index
    %0 = vector.load %arg2[%c0, %c0_0] : memref<36x128xbf16, #tpu.memory_space<vmem>>, vector<36x128xbf16>
    %c0_1 = arith.constant 0 : index
    %c0_2 = arith.constant 0 : index
    %c0_3 = arith.constant 0 : index
    %1 = vector.load %arg1[%c0_1, %c0_2, %c0_3] : memref<1x288x36xbf16, #tpu.memory_space<vmem>>, vector<1x288x36xbf16>
    %2 = vector.shape_cast %1 : vector<1x288x36xbf16> to vector<288x36xbf16>
    %cst = arith.constant dense<0.000000e+00> : vector<288x128xf32>
    %3 = tpu.matmul %2, %0, %cst {dimension_numbers = #tpu.dot_dimension_numbers<[1], [0], [0], [1], [0, 0, 1, 1], [], []>} : vector<288x36xbf16>, vector<36x128xbf16>, vector<288x128xf32> -> vector<288x128xf32>
    %4 = vector.extract_strided_slice %3 {offsets = [0, 0], sizes = [288, 32], strides = [1, 1]} : vector<288x128xf32> to vector<288x32xf32>
    %5 = vector.extract_strided_slice %3 {offsets = [0, 32], sizes = [288, 32], strides = [1, 1]} : vector<288x128xf32> to vector<288x32xf32>
    %6 = arith.maximumf %4, %5 : vector<288x32xf32>
    %7 = vector.extract_strided_slice %3 {offsets = [0, 64], sizes = [288, 32], strides = [1, 1]} : vector<288x128xf32> to vector<288x32xf32>
    %8 = arith.maximumf %6, %7 : vector<288x32xf32>
    %9 = vector.extract_strided_slice %3 {offsets = [0, 96], sizes = [288, 32], strides = [1, 1]} : vector<288x128xf32> to vector<288x32xf32>
    %10 = arith.maximumf %8, %9 : vector<288x32xf32>
    %c0_4 = arith.constant 0 : index
    %c0_5 = arith.constant 0 : index
    %11 = vector.load %arg3[%c0_4, %c0_5] : memref<1x32xf32, #tpu.memory_space<vmem>>, vector<1x32xf32>
    %12 = vector.broadcast %11 : vector<1x32xf32> to vector<288x32xf32>
    %13 = arith.addf %10, %12 : vector<288x32xf32>
    %cst_6 = arith.constant 0.000000e+00 : f32
    %14 = vector.broadcast %cst_6 : f32 to vector<288x32xf32>
    %15 = arith.maximumf %13, %14 : vector<288x32xf32>
    %16 = arith.truncf %15 : vector<288x32xf32> to vector<288x32xbf16>
    %c0_7 = arith.constant 0 : index
    %c0_8 = arith.constant 0 : index
    %17 = vector.load %arg4[%c0_7, %c0_8] : memref<288x32xbf16, #tpu.memory_space<vmem>>, vector<288x32xbf16>
    tpu.vector_store %arg4[%c0_7, %c0_8], %16 {strides = array<i32>} : memref<288x32xbf16, #tpu.memory_space<vmem>>, vector<288x32xbf16>,
    return
  }
  func.func @transform_0(%arg0: i32) -> (i32, i32, i32) {
    %c0_i32 = arith.constant 0 : i32
    %c0_i32_0 = arith.constant 0 : i32
    %c0_i32_1 = arith.constant 0 : i32
    return %c0_i32, %arg0, %c0_i32_0 : i32, i32, i32
  }
  func.func @transform_1(%arg0: i32) -> (i32, i32) {
    %c0_i32 = arith.constant 0 : i32
    %c0_i32_0 = arith.constant 0 : i32
    %c0_i32_1 = arith.constant 0 : i32
    return %c0_i32, %c0_i32_0 : i32, i32
  }
  func.func @transform_2(%arg0: i32) -> (i32, i32) {
    %c0_i32 = arith.constant 0 : i32
    %c0_i32_0 = arith.constant 0 : i32
    %c0_i32_1 = arith.constant 0 : i32
    return %c0_i32, %c0_i32_0 : i32, i32
  }
  func.func @transform_3(%arg0: i32) -> (i32, i32) {
    %c0_i32 = arith.constant 0 : i32
    %c0_i32_0 = arith.constant 0 : i32
    return %arg0, %c0_i32 : i32, i32
  }
}

module attributes {stable_mosaic.version = 11 : i64} {
  func.func @_conv_relu_pool_kernel(%arg0: i32, %arg1: memref<2x144x576xbf16, #tpu.memory_space<vmem>>, %arg2: memref<576x128xbf16, #tpu.memory_space<vmem>>, %arg3: memref<1x64xf32, #tpu.memory_space<vmem>>, %arg4: memref<144x64xbf16, #tpu.memory_space<vmem>>) attributes {dimension_semantics = [#tpu.dimension_semantics<parallel>], iteration_bounds = array<i64: 2>, scalar_prefetch = 0 : i64, scratch_operands = 0 : i64, tpu.core_type = #tpu.core_type<tc>, window_params = [{transform_indices = @transform_0, window_bounds = array<i64: 2, 144, 576>}, {pipeline_mode = #tpu.pipeline_mode<synchronous>, transform_indices = @transform_1, window_bounds = array<i64: 576, 128>}, {pipeline_mode = #tpu.pipeline_mode<synchronous>, transform_indices = @transform_2, window_bounds = array<i64: 1, 64>}, {transform_indices = @transform_3, window_bounds = array<i64: 144, 64>}]} {
    %c0 = arith.constant 0 : index
    %c0_0 = arith.constant 0 : index
    %0 = vector.load %arg2[%c0, %c0_0] : memref<576x128xbf16, #tpu.memory_space<vmem>>, vector<576x128xbf16>
    %c0_1 = arith.constant 0 : index
    %c0_2 = arith.constant 0 : index
    %c0_3 = arith.constant 0 : index
    %1 = vector.load %arg1[%c0_1, %c0_2, %c0_3] : memref<2x144x576xbf16, #tpu.memory_space<vmem>>, vector<1x144x576xbf16>
    %2 = vector.shape_cast %1 : vector<1x144x576xbf16> to vector<144x576xbf16>
    %cst = arith.constant dense<0.000000e+00> : vector<144x128xf32>
    %3 = tpu.matmul %2, %0, %cst {dimension_numbers = #tpu.dot_dimension_numbers<[1], [0], [0], [1], [0, 0, 1, 1], [], []>} : vector<144x576xbf16>, vector<576x128xbf16>, vector<144x128xf32> -> vector<144x128xf32>
    %c1 = arith.constant 1 : index
    %c0_4 = arith.constant 0 : index
    %c0_5 = arith.constant 0 : index
    %4 = vector.load %arg1[%c1, %c0_4, %c0_5] : memref<2x144x576xbf16, #tpu.memory_space<vmem>>, vector<1x144x576xbf16>
    %5 = vector.shape_cast %4 : vector<1x144x576xbf16> to vector<144x576xbf16>
    %cst_6 = arith.constant dense<0.000000e+00> : vector<144x128xf32>
    %6 = tpu.matmul %5, %0, %cst_6 {dimension_numbers = #tpu.dot_dimension_numbers<[1], [0], [0], [1], [0, 0, 1, 1], [], []>} : vector<144x576xbf16>, vector<576x128xbf16>, vector<144x128xf32> -> vector<144x128xf32>
    %7 = arith.maximumf %3, %6 : vector<144x128xf32>
    %8 = vector.extract_strided_slice %7 {offsets = [0, 0], sizes = [144, 64], strides = [1, 1]} : vector<144x128xf32> to vector<144x64xf32>
    %9 = vector.extract_strided_slice %7 {offsets = [0, 64], sizes = [144, 64], strides = [1, 1]} : vector<144x128xf32> to vector<144x64xf32>
    %10 = arith.maximumf %8, %9 : vector<144x64xf32>
    %c0_7 = arith.constant 0 : index
    %c0_8 = arith.constant 0 : index
    %11 = vector.load %arg3[%c0_7, %c0_8] : memref<1x64xf32, #tpu.memory_space<vmem>>, vector<1x64xf32>
    %12 = vector.broadcast %11 : vector<1x64xf32> to vector<144x64xf32>
    %13 = arith.addf %10, %12 : vector<144x64xf32>
    %cst_9 = arith.constant 0.000000e+00 : f32
    %14 = vector.broadcast %cst_9 : f32 to vector<144x64xf32>
    %15 = arith.maximumf %13, %14 : vector<144x64xf32>
    %16 = arith.truncf %15 : vector<144x64xf32> to vector<144x64xbf16>
    %c0_10 = arith.constant 0 : index
    %c0_11 = arith.constant 0 : index
    %17 = vector.load %arg4[%c0_10, %c0_11] : memref<144x64xbf16, #tpu.memory_space<vmem>>, vector<144x64xbf16>
    tpu.vector_store %arg4[%c0_10, %c0_11], %16 {strides = array<i32>} : memref<144x64xbf16, #tpu.memory_space<vmem>>, vector<144x64xbf16>,
    return
  }
  func.func @transform_0(%arg0: i32) -> (i32, i32, i32) {
    %c0_i32 = arith.constant 0 : i32
    %c0_i32_0 = arith.constant 0 : i32
    %c0_i32_1 = arith.constant 0 : i32
    return %c0_i32, %arg0, %c0_i32_0 : i32, i32, i32
  }
  func.func @transform_1(%arg0: i32) -> (i32, i32) {
    %c0_i32 = arith.constant 0 : i32
    %c0_i32_0 = arith.constant 0 : i32
    %c0_i32_1 = arith.constant 0 : i32
    return %c0_i32, %c0_i32_0 : i32, i32
  }
  func.func @transform_2(%arg0: i32) -> (i32, i32) {
    %c0_i32 = arith.constant 0 : i32
    %c0_i32_0 = arith.constant 0 : i32
    %c0_i32_1 = arith.constant 0 : i32
    return %c0_i32, %c0_i32_0 : i32, i32
  }
  func.func @transform_3(%arg0: i32) -> (i32, i32) {
    %c0_i32 = arith.constant 0 : i32
    %c0_i32_0 = arith.constant 0 : i32
    return %arg0, %c0_i32 : i32, i32
  }
}

module attributes {stable_mosaic.version = 11 : i64} {
  func.func @_mlp_head_kernel(%arg0: i32, %arg1: i32, %arg2: memref<2x1536xbf16, #tpu.memory_space<vmem>>, %arg3: memref<1536x128xbf16, #tpu.memory_space<vmem>>, %arg4: memref<1x128xf32, #tpu.memory_space<vmem>>, %arg5: memref<128x7xbf16, #tpu.memory_space<vmem>>, %arg6: memref<1x7xf32, #tpu.memory_space<vmem>>, %arg7: memref<2x7xf32, #tpu.memory_space<vmem>>, %arg8: memref<2x128xf32, #tpu.memory_space<vmem>>) attributes {dimension_semantics = [#tpu.dimension_semantics<parallel>, #tpu.dimension_semantics<arbitrary>], iteration_bounds = array<i64: 1, 6>, scalar_prefetch = 0 : i64, scratch_operands = 1 : i64, tpu.core_type = #tpu.core_type<tc>, window_params = [{transform_indices = @transform_0, window_bounds = array<i64: 2, 1536>}, {transform_indices = @transform_1, window_bounds = array<i64: 1536, 128>}, {pipeline_mode = #tpu.pipeline_mode<synchronous>, transform_indices = @transform_2, window_bounds = array<i64: 1, 128>}, {pipeline_mode = #tpu.pipeline_mode<synchronous>, transform_indices = @transform_3, window_bounds = array<i64: 128, 7>}, {pipeline_mode = #tpu.pipeline_mode<synchronous>, transform_indices = @transform_4, window_bounds = array<i64: 1, 7>}, {transform_indices = @transform_5, window_bounds = array<i64: 2, 7>}]} {
    %c0_i32 = arith.constant 0 : i32
    %0 = arith.cmpi eq, %arg1, %c0_i32 : i32
    %1 = arith.extui %0 : i1 to i32
    %c0_i32_0 = arith.constant 0 : i32
    %2 = arith.cmpi ne, %1, %c0_i32_0 : i32
    scf.if %2 {
      %cst_9 = arith.constant 0.000000e+00 : f32
      %12 = vector.broadcast %cst_9 : f32 to vector<2x128xf32>
      %c0_10 = arith.constant 0 : index
      %c0_11 = arith.constant 0 : index
      %13 = vector.load %arg8[%c0_10, %c0_11] : memref<2x128xf32, #tpu.memory_space<vmem>>, vector<2x128xf32>
      tpu.vector_store %arg8[%c0_10, %c0_11], %12 {strides = array<i32>} : memref<2x128xf32, #tpu.memory_space<vmem>>, vector<2x128xf32>,
    } else {
    }
    %c0 = arith.constant 0 : index
    %c0_1 = arith.constant 0 : index
    %3 = vector.load %arg8[%c0, %c0_1] : memref<2x128xf32, #tpu.memory_space<vmem>>, vector<2x128xf32>
    %c0_2 = arith.constant 0 : index
    %c0_3 = arith.constant 0 : index
    %4 = vector.load %arg2[%c0_2, %c0_3] : memref<2x1536xbf16, #tpu.memory_space<vmem>>, vector<2x1536xbf16>
    %c0_4 = arith.constant 0 : index
    %c0_5 = arith.constant 0 : index
    %5 = vector.load %arg3[%c0_4, %c0_5] : memref<1536x128xbf16, #tpu.memory_space<vmem>>, vector<1536x128xbf16>
    %cst = arith.constant dense<0.000000e+00> : vector<2x128xf32>
    %6 = tpu.matmul %4, %5, %cst {dimension_numbers = #tpu.dot_dimension_numbers<[1], [0], [0], [1], [0, 0, 1, 1], [], []>} : vector<2x1536xbf16>, vector<1536x128xbf16>, vector<2x128xf32> -> vector<2x128xf32>
    %7 = arith.addf %3, %6 : vector<2x128xf32>
    %c0_6 = arith.constant 0 : index
    %c0_7 = arith.constant 0 : index
    %8 = vector.load %arg8[%c0_6, %c0_7] : memref<2x128xf32, #tpu.memory_space<vmem>>, vector<2x128xf32>
    tpu.vector_store %arg8[%c0_6, %c0_7], %7 {strides = array<i32>} : memref<2x128xf32, #tpu.memory_space<vmem>>, vector<2x128xf32>,
    %c5_i32 = arith.constant 5 : i32
    %9 = arith.cmpi eq, %arg1, %c5_i32 : i32
    %10 = arith.extui %9 : i1 to i32
    %c0_i32_8 = arith.constant 0 : i32
    %11 = arith.cmpi ne, %10, %c0_i32_8 : i32
    scf.if %11 {
      %c0_9 = arith.constant 0 : index
      %c0_10 = arith.constant 0 : index
      %12 = vector.load %arg8[%c0_9, %c0_10] : memref<2x128xf32, #tpu.memory_space<vmem>>, vector<2x128xf32>
      %c0_11 = arith.constant 0 : index
      %c0_12 = arith.constant 0 : index
      %13 = vector.load %arg4[%c0_11, %c0_12] : memref<1x128xf32, #tpu.memory_space<vmem>>, vector<1x128xf32>
      %14 = vector.broadcast %13 : vector<1x128xf32> to vector<2x128xf32>
      %15 = arith.addf %12, %14 : vector<2x128xf32>
      %cst_13 = arith.constant 0.000000e+00 : f32
      %16 = vector.broadcast %cst_13 : f32 to vector<2x128xf32>
      %17 = arith.maximumf %15, %16 : vector<2x128xf32>
      %18 = arith.truncf %17 : vector<2x128xf32> to vector<2x128xbf16>
      %c0_14 = arith.constant 0 : index
      %c0_15 = arith.constant 0 : index
      %19 = vector.load %arg5[%c0_14, %c0_15] : memref<128x7xbf16, #tpu.memory_space<vmem>>, vector<128x7xbf16>
      %cst_16 = arith.constant dense<0.000000e+00> : vector<2x7xf32>
      %20 = tpu.matmul %18, %19, %cst_16 {dimension_numbers = #tpu.dot_dimension_numbers<[1], [0], [0], [1], [0, 0, 1, 1], [], []>} : vector<2x128xbf16>, vector<128x7xbf16>, vector<2x7xf32> -> vector<2x7xf32>
      %c0_17 = arith.constant 0 : index
      %c0_18 = arith.constant 0 : index
      %21 = vector.load %arg6[%c0_17, %c0_18] : memref<1x7xf32, #tpu.memory_space<vmem>>, vector<1x7xf32>
      %22 = vector.broadcast %21 : vector<1x7xf32> to vector<2x7xf32>
      %23 = arith.addf %20, %22 : vector<2x7xf32>
      %c0_19 = arith.constant 0 : index
      %c0_20 = arith.constant 0 : index
      %24 = vector.load %arg7[%c0_19, %c0_20] : memref<2x7xf32, #tpu.memory_space<vmem>>, vector<2x7xf32>
      tpu.vector_store %arg7[%c0_19, %c0_20], %23 {strides = array<i32>} : memref<2x7xf32, #tpu.memory_space<vmem>>, vector<2x7xf32>,
    } else {
    }
    return
  }
  func.func @transform_0(%arg0: i32, %arg1: i32) -> (i32, i32) {
    %c0_i32 = arith.constant 0 : i32
    return %arg0, %arg1 : i32, i32
  }
  func.func @transform_1(%arg0: i32, %arg1: i32) -> (i32, i32) {
    %c0_i32 = arith.constant 0 : i32
    %c0_i32_0 = arith.constant 0 : i32
    return %arg1, %c0_i32 : i32, i32
  }
  func.func @transform_2(%arg0: i32, %arg1: i32) -> (i32, i32) {
    %c0_i32 = arith.constant 0 : i32
    %c0_i32_0 = arith.constant 0 : i32
    %c0_i32_1 = arith.constant 0 : i32
    return %c0_i32, %c0_i32_0 : i32, i32
  }
  func.func @transform_3(%arg0: i32, %arg1: i32) -> (i32, i32) {
    %c0_i32 = arith.constant 0 : i32
    %c0_i32_0 = arith.constant 0 : i32
    %c0_i32_1 = arith.constant 0 : i32
    return %c0_i32, %c0_i32_0 : i32, i32
  }
  func.func @transform_4(%arg0: i32, %arg1: i32) -> (i32, i32) {
    %c0_i32 = arith.constant 0 : i32
    %c0_i32_0 = arith.constant 0 : i32
    %c0_i32_1 = arith.constant 0 : i32
    return %c0_i32, %c0_i32_0 : i32, i32
  }
  func.func @transform_5(%arg0: i32, %arg1: i32) -> (i32, i32) {
    %c0_i32 = arith.constant 0 : i32
    %c0_i32_0 = arith.constant 0 : i32
    return %arg0, %c0_i32 : i32, i32
  }
}

</mosaic_0001>

<bundles_post_ra>
// kernel: emotion_cnn_forward.3
= control target key start
LH: loop header
LB: loop body
LE: loop exit
PB: predicated region body
PF: predicated region fallthrough
CT: control target
= control target key end

     0   :  { %s1596_s12 = smov 0   ;;  %s2118_s0 = inlined_call_operand.vmem [shape: bf16[1,1152,36], index: 0, kind: input, shape index: {}]   ;;  %s2119_s1 = inlined_call_operand.vmem [shape: bf16[36,128], index: 1, kind: input, shape index: {}]   ;;  %s2120_s2 = inlined_call_operand.vmem [shape: f32[1,32], index: 2, kind: input, shape index: {}]   ;;  %s2121_s3 = inlined_call_operand.vmem [shape: bf16[1152,32], index: 3, kind: output, shape index: {}]  }
   0x1 LB: > { %s1341_s13 = sadd.s32 4294967295, %s1571_s12   ;;  %p1345_p0 = scmp.ge.s32.totalorder %s1571_s12, 1  ;;  %s1571_s12 = sphi %s1596_s12, %s13_s12  }
   0x2   : > { %p138_p1 = scmp.lt.s32.totalorder %s1571_s12, 5 }
   0x4   : > { %p139_p2 = pnand %p1345_p0, %p138_p1 }
   0x5   : > { %v1544_v0 = vld [vmem:[%s2119_s1] sm:$0xff] (!%p139_p2)   ;;  %v1545_v1 = vld [vmem:[%s2119_s1 + $0x8] sm:$0xff] (!%p139_p2)   ;;  %s162_s18 = smul.u32 (!%p139_p2), 36, %s1341_s13  ;;  %v1546_v2 = vld [vmem:[%s2119_s1 + $0x10] ss:$0 sps:$4 sm:$0x33] (!%p139_p2)  }
   0x6   : > { %142 = sbr.rel (%p139_p2) target bundleno = 566 (0x236), region = 32  ;;  %1483 = vmatprep.subr.bf16.mxu0 (!%p139_p2), %v1544_v0  ;;  %1525 = vmatprep.subr.bf16.mxu1 (!%p139_p2), %v1544_v0  ;;  %vm376_vm0 = vcmask (!%p139_p2), 1041408   ;;  %vm321_vm1 = vcmask (!%p139_p2), 293888   ;;  %s1573_s25 = smov (!%p139_p2), 96   ;;  %vm1248_vm2 = vcmask (!%p139_p2), 257024  }
   0x7   : > { %1484 = vmatpush3.bf16.msra.mxu0 (!%p139_p2), %v1544_v0  ;;  %1528 = vmatpush3.bf16.msra.mxu1 (!%p139_p2), %v1544_v0  ;;  %p163_p3 = scmp.lt.s32.totalorder (!%p139_p2), %s162_s18, 143  ;;  %v378_v3 = vsel (!%p139_p2), %vm376_vm0, %v1546_v2, 0  ;;  %s1574_s26 = smov (!%p139_p2), 64  }
   0x8   : > { %1485 = vmatprep.subr.bf16.mxu0 (!%p139_p2), %v1545_v1  ;;  %1526 = vmatprep.subr.bf16.mxu1 (!%p139_p2), %v1545_v1  ;;  %s1575_s27 = smov (!%p139_p2), 32  }
   0xb   : > { %1486 = vmatpush3.bf16.msra.mxu0 (!%p139_p2), %v1545_v1  ;;  %1529 = vmatpush3.bf16.msra.mxu1 (!%p139_p2), %v1545_v1 }
   0xc   : > { %1531 = vmatprep.subr.msk.bf16.mxu0 (!%p139_p2), %vm376_vm0, %v1546_v2  ;;  %1532 = vmatprep.subr.msk.bf16.mxu1 (!%p139_p2), %vm376_vm0, %v1546_v2  ;;  %v1863_v2 = vld [vmem:[%s2120_s2] ss:$0 sm:$0xff] (!%p139_p2) }
   0xd   : > { %s2123_s18 = smov (!%p163_p3, %s162_s18), 143 }
   0xe   : > { %s1346_s21 = sshll.u32 %s2123_s18, 2 }
   0xf   : > { %s1621_s24 = scalar_lea.vmem %s2118_s0, %s1346_s21  ;;  %1488 = vmatpush3.bf16.msra.mxu0 %v378_v3  ;;  %1530 = vmatpush3.bf16.msra.mxu1 %v378_v3  ;;  %s1877_s5 = scalar_lea.vmem %s2121_s3, %s1346_s21 }
  0x10   : > { %v1547_v4 = vld [vmem:[%s1621_s24] sm:$0xff]   ;;  %v1548_v5 = vld [vmem:[%s1621_s24 + $0x50] sm:$0xff]   ;;  %v1549_v6 = vld [vmem:[%s1621_s24 + $0x8] sm:$0xff]  }
  0x11   : > { %1489 = vmatprep.mubr.msk.bf16.mxu0 %vm321_vm1, %v1547_v4  ;;  %1509 = vmatprep.mubr.msk.bf16.mxu1 %vm321_vm1, %v1548_v5  ;;  %v1550_v7 = vld [vmem:[%s1621_s24 + $0x58] sm:$0xff]   ;;  %v1551_v8 = vld [vmem:[%s1621_s24 + $0x10] sm:$0xff]   ;;  %v1553_v9 = vld [vmem:[%s1621_s24 + $0x60] sm:$0xff]  }
  0x12   : > { %1490 = vmatmul.mubr.msk.bf16.vlgmr.msra.gmra.mrb[0].mxu0 %vm321_vm1, %v1549_v6  ;;  %1510 = vmatmul.mubr.msk.bf16.vlgmr.msra.gmra.mrb[0].mxu1 %vm321_vm1, %v1550_v7  ;;  %v1552_v10 = vld [vmem:[%s1621_s24 + $0x18] sm:$0xff]   ;;  %v1554_v11 = vld [vmem:[%s1621_s24 + $0x68] sm:$0xff]   ;;  %v1555_v12 = vld [vmem:[%s1621_s24 + $0x20] sm:$0xff]  }
  0x13   : > { %1493 = vmatprep.mubr.msk.bf16.mxu0 %vm321_vm1, %v1551_v8  ;;  %1513 = vmatprep.mubr.msk.bf16.mxu1 %vm321_vm1, %v1553_v9  ;;  %v1557_v13 = vld [vmem:[%s1621_s24 + $0x70] sm:$0xff]   ;;  %v1556_v14 = vld [vmem:[%s1621_s24 + $0x28] sm:$0xff]   ;;  %v1558_v15 = vld [vmem:[%s1621_s24 + $0x78] sm:$0xff]  }
  0x14   : > { %v1559_v16 = vld [vmem:[%s1621_s24 + $0x30] sm:$0xff]   ;;  %v1561_v17 = vld [vmem:[%s1621_s24 + $0x80] sm:$0xff]   ;;  %v1560_v18 = vld [vmem:[%s1621_s24 + $0x38] sm:$0xff]  }
  0x15   : > { %v1562_v19 = vld [vmem:[%s1621_s24 + $0x88] sm:$0xff]   ;;  %v1563_v20 = vld [vmem:[%s1621_s24 + $0x40] sm:$0xff]  }
  0x16   : > { %v1564_v21 = vld [vmem:[%s1621_s24 + $0x48] sm:$0xff]  }
  0x1a   : > { %1494 = vmatmul.mubr.msk.bf16.gmra.mrb[4].mxu0 %vm321_vm1, %v1552_v10  ;;  %1514 = vmatmul.mubr.msk.bf16.gmra.mrb[4].mxu1 %vm321_vm1, %v1554_v11 }
  0x1b   : > { %1497 = vmatprep.mubr.msk.bf16.mxu0 %vm321_vm1, %v1555_v12  ;;  %1517 = vmatprep.mubr.msk.bf16.mxu1 %vm321_vm1, %v1557_v13 }
  0x22   : > { %1498 = vmatmul.mubr.msk.bf16.gmra.mrb[8].mxu0 %vm321_vm1, %v1556_v14  ;;  %1518 = vmatmul.mubr.msk.bf16.gmra.mrb[8].mxu1 %vm321_vm1, %v1558_v15 }
  0x23   : > { %1501 = vmatprep.mubr.msk.bf16.mxu0 %vm321_vm1, %v1559_v16  ;;  %1521 = vmatprep.mubr.msk.bf16.mxu1 %vm321_vm1, %v1561_v17 }
  0x2a   : > { %1502 = vmatmul.mubr.msk.bf16.gmra.mrb[12].mxu0 %vm321_vm1, %v1560_v18  ;;  %1522 = vmatmul.mubr.msk.bf16.gmra.mrb[12].mxu1 %vm321_vm1, %v1562_v19 }
  0x2b   : > { %1505 = vmatprep.mubr.msk.bf16.mxu0 %vm321_vm1, %v1563_v20 }
  0x32   : > { %1506 = vmatmul.mubr.msk.bf16.gmra.mrb[16].mxu0 %vm321_vm1, %v1564_v21 }
  0xe5   : > { %v1659_v22 = vpop.f32.mrb[0].mxu0  ;;  %v1661_v23 = vpop.f32.mrb[0].mxu1 }
  0xe6   : > { %637 = vrot.lane.b32.xlu0 %v1661_v23, %s1573_s25  ;;  %v1665_v24 = vpop.f32.mrb[1].mxu1  ;;  %597 = vrot.lane.b32.xlu1 %v1659_v22, %s1573_s25  ;;  %v1669_v25 = vpop.f32.mrb[1].mxu0 }
  0xe7   : > { %v1671_v26 = vpop.f32.mrb[2].mxu0  ;;  %v1673_v27 = vpop.f32.mrb[2].mxu1 }
  0xe8   : > { %v1675_v28 = vpop.f32.mrb[3].mxu0  ;;  %v1677_v29 = vpop.f32.mrb[3].mxu1 }
  0xea   : > { %741 = vrot.lane.b32.xlu0 %v1659_v22, %s1574_s26  ;;  %599 = vrot.lane.b32.xlu1 %v1671_v26, %s1573_s25 }
  0xed   : > { %v1683_v30 = vpop.f32.mrb[4].mxu0  ;;  %v1685_v31 = vpop.f32.mrb[4].mxu1 }
  0xee   : > { %781 = vrot.lane.b32.xlu0 %v1661_v23, %s1574_s26  ;;  %639 = vrot.lane.b32.xlu1 %v1673_v27, %s1573_s25  ;;  %v1691_v32 = vpop.f32.mrb[5].mxu0  ;;  %v1693_v33 = vpop.f32.mrb[5].mxu1 }
  0xef   : > { %v1695_v34 = vpop.f32.mrb[6].mxu0  ;;  %v1697_v35 = vpop.f32.mrb[6].mxu1 }
  0xf0   : > { %v1699_v36 = vpop.f32.mrb[7].mxu0  ;;  %v1701_v37 = vpop.f32.mrb[7].mxu1 }
  0xf2   : > { %885 = vrot.lane.b32.xlu0 %v1659_v22, %s1575_s27  ;;  %743 = vrot.lane.b32.xlu1 %v1671_v26, %s1574_s26 }
  0xf5   : > { %v1707_v38 = vpop.f32.mrb[8].mxu0  ;;  %v1709_v39 = vpop.f32.mrb[8].mxu1 }
  0xf6   : > { %925 = vrot.lane.b32.xlu0 %v1661_v23, %s1575_s27  ;;  %783 = vrot.lane.b32.xlu1 %v1673_v27, %s1574_s26  ;;  %v1715_v40 = vpop.f32.mrb[9].mxu0  ;;  %v1717_v41 = vpop.f32.mrb[9].mxu1 }
  0xf7   : > { %v1719_v42 = vpop.f32.mrb[10].mxu0  ;;  %v1721_v43 = vpop.f32.mrb[10].mxu1 }
  0xf8   : > { %v1723_v44 = vpop.f32.mrb[11].mxu0  ;;  %v1725_v45 = vpop.f32.mrb[11].mxu1 }
  0xfa   : > { %593 = vrot.lane.b32.xlu0 %v1669_v25, %s1573_s25  ;;  %887 = vrot.lane.b32.xlu1 %v1671_v26, %s1575_s27 }
  0xfd   : > { %v1731_v46 = vpop.f32.mrb[12].mxu0  ;;  %v1733_v47 = vpop.f32.mrb[12].mxu1 }
  0xfe   : > { %633 = vrot.lane.b32.xlu0 %v1665_v24, %s1573_s25  ;;  %927 = vrot.lane.b32.xlu1 %v1673_v27, %s1575_s27  ;;  %v1739_v48 = vpop.f32.mrb[13].mxu0  ;;  %v1741_v49 = vpop.f32.mrb[13].mxu1 }
  0xff   : > { %v1743_v50 = vpop.f32.mrb[14].mxu0  ;;  %v1745_v51 = vpop.f32.mrb[14].mxu1 }
 0x100   : > { %v1747_v52 = vpop.f32.mrb[15].mxu0  ;;  %v1749_v53 = vpop.f32.mrb[15].mxu1 }
 0x102   : > { %737 = vrot.lane.b32.xlu0 %v1669_v25, %s1574_s26  ;;  %635 = vrot.lane.b32.xlu1 %v1677_v29, %s1573_s25 }
 0x105   : > { %v1779_v54 = vpop.f32.mrb[16].mxu0 }
 0x106   : > { %777 = vrot.lane.b32.xlu0 %v1665_v24, %s1574_s26  ;;  %739 = vrot.lane.b32.xlu1 %v1675_v28, %s1574_s26  ;;  %v1781_v55 = vpop.f32.mrb[17].mxu0 }
 0x107   : > { %v1787_v56 = vpop.f32.mrb[18].mxu0 }
 0x108   : > { %v1789_v57 = vpop.f32.mrb[19].mxu0 }
 0x10a   : > { %881 = vrot.lane.b32.xlu0 %v1669_v25, %s1575_s27  ;;  %779 = vrot.lane.b32.xlu1 %v1677_v29, %s1574_s26 }
 0x10e   : > { %921 = vrot.lane.b32.xlu0 %v1665_v24, %s1575_s27  ;;  %883 = vrot.lane.b32.xlu1 %v1675_v28, %s1575_s27 }
 0x112   : > { %923 = vrot.lane.b32.xlu1 %v1677_v29, %s1575_s27  ;;  %595 = vrot.lane.b32.xlu0 %v1675_v28, %s1573_s25 }
 0x116   : > { %605 = vrot.lane.b32.xlu0 %v1683_v30, %s1573_s25  ;;  %607 = vrot.lane.b32.xlu1 %v1695_v34, %s1573_s25 }
 0x11a   : > { %645 = vrot.lane.b32.xlu0 %v1685_v31, %s1573_s25  ;;  %647 = vrot.lane.b32.xlu1 %v1697_v35, %s1573_s25 }
 0x11e   : > { %749 = vrot.lane.b32.xlu0 %v1683_v30, %s1574_s26  ;;  %751 = vrot.lane.b32.xlu1 %v1695_v34, %s1574_s26 }
 0x122   : > { %789 = vrot.lane.b32.xlu0 %v1685_v31, %s1574_s26  ;;  %791 = vrot.lane.b32.xlu1 %v1697_v35, %s1574_s26 }
 0x126   : > { %893 = vrot.lane.b32.xlu0 %v1683_v30, %s1575_s27  ;;  %895 = vrot.lane.b32.xlu1 %v1695_v34, %s1575_s27 }
 0x12a   : > { %933 = vrot.lane.b32.xlu0 %v1685_v31, %s1575_s27  ;;  %935 = vrot.lane.b32.xlu1 %v1697_v35, %s1575_s27 }
 0x12e   : > { %601 = vrot.lane.b32.xlu0 %v1691_v32, %s1573_s25  ;;  %603 = vrot.lane.b32.xlu1 %v1699_v36, %s1573_s25 }
 0x132   : > { %641 = vrot.lane.b32.xlu0 %v1693_v33, %s1573_s25  ;;  %643 = vrot.lane.b32.xlu1 %v1701_v37, %s1573_s25 }
 0x136   : > { %745 = vrot.lane.b32.xlu0 %v1691_v32, %s1574_s26  ;;  %747 = vrot.lane.b32.xlu1 %v1699_v36, %s1574_s26 }
 0x13a   : > { %785 = vrot.lane.b32.xlu0 %v1693_v33, %s1574_s26  ;;  %787 = vrot.lane.b32.xlu1 %v1701_v37, %s1574_s26 }
 0x13e   : > { %889 = vrot.lane.b32.xlu0 %v1691_v32, %s1575_s27  ;;  %891 = vrot.lane.b32.xlu1 %v1699_v36, %s1575_s27 }
 0x142   : > { %929 = vrot.lane.b32.xlu0 %v1693_v33, %s1575_s27  ;;  %931 = vrot.lane.b32.xlu1 %v1701_v37, %s1575_s27 }
 0x146   : > { %613 = vrot.lane.b32.xlu0 %v1707_v38, %s1573_s25  ;;  %615 = vrot.lane.b32.xlu1 %v1719_v42, %s1573_s25 }
 0x14a   : > { %653 = vrot.lane.b32.xlu0 %v1709_v39, %s1573_s25  ;;  %655 = vrot.lane.b32.xlu1 %v1721_v43, %s1573_s25 }
 0x14e   : > { %757 = vrot.lane.b32.xlu0 %v1707_v38, %s1574_s26  ;;  %759 = vrot.lane.b32.xlu1 %v1719_v42, %s1574_s26 }
 0x152   : > { %797 = vrot.lane.b32.xlu0 %v1709_v39, %s1574_s26  ;;  %799 = vrot.lane.b32.xlu1 %v1721_v43, %s1574_s26 }
 0x156   : > { %901 = vrot.lane.b32.xlu0 %v1707_v38, %s1575_s27  ;;  %903 = vrot.lane.b32.xlu1 %v1719_v42, %s1575_s27 }
 0x158   : > { %v638_v58 = vpop.permute.xlu0 %637  ;;  %v598_v59 = vpop.permute.xlu1 %597 }
 0x159   : > { %v703_v0 = vmax.f32 %v1659_v22, %v598_v59  ;;  %v723_v5 = vmax.f32 %v1661_v23, %v638_v58 }
 0x15a   : > { %941 = vrot.lane.b32.xlu0 %v1709_v39, %s1575_s27  ;;  %943 = vrot.lane.b32.xlu1 %v1721_v43, %s1575_s27 }
 0x15c   : > { %v742_v60 = vpop.permute.xlu0 %741  ;;  %v600_v61 = vpop.permute.xlu1 %599 }
 0x15d   : > { %v847_v1 = vmax.f32 %v703_v0, %v742_v60  ;;  %v704_v11 = vmax.f32 %v1671_v26, %v600_v61 }
 0x15e   : > { %609 = vrot.lane.b32.xlu0 %v1715_v40, %s1573_s25  ;;  %611 = vrot.lane.b32.xlu1 %v1723_v44, %s1573_s25 }
 0x160   : > { %v782_v62 = vpop.permute.xlu0 %781  ;;  %v640_v63 = vpop.permute.xlu1 %639 }
 0x161   : > { %v867_v7 = vmax.f32 %v723_v5, %v782_v62  ;;  %v724_v19 = vmax.f32 %v1673_v27, %v640_v63 }
 0x162   : > { %649 = vrot.lane.b32.xlu0 %v1717_v41, %s1573_s25  ;;  %651 = vrot.lane.b32.xlu1 %v1725_v45, %s1573_s25 }
 0x164   : > { %v886_v3 = vpop.permute.xlu0 %885  ;;  %v744_v4 = vpop.permute.xlu1 %743 }
 0x165   : > { %v991_v6 = vmax.f32 %v847_v1, %v886_v3  ;;  %v848_v15 = vmax.f32 %v704_v11, %v744_v4 }
 0x166   : > { %753 = vrot.lane.b32.xlu0 %v1715_v40, %s1574_s26  ;;  %755 = vrot.lane.b32.xlu1 %v1723_v44, %s1574_s26 }
 0x167   : > { %v1034_v8 = vadd.f32 %v1863_v2, %v991_v6 }
 0x168   : > { %v926_v9 = vpop.permute.xlu0 %925  ;;  %v784_v10 = vpop.permute.xlu1 %783 }
 0x169   : > { %v1070_v12 = vmax.f32 %v1034_v8, 0.0  ;;  %v1011_v13 = vmax.f32 %v867_v7, %v926_v9  ;;  %v868_v23 = vmax.f32 %v724_v19, %v784_v10 }
 0x16a   : > { %793 = vrot.lane.b32.xlu0 %v1717_v41, %s1574_s26  ;;  %795 = vrot.lane.b32.xlu1 %v1725_v45, %s1574_s26 }
 0x16b   : > { %v1428_v14 = vpack.c.bf16 %v1070_v12, %v1070_v12  ;;  %v1054_v16 = vadd.f32 %v1863_v2, %v1011_v13 }
 0x16c   : > { %v594_v17 = vpop.permute.xlu0 %593  ;;  %v888_v18 = vpop.permute.xlu1 %887 }
 0x16d   : > { %1251 = vst.msk [vmem:[%s1877_s5 + $0x8] sm:$0xf] %vm1248_vm2, %v1428_v14  ;;  %v1090_v20 = vmax.f32 %v1054_v16, 0.0  ;;  %v992_v21 = vmax.f32 %v848_v15, %v888_v18  ;;  %v701_v6 = vmax.f32 %v1669_v25, %v594_v17 }
 0x16e   : > { %897 = vrot.lane.b32.xlu0 %v1715_v40, %s1575_s27  ;;  %899 = vrot.lane.b32.xlu1 %v1723_v44, %s1575_s27 }
 0x16f   : > { %v1448_v22 = vpack.c.bf16 %v1090_v20, %v1090_v20  ;;  %v1035_v26 = vadd.f32 %v1863_v2, %v992_v21 }
 0x170   : > { %v634_v58 = vpop.permute.xlu0 %633  ;;  %v928_v59 = vpop.permute.xlu1 %927 }
 0x171   : > { %1271 = vst.msk [vmem:[%s1877_s5 + $0x58] sm:$0xf] %vm1248_vm2, %v1448_v22  ;;  %v1071_v27 = vmax.f32 %v1035_v26, 0.0  ;;  %v1012_v60 = vmax.f32 %v868_v23, %v928_v59  ;;  %v721_v10 = vmax.f32 %v1665_v24, %v634_v58 }
 0x172   : > { %937 = vrot.lane.b32.xlu0 %v1717_v41, %s1575_s27  ;;  %939 = vrot.lane.b32.xlu1 %v1725_v45, %s1575_s27 }
 0x173   : > { %v1429_v61 = vpack.c.bf16 %v1071_v27, %v1071_v27  ;;  %v1055_v62 = vadd.f32 %v1863_v2, %v1012_v60 }
 0x174   : > { %v738_v63 = vpop.permute.xlu0 %737  ;;  %v636_v0 = vpop.permute.xlu1 %635 }
 0x175   : > { %1252 = vst.msk [vmem:[%s1877_s5 + $0xc] sm:$0xf] %vm1248_vm2, %v1429_v61  ;;  %v1091_v1 = vmax.f32 %v1055_v62, 0.0  ;;  %v845_v7 = vmax.f32 %v701_v6, %v738_v63  ;;  %v722_v15 = vmax.f32 %v1677_v29, %v636_v0 }
 0x176   : > { %621 = vrot.lane.b32.xlu0 %v1731_v46, %s1573_s25  ;;  %623 = vrot.lane.b32.xlu1 %v1743_v50, %s1573_s25 }
 0x177   : > { %v1449_v3 = vpack.c.bf16 %v1091_v1, %v1091_v1 }
 0x178   : > { %v778_v4 = vpop.permute.xlu0 %777  ;;  %v740_v5 = vpop.permute.xlu1 %739 }
 0x179   : > { %1272 = vst.msk [vmem:[%s1877_s5 + $0x5c] sm:$0xf] %vm1248_vm2, %v1449_v3  ;;  %v865_v25 = vmax.f32 %v721_v10, %v778_v4 }
 0x17a   : > { %661 = vrot.lane.b32.xlu0 %v1733_v47, %s1573_s25  ;;  %663 = vrot.lane.b32.xlu1 %v1745_v51, %s1573_s25 }
 0x17c   : > { %v882_v8 = vpop.permute.xlu0 %881  ;;  %v780_v9 = vpop.permute.xlu1 %779 }
 0x17d   : > { %v989_v11 = vmax.f32 %v845_v7, %v882_v8  ;;  %v866_v18 = vmax.f32 %v722_v15, %v780_v9 }
 0x17e   : > { %765 = vrot.lane.b32.xlu0 %v1731_v46, %s1574_s26  ;;  %767 = vrot.lane.b32.xlu1 %v1743_v50, %s1574_s26 }
 0x17f   : > { %v1032_v12 = vadd.f32 %v1863_v2, %v989_v11 }
 0x180   : > { %v922_v13 = vpop.permute.xlu0 %921  ;;  %v884_v14 = vpop.permute.xlu1 %883 }
 0x181   : > { %v1068_v16 = vmax.f32 %v1032_v12, 0.0  ;;  %v1009_v17 = vmax.f32 %v865_v25, %v922_v13 }
 0x182   : > { %805 = vrot.lane.b32.xlu0 %v1733_v47, %s1574_s26  ;;  %807 = vrot.lane.b32.xlu1 %v1745_v51, %s1574_s26 }
 0x183   : > { %v1426_v24 = vpack.c.bf16 %v1068_v16, %v1068_v16  ;;  %v1052_v19 = vadd.f32 %v1863_v2, %v1009_v17 }
 0x184   : > { %v924_v20 = vpop.permute.xlu1 %923  ;;  %v596_v21 = vpop.permute.xlu0 %595 }
 0x185   : > { %1249 = vst.msk [vmem:[%s1877_s5] sm:$0xf] %vm1248_vm2, %v1426_v24  ;;  %v1088_v22 = vmax.f32 %v1052_v19, 0.0  ;;  %v1010_v23 = vmax.f32 %v866_v18, %v924_v20  ;;  %v702_v29 = vmax.f32 %v1675_v28, %v596_v21 }
 0x186   : > { %909 = vrot.lane.b32.xlu0 %v1731_v46, %s1575_s27  ;;  %911 = vrot.lane.b32.xlu1 %v1743_v50, %s1575_s27 }
 0x187   : > { %v1446_v26 = vpack.c.bf16 %v1088_v22, %v1088_v22  ;;  %v1053_v58 = vadd.f32 %v1863_v2, %v1010_v23  ;;  %v846_v59 = vmax.f32 %v702_v29, %v740_v5 }
 0x188   : > { %v606_v27 = vpop.permute.xlu0 %605  ;;  %v608_v60 = vpop.permute.xlu1 %607 }
 0x189   : > { %1269 = vst.msk [vmem:[%s1877_s5 + $0x50] sm:$0xf] %vm1248_vm2, %v1446_v26  ;;  %v1089_v61 = vmax.f32 %v1053_v58, 0.0  ;;  %v990_v62 = vmax.f32 %v846_v59, %v884_v14  ;;  %v707_v9 = vmax.f32 %v1683_v30, %v606_v27  ;;  %v708_v10 = vmax.f32 %v1695_v34, %v608_v60 }
 0x18a   : > { %617 = vrot.lane.b32.xlu0 %v1739_v48, %s1573_s25  ;;  %619 = vrot.lane.b32.xlu1 %v1747_v52, %s1573_s25 }
 0x18b   : > { %v1447_v28 = vpack.c.bf16 %v1089_v61, %v1089_v61  ;;  %v1033_v63 = vadd.f32 %v1863_v2, %v990_v62 }
 0x18c   : > { %v646_v0 = vpop.permute.xlu0 %645  ;;  %v648_v1 = vpop.permute.xlu1 %647 }
 0x18d   : > { %1270 = vst.msk [vmem:[%s1877_s5 + $0x54] sm:$0xf] %vm1248_vm2, %v1447_v28  ;;  %v1069_v3 = vmax.f32 %v1033_v63, 0.0  ;;  %v727_v14 = vmax.f32 %v1685_v31, %v646_v0  ;;  %v728_v15 = vmax.f32 %v1697_v35, %v648_v1 }
 0x18e   : > { %657 = vrot.lane.b32.xlu0 %v1741_v49, %s1573_s25  ;;  %659 = vrot.lane.b32.xlu1 %v1749_v53, %s1573_s25 }
 0x18f   : > { %v1427_v4 = vpack.c.bf16 %v1069_v3, %v1069_v3 }
 0x190   : > { %v750_v5 = vpop.permute.xlu0 %749  ;;  %v752_v6 = vpop.permute.xlu1 %751 }
 0x191   : > { %1250 = vst.msk [vmem:[%s1877_s5 + $0x4] sm:$0xf] %vm1248_vm2, %v1427_v4  ;;  %v851_v11 = vmax.f32 %v707_v9, %v750_v5  ;;  %v852_v25 = vmax.f32 %v708_v10, %v752_v6 }
 0x192   : > { %761 = vrot.lane.b32.xlu0 %v1739_v48, %s1574_s26  ;;  %763 = vrot.lane.b32.xlu1 %v1747_v52, %s1574_s26 }
 0x194   : > { %v790_v7 = vpop.permute.xlu0 %789  ;;  %v792_v8 = vpop.permute.xlu1 %791 }
 0x195   : > { %v871_v30 = vmax.f32 %v727_v14, %v790_v7  ;;  %v872_v34 = vmax.f32 %v728_v15, %v792_v8 }
 0x196   : > { %801 = vrot.lane.b32.xlu0 %v1741_v49, %s1574_s26  ;;  %803 = vrot.lane.b32.xlu1 %v1749_v53, %s1574_s26 }
 0x198   : > { %v894_v12 = vpop.permute.xlu0 %893  ;;  %v896_v13 = vpop.permute.xlu1 %895 }
 0x199   : > { %v995_v16 = vmax.f32 %v851_v11, %v894_v12  ;;  %v996_v17 = vmax.f32 %v852_v25, %v896_v13 }
 0x19a   : > { %905 = vrot.lane.b32.xlu0 %v1739_v48, %s1575_s27  ;;  %907 = vrot.lane.b32.xlu1 %v1747_v52, %s1575_s27 }
 0x19b   : > { %v1038_v24 = vadd.f32 %v1863_v2, %v995_v16  ;;  %v1039_v18 = vadd.f32 %v1863_v2, %v996_v17 }
 0x19c   : > { %v934_v19 = vpop.permute.xlu0 %933  ;;  %v936_v31 = vpop.permute.xlu1 %935 }
 0x19d   : > { %v1074_v20 = vmax.f32 %v1038_v24, 0.0  ;;  %v1075_v35 = vmax.f32 %v1039_v18, 0.0  ;;  %v1015_v21 = vmax.f32 %v871_v30, %v934_v19  ;;  %v1016_v22 = vmax.f32 %v872_v34, %v936_v31 }
 0x19e   : > { %945 = vrot.lane.b32.xlu0 %v1741_v49, %s1575_s27  ;;  %947 = vrot.lane.b32.xlu1 %v1749_v53, %s1575_s27 }
 0x19f   : > { %v1432_v23 = vpack.c.bf16 %v1074_v20, %v1074_v20  ;;  %v1433_v29 = vpack.c.bf16 %v1075_v35, %v1075_v35  ;;  %v1058_v26 = vadd.f32 %v1863_v2, %v1015_v21  ;;  %v1059_v58 = vadd.f32 %v1863_v2, %v1016_v22 }
 0x1a0   : > { %v602_v59 = vpop.permute.xlu0 %601  ;;  %v604_v27 = vpop.permute.xlu1 %603 }
 0x1a1   : > { %1255 = vst.msk [vmem:[%s1877_s5 + $0x18] sm:$0xf] %vm1248_vm2, %v1432_v23  ;;  %1256 = vst.msk [vmem:[%s1877_s5 + $0x1c] sm:$0xf] %vm1248_vm2, %v1433_v29  ;;  %v1094_v60 = vmax.f32 %v1058_v26, 0.0  ;;  %v1095_v61 = vmax.f32 %v1059_v58, 0.0  ;;  %v705_v6 = vmax.f32 %v1691_v32, %v602_v59  ;;  %v706_v7 = vmax.f32 %v1699_v36, %v604_v27 }
 0x1a2   : > { %629 = vrot.lane.b32.xlu0 %v1779_v54, %s1573_s25  ;;  %631 = vrot.lane.b32.xlu1 %v1787_v56, %s1573_s25 }
 0x1a3   : > { %v1452_v62 = vpack.c.bf16 %v1094_v60, %v1094_v60  ;;  %v1453_v28 = vpack.c.bf16 %v1095_v61, %v1095_v61 }
 0x1a4   : > { %v642_v63 = vpop.permute.xlu0 %641  ;;  %v644_v0 = vpop.permute.xlu1 %643 }
 0x1a5   : > { %1275 = vst.msk [vmem:[%s1877_s5 + $0x68] sm:$0xf] %vm1248_vm2, %v1452_v62  ;;  %1276 = vst.msk [vmem:[%s1877_s5 + $0x6c] sm:$0xf] %vm1248_vm2, %v1453_v28  ;;  %v725_v25 = vmax.f32 %v1693_v33, %v642_v63  ;;  %v726_v12 = vmax.f32 %v1701_v37, %v644_v0 }
 0x1a6   : > { %773 = vrot.lane.b32.xlu0 %v1779_v54, %s1574_s26  ;;  %775 = vrot.lane.b32.xlu1 %v1787_v56, %s1574_s26 }
 0x1a8   : > { %v746_v1 = vpop.permute.xlu0 %745  ;;  %v748_v3 = vpop.permute.xlu1 %747 }
 0x1a9   : > { %v849_v8 = vmax.f32 %v705_v6, %v746_v1  ;;  %v850_v9 = vmax.f32 %v706_v7, %v748_v3 }
 0x1aa   : > { %917 = vrot.lane.b32.xlu0 %v1779_v54, %s1575_s27  ;;  %919 = vrot.lane.b32.xlu1 %v1787_v56, %s1575_s27 }
 0x1ac   : > { %v786_v4 = vpop.permute.xlu0 %785  ;;  %v788_v5 = vpop.permute.xlu1 %787 }
 0x1ad   : > { %v869_v32 = vmax.f32 %v725_v25, %v786_v4  ;;  %v870_v36 = vmax.f32 %v726_v12, %v788_v5 }
 0x1ae   : > { %625 = vrot.lane.b32.xlu0 %v1781_v55, %s1573_s25  ;;  %627 = vrot.lane.b32.xlu1 %v1789_v57, %s1573_s25 }
 0x1b0   : > { %v890_v10 = vpop.permute.xlu0 %889  ;;  %v892_v11 = vpop.permute.xlu1 %891 }
 0x1b1   : > { %v993_v13 = vmax.f32 %v849_v8, %v890_v10  ;;  %v994_v14 = vmax.f32 %v850_v9, %v892_v11 }
 0x1b2   : > { %769 = vrot.lane.b32.xlu0 %v1781_v55, %s1574_s26  ;;  %771 = vrot.lane.b32.xlu1 %v1789_v57, %s1574_s26 }
 0x1b3   : > { %v1036_v15 = vadd.f32 %v1863_v2, %v993_v13  ;;  %v1037_v16 = vadd.f32 %v1863_v2, %v994_v14 }
 0x1b4   : > { %v930_v17 = vpop.permute.xlu0 %929  ;;  %v932_v33 = vpop.permute.xlu1 %931 }
 0x1b5   : > { %v1072_v30 = vmax.f32 %v1036_v15, 0.0  ;;  %v1073_v37 = vmax.f32 %v1037_v16, 0.0  ;;  %v1013_v34 = vmax.f32 %v869_v32, %v930_v17  ;;  %v1014_v24 = vmax.f32 %v870_v36, %v932_v33 }
 0x1b6   : > { %913 = vrot.lane.b32.xlu0 %v1781_v55, %s1575_s27  ;;  %915 = vrot.lane.b32.xlu1 %v1789_v57, %s1575_s27 }
 0x1b7   : > { %v1430_v18 = vpack.c.bf16 %v1072_v30, %v1072_v30  ;;  %v1431_v19 = vpack.c.bf16 %v1073_v37, %v1073_v37  ;;  %v1056_v31 = vadd.f32 %v1863_v2, %v1013_v34  ;;  %v1057_v20 = vadd.f32 %v1863_v2, %v1014_v24 }
 0x1b8   : > { %v614_v35 = vpop.permute.xlu0 %613  ;;  %v616_v21 = vpop.permute.xlu1 %615 }
 0x1b9   : > { %1253 = vst.msk [vmem:[%s1877_s5 + $0x10] sm:$0xf] %vm1248_vm2, %v1430_v18  ;;  %1254 = vst.msk [vmem:[%s1877_s5 + $0x14] sm:$0xf] %vm1248_vm2, %v1431_v19  ;;  %v1092_v22 = vmax.f32 %v1056_v31, 0.0  ;;  %v1093_v23 = vmax.f32 %v1057_v20, 0.0  ;;  %v711_v28 = vmax.f32 %v1707_v38, %v614_v35  ;;  %v712_v63 = vmax.f32 %v1719_v42, %v616_v21 }
 0x1ba   : > { %949 = vrot.lane.b32.xlu0 %v1733_v47, %s1575_s27  ;;  %951 = vrot.lane.b32.xlu1 %v1745_v51, %s1575_s27 }
 0x1bb   : > { %v1450_v29 = vpack.c.bf16 %v1092_v22, %v1092_v22  ;;  %v1451_v26 = vpack.c.bf16 %v1093_v23, %v1093_v23 }
 0x1bc   : > { %v654_v58 = vpop.permute.xlu0 %653  ;;  %v656_v59 = vpop.permute.xlu1 %655 }
 0x1bd   : > { %1273 = vst.msk [vmem:[%s1877_s5 + $0x60] sm:$0xf] %vm1248_vm2, %v1450_v29  ;;  %1274 = vst.msk [vmem:[%s1877_s5 + $0x64] sm:$0xf] %vm1248_vm2, %v1451_v26  ;;  %v731_v5 = vmax.f32 %v1709_v39, %v654_v58  ;;  %v732_v6 = vmax.f32 %v1721_v43, %v656_v59 }
 0x1c0   : > { %v758_v27 = vpop.permute.xlu0 %757  ;;  %v760_v60 = vpop.permute.xlu1 %759 }
 0x1c1   : > { %v855_v0 = vmax.f32 %v711_v28, %v758_v27  ;;  %v856_v1 = vmax.f32 %v712_v63, %v760_v60 }
 0x1c4   : > { %v798_v61 = vpop.permute.xlu0 %797  ;;  %v800_v62 = vpop.permute.xlu1 %799 }
 0x1c5   : > { %v875_v9 = vmax.f32 %v731_v5, %v798_v61  ;;  %v876_v10 = vmax.f32 %v732_v6, %v800_v62 }
 0x1c8   : > { %v902_v3 = vpop.permute.xlu0 %901  ;;  %v904_v4 = vpop.permute.xlu1 %903 }
 0x1c9   : > { %v999_v7 = vmax.f32 %v855_v0, %v902_v3  ;;  %v1000_v8 = vmax.f32 %v856_v1, %v904_v4 }
 0x1cb   : > { %v1042_v11 = vadd.f32 %v1863_v2, %v999_v7  ;;  %v1043_v38 = vadd.f32 %v1863_v2, %v1000_v8 }
 0x1cc   : > { %v942_v25 = vpop.permute.xlu0 %941  ;;  %v944_v42 = vpop.permute.xlu1 %943 }
 0x1cd   : > { %v1078_v12 = vmax.f32 %v1042_v11, 0.0  ;;  %v1079_v13 = vmax.f32 %v1043_v38, 0.0  ;;  %v1019_v14 = vmax.f32 %v875_v9, %v942_v25  ;;  %v1020_v32 = vmax.f32 %v876_v10, %v944_v42 }
 0x1cf   : > { %v1436_v39 = vpack.c.bf16 %v1078_v12, %v1078_v12  ;;  %v1437_v43 = vpack.c.bf16 %v1079_v13, %v1079_v13  ;;  %v1062_v36 = vadd.f32 %v1863_v2, %v1019_v14  ;;  %v1063_v15 = vadd.f32 %v1863_v2, %v1020_v32 }
 0x1d0   : > { %v610_v16 = vpop.permute.xlu0 %609  ;;  %v612_v17 = vpop.permute.xlu1 %611 }
 0x1d1   : > { %1259 = vst.msk [vmem:[%s1877_s5 + $0x28] sm:$0xf] %vm1248_vm2, %v1436_v39  ;;  %1260 = vst.msk [vmem:[%s1877_s5 + $0x2c] sm:$0xf] %vm1248_vm2, %v1437_v43  ;;  %v1098_v33 = vmax.f32 %v1062_v36, 0.0  ;;  %v1099_v30 = vmax.f32 %v1063_v15, 0.0  ;;  %v709_v21 = vmax.f32 %v1715_v40, %v610_v16  ;;  %v710_v22 = vmax.f32 %v1723_v44, %v612_v17 }
 0x1d3   : > { %v1456_v37 = vpack.c.bf16 %v1098_v33, %v1098_v33  ;;  %v1457_v34 = vpack.c.bf16 %v1099_v30, %v1099_v30 }
 0x1d4   : > { %v650_v24 = vpop.permute.xlu0 %649  ;;  %v652_v18 = vpop.permute.xlu1 %651 }
 0x1d5   : > { %1279 = vst.msk [vmem:[%s1877_s5 + $0x78] sm:$0xf] %vm1248_vm2, %v1456_v37  ;;  %1280 = vst.msk [vmem:[%s1877_s5 + $0x7c] sm:$0xf] %vm1248_vm2, %v1457_v34  ;;  %v729_v59 = vmax.f32 %v1717_v41, %v650_v24  ;;  %v730_v27 = vmax.f32 %v1725_v45, %v652_v18 }
 0x1d8   : > { %v754_v19 = vpop.permute.xlu0 %753  ;;  %v756_v31 = vpop.permute.xlu1 %755 }
 0x1d9   : > { %v853_v23 = vmax.f32 %v709_v21, %v754_v19  ;;  %v854_v29 = vmax.f32 %v710_v22, %v756_v31 }
 0x1dc   : > { %v794_v20 = vpop.permute.xlu0 %793  ;;  %v796_v35 = vpop.permute.xlu1 %795 }
 0x1dd   : > { %v873_v62 = vmax.f32 %v729_v59, %v794_v20  ;;  %v874_v28 = vmax.f32 %v730_v27, %v796_v35 }
 0x1e0   : > { %v898_v26 = vpop.permute.xlu0 %897  ;;  %v900_v58 = vpop.permute.xlu1 %899 }
 0x1e1   : > { %v997_v60 = vmax.f32 %v853_v23, %v898_v26  ;;  %v998_v61 = vmax.f32 %v854_v29, %v900_v58 }
 0x1e3   : > { %v1040_v63 = vadd.f32 %v1863_v2, %v997_v60  ;;  %v1041_v40 = vadd.f32 %v1863_v2, %v998_v61 }
 0x1e4   : > { %v938_v0 = vpop.permute.xlu0 %937  ;;  %v940_v44 = vpop.permute.xlu1 %939 }
 0x1e5   : > { %v1076_v1 = vmax.f32 %v1040_v63, 0.0  ;;  %v1077_v3 = vmax.f32 %v1041_v40, 0.0  ;;  %v1017_v4 = vmax.f32 %v873_v62, %v938_v0  ;;  %v1018_v5 = vmax.f32 %v874_v28, %v940_v44 }
 0x1e7   : > { %v1434_v41 = vpack.c.bf16 %v1076_v1, %v1076_v1  ;;  %v1435_v45 = vpack.c.bf16 %v1077_v3, %v1077_v3  ;;  %v1060_v6 = vadd.f32 %v1863_v2, %v1017_v4  ;;  %v1061_v7 = vadd.f32 %v1863_v2, %v1018_v5 }
 0x1e8   : > { %v622_v8 = vpop.permute.xlu0 %621  ;;  %v624_v9 = vpop.permute.xlu1 %623 }
 0x1e9   : > { %1257 = vst.msk [vmem:[%s1877_s5 + $0x20] sm:$0xf] %vm1248_vm2, %v1434_v41  ;;  %1258 = vst.msk [vmem:[%s1877_s5 + $0x24] sm:$0xf] %vm1248_vm2, %v1435_v45  ;;  %v1096_v10 = vmax.f32 %v1060_v6, 0.0  ;;  %v1097_v11 = vmax.f32 %v1061_v7, 0.0  ;;  %v715_v43 = vmax.f32 %v1731_v46, %v622_v8  ;;  %v716_v36 = vmax.f32 %v1743_v50, %v624_v9 }
 0x1eb   : > { %v1454_v38 = vpack.c.bf16 %v1096_v10, %v1096_v10  ;;  %v1455_v25 = vpack.c.bf16 %v1097_v11, %v1097_v11 }
 0x1ec   : > { %v2051_v42 = vpop.permute.xlu0 %661  ;;  %v2053_v12 = vpop.permute.xlu1 %663 }
 0x1ed   : > { %1277 = vst.msk [vmem:[%s1877_s5 + $0x70] sm:$0xf] %vm1248_vm2, %v1454_v38  ;;  %1278 = vst.msk [vmem:[%s1877_s5 + $0x74] sm:$0xf] %vm1248_vm2, %v1455_v25 }
 0x1f0   : > { %v766_v13 = vpop.permute.xlu0 %765  ;;  %v768_v14 = vpop.permute.xlu1 %767 }
 0x1f1   : > { %v859_v15 = vmax.f32 %v715_v43, %v766_v13  ;;  %v860_v16 = vmax.f32 %v716_v36, %v768_v14 }
 0x1f4   : > { %v2059_v32 = vpop.permute.xlu0 %805  ;;  %v2061_v39 = vpop.permute.xlu1 %807 }
 0x1f8   : > { %v910_v17 = vpop.permute.xlu0 %909  ;;  %v912_v33 = vpop.permute.xlu1 %911 }
 0x1f9   : > { %v1003_v30 = vmax.f32 %v859_v15, %v910_v17  ;;  %v1004_v37 = vmax.f32 %v860_v16, %v912_v33 }
 0x1fb   : > { %v1046_v34 = vadd.f32 %v1863_v2, %v1003_v30  ;;  %v1047_v24 = vadd.f32 %v1863_v2, %v1004_v37 }
 0x1fc   : > { %v618_v18 = vpop.permute.xlu0 %617  ;;  %v620_v19 = vpop.permute.xlu1 %619 }
 0x1fd   : > { %v1082_v31 = vmax.f32 %v1046_v34, 0.0  ;;  %v1083_v20 = vmax.f32 %v1047_v24, 0.0  ;;  %v713_v58 = vmax.f32 %v1739_v48, %v618_v18  ;;  %v714_v59 = vmax.f32 %v1747_v52, %v620_v19 }
 0x1ff   : > { %v1440_v35 = vpack.c.bf16 %v1082_v31, %v1082_v31  ;;  %v1441_v46 = vpack.c.bf16 %v1083_v20, %v1083_v20 }
 0x200   : > { %v658_v21 = vpop.permute.xlu0 %657  ;;  %v660_v50 = vpop.permute.xlu1 %659 }
 0x201   : > { %1263 = vst.msk [vmem:[%s1877_s5 + $0x38] sm:$0xf] %vm1248_vm2, %v1440_v35  ;;  %1264 = vst.msk [vmem:[%s1877_s5 + $0x3c] sm:$0xf] %vm1248_vm2, %v1441_v46  ;;  %v733_v28 = vmax.f32 %v1741_v49, %v658_v21  ;;  %v734_v63 = vmax.f32 %v1749_v53, %v660_v50 }
 0x204   : > { %v762_v22 = vpop.permute.xlu0 %761  ;;  %v764_v23 = vpop.permute.xlu1 %763 }
 0x205   : > { %v857_v27 = vmax.f32 %v713_v58, %v762_v22  ;;  %v858_v60 = vmax.f32 %v714_v59, %v764_v23  ;;  %v735_v59 = vmax.f32 %v1733_v47, %v2051_v42 }
 0x208   : > { %v802_v29 = vpop.permute.xlu0 %801  ;;  %v804_v26 = vpop.permute.xlu1 %803 }
 0x209   : > { %v877_v44 = vmax.f32 %v733_v28, %v802_v29  ;;  %v878_v1 = vmax.f32 %v734_v63, %v804_v26 }
 0x20c   : > { %v906_v61 = vpop.permute.xlu0 %905  ;;  %v908_v62 = vpop.permute.xlu1 %907 }
 0x20d   : > { %v1001_v40 = vmax.f32 %v857_v27, %v906_v61  ;;  %v1002_v0 = vmax.f32 %v858_v60, %v908_v62  ;;  %v736_v27 = vmax.f32 %v1745_v51, %v2053_v12  ;;  %v879_v62 = vmax.f32 %v735_v59, %v2059_v32 }
 0x20f   : > { %v1044_v3 = vadd.f32 %v1863_v2, %v1001_v40  ;;  %v1045_v48 = vadd.f32 %v1863_v2, %v1002_v0 }
 0x210   : > { %v946_v4 = vpop.permute.xlu0 %945  ;;  %v948_v52 = vpop.permute.xlu1 %947 }
 0x211   : > { %v1080_v5 = vmax.f32 %v1044_v3, 0.0  ;;  %v1081_v41 = vmax.f32 %v1045_v48, 0.0  ;;  %v1021_v45 = vmax.f32 %v877_v44, %v946_v4  ;;  %v1022_v6 = vmax.f32 %v878_v1, %v948_v52 }
 0x213   : > { %v1438_v49 = vpack.c.bf16 %v1080_v5, %v1080_v5  ;;  %v1439_v53 = vpack.c.bf16 %v1081_v41, %v1081_v41  ;;  %v1064_v7 = vadd.f32 %v1863_v2, %v1021_v45  ;;  %v1065_v8 = vadd.f32 %v1863_v2, %v1022_v6 }
 0x214   : > { %v630_v9 = vpop.permute.xlu0 %629  ;;  %v632_v10 = vpop.permute.xlu1 %631 }
 0x215   : > { %1261 = vst.msk [vmem:[%s1877_s5 + $0x30] sm:$0xf] %vm1248_vm2, %v1438_v49  ;;  %1262 = vst.msk [vmem:[%s1877_s5 + $0x34] sm:$0xf] %vm1248_vm2, %v1439_v53  ;;  %v1100_v11 = vmax.f32 %v1064_v7, 0.0  ;;  %v1101_v38 = vmax.f32 %v1065_v8, 0.0  ;;  %v719_v36 = vmax.f32 %v1779_v54, %v630_v9  ;;  %v720_v15 = vmax.f32 %v1787_v56, %v632_v10 }
 0x217   : > { %v1458_v25 = vpack.c.bf16 %v1100_v11, %v1100_v11  ;;  %v1459_v13 = vpack.c.bf16 %v1101_v38, %v1101_v38 }
 0x218   : > { %v774_v14 = vpop.permute.xlu0 %773  ;;  %v776_v43 = vpop.permute.xlu1 %775 }
 0x219   : > { %1281 = vst.msk [vmem:[%s1877_s5 + $0x80] sm:$0xf] %vm1248_vm2, %v1458_v25  ;;  %1282 = vst.msk [vmem:[%s1877_s5 + $0x84] sm:$0xf] %vm1248_vm2, %v1459_v13  ;;  %v863_v16 = vmax.f32 %v719_v36, %v774_v14  ;;  %v864_v17 = vmax.f32 %v720_v15, %v776_v43 }
 0x21c   : > { %v918_v33 = vpop.permute.xlu0 %917  ;;  %v920_v30 = vpop.permute.xlu1 %919 }
 0x21d   : > { %v1007_v37 = vmax.f32 %v863_v16, %v918_v33  ;;  %v1008_v34 = vmax.f32 %v864_v17, %v920_v30 }
 0x21f   : > { %v1050_v24 = vadd.f32 %v1863_v2, %v1007_v37  ;;  %v1051_v18 = vadd.f32 %v1863_v2, %v1008_v34 }
 0x220   : > { %v626_v19 = vpop.permute.xlu0 %625  ;;  %v628_v31 = vpop.permute.xlu1 %627 }
 0x221   : > { %v1086_v20 = vmax.f32 %v1050_v24, 0.0  ;;  %v1087_v35 = vmax.f32 %v1051_v18, 0.0  ;;  %v717_v50 = vmax.f32 %v1781_v55, %v626_v19  ;;  %v718_v22 = vmax.f32 %v1789_v57, %v628_v31 }
 0x222   : > { %v880_v55 = vmax.f32 %v736_v27, %v2061_v39 }
 0x223   : > { %v1444_v46 = vpack.c.bf16 %v1086_v20, %v1086_v20  ;;  %v1445_v54 = vpack.c.bf16 %v1087_v35, %v1087_v35 }
 0x224   : > { %v770_v21 = vpop.permute.xlu0 %769  ;;  %v772_v56 = vpop.permute.xlu1 %771 }
 0x225   : > { %1267 = vst.msk [vmem:[%s1877_s5 + $0x48] sm:$0xf] %vm1248_vm2, %v1444_v46  ;;  %1268 = vst.msk [vmem:[%s1877_s5 + $0x4c] sm:$0xf] %vm1248_vm2, %v1445_v54  ;;  %v861_v23 = vmax.f32 %v717_v50, %v770_v21  ;;  %v862_v29 = vmax.f32 %v718_v22, %v772_v56 }
 0x228   : > { %v914_v26 = vpop.permute.xlu0 %913  ;;  %v916_v58 = vpop.permute.xlu1 %915 }
 0x229   : > { %v1005_v60 = vmax.f32 %v861_v23, %v914_v26  ;;  %v1006_v61 = vmax.f32 %v862_v29, %v916_v58 }
 0x22b   : > { %v1048_v57 = vadd.f32 %v1863_v2, %v1005_v60  ;;  %v1049_v28 = vadd.f32 %v1863_v2, %v1006_v61 }
 0x22c   : > { %v950_v63 = vpop.permute.xlu0 %949  ;;  %v952_v40 = vpop.permute.xlu1 %951 }
 0x22d   : > { %v1084_v47 = vmax.f32 %v1048_v57, 0.0  ;;  %v1085_v42 = vmax.f32 %v1049_v28, 0.0  ;;  %v1023_v0 = vmax.f32 %v879_v62, %v950_v63  ;;  %v1024_v51 = vmax.f32 %v880_v55, %v952_v40 }
 0x22f   : > { %v1442_v12 = vpack.c.bf16 %v1084_v47, %v1084_v47  ;;  %v1443_v44 = vpack.c.bf16 %v1085_v42, %v1085_v42  ;;  %v1066_v1 = vadd.f32 %v1863_v2, %v1023_v0  ;;  %v1067_v32 = vadd.f32 %v1863_v2, %v1024_v51 }
 0x231   : > { %1265 = vst.msk [vmem:[%s1877_s5 + $0x40] sm:$0xf] %vm1248_vm2, %v1442_v12  ;;  %1266 = vst.msk [vmem:[%s1877_s5 + $0x44] sm:$0xf] %vm1248_vm2, %v1443_v44  ;;  %v1102_v39 = vmax.f32 %v1066_v1, 0.0  ;;  %v1103_v3 = vmax.f32 %v1067_v32, 0.0 }
 0x233   : > { %v1460_v48 = vpack.c.bf16 %v1102_v39, %v1102_v39  ;;  %v1461_v4 = vpack.c.bf16 %v1103_v3, %v1103_v3 }
 0x235   : > { %1283 = vst.msk [vmem:[%s1877_s5 + $0x88] sm:$0xf] %vm1248_vm2, %v1460_v48  ;;  %1284 = vst.msk [vmem:[%s1877_s5 + $0x8c] sm:$0xf] %vm1248_vm2, %v1461_v4 }
 0x236 PF: > { %s13_s12 = sadd.s32 1, %s1571_s12  }
 0x237   : > { %p10_p4 = scmp.ge.s32.totalorder %s13_s12, 6  }
 0x239   :  { %12 = sbr.rel (!%p10_p4) target bundleno = 1 (0x1), region = 62 }

// kernel: emotion_cnn_forward.4
= control target key start
LH: loop header
LB: loop body
LE: loop exit
PB: predicated region body
PF: predicated region fallthrough
CT: control target
= control target key end

     0   :  { %s3208_s12 = smov 0   ;;  %s3210_s13 = smov 0   ;;  %s4199_s0 = inlined_call_operand.vmem [shape: bf16[2,288,576], index: 0, kind: input, shape index: {}]   ;;  %s4200_s1 = inlined_call_operand.vmem [shape: bf16[576,128], index: 1, kind: input, shape index: {}]   ;;  %s4201_s2 = inlined_call_operand.vmem [shape: f32[1,64], index: 2, kind: input, shape index: {}]   ;;  %s4202_s3 = inlined_call_operand.vmem [shape: bf16[288,64], index: 3, kind: output, shape index: {}]  }
   0x1   :  { %s3212_s14 = smov 0  }
   0x2 LB: > { %s2258_s15 = sadd.s32 4294967295, %s3183_s14   ;;  %s3225_s16 = sadd.s32 1, %s3183_s14   ;;  %s3183_s14 = sphi %s3212_s14, %s4205_s14   ;;  %s3179_s13 = sphi %s3210_s13, %s4204_s13   ;;  %s3175_s12 = sphi %s3208_s12, %s4203_s12  }
   0x3   : > { %s17_s17 = ssub.s32 %s3183_s14, %s3225_s16  ;;  %s20_s18 = sadd.s32 1, %s3179_s13 }
   0x4   : > { %p18_p0 = scmp.eq.s32.totalorder %s17_s17, 0  ;;  %p27_p1 = scmp.ne.s32.totalorder %s3179_s13, %s3175_s12 }
   0x5   : > { %p28_p2 = scmp.eq.s32.totalorder %s3183_s14, 0  ;;  %p2261_p4 = scmp.ge.s32.totalorder %s3183_s14, 2 }
   0x6   : > { %s3234_s19 = scalar_select %p18_p0, %s3179_s13, %s20_s18  }
   0x7   : > { %p29_p3 = por %p28_p2, %p27_p1  ;;  %127 = sbr.rel (%p2261_p4) target bundleno = 80 (0x50), region = 24 }
   0xe   : > { %130 = sbr.rel (!%p29_p3) target bundleno = 80 (0x50), region = 28  ;;  %s132_s20 = sand.u32 (%p29_p3), 1, %s3179_s13  }
   0xf   : > { %s2968_s21 = smul.u32 (%p29_p3), 720, %s132_s20 }
  0x10   : > { %s2971_s22 = smul.u32 (%p29_p3), 360, %s3183_s14 }
  0x11   : > { %s3247_s26 = scalar_lea.vmem (%p29_p3), [#allocation2], %s2968_s21 }
  0x12   : > { %s3242_s25 = scalar_lea.vmem (%p29_p3), %s4199_s0, %s2971_s22 }
  0x13   : > { %v153_v0 = vld [vmem:[%s3242_s25] sm:$0xff] (%p29_p3)  ;;  %v155_v1 = vld [vmem:[%s3242_s25 + $0x8] sm:$0xff] (%p29_p3)  ;;  %v157_v2 = vld [vmem:[%s3242_s25 + $0x14] sm:$0xff] (%p29_p3) }
  0x14   : > { %154 = vst [vmem:[%s3247_s26] sm:$0xff] (%p29_p3), %v153_v0  ;;  %156 = vst [vmem:[%s3247_s26 + $0x8] sm:$0xff] (%p29_p3), %v155_v1  ;;  %v159_v3 = vld [vmem:[%s3242_s25 + $0x1c] sm:$0xff] (%p29_p3)  ;;  %v161_v4 = vld [vmem:[%s3242_s25 + $0x28] sm:$0xff] (%p29_p3) }
  0x15   : > { %158 = vst [vmem:[%s3247_s26 + $0x14] sm:$0xff] %v157_v2  ;;  %v163_v5 = vld [vmem:[%s3242_s25 + $0x30] sm:$0xff]  ;;  %160 = vst [vmem:[%s3247_s26 + $0x1c] sm:$0xff] %v159_v3  ;;  %v165_v6 = vld [vmem:[%s3242_s25 + $0x3c] sm:$0xff] }
  0x16   : > { %162 = vst [vmem:[%s3247_s26 + $0x28] sm:$0xff] %v161_v4  ;;  %164 = vst [vmem:[%s3247_s26 + $0x30] sm:$0xff] %v163_v5  ;;  %v167_v7 = vld [vmem:[%s3242_s25 + $0x44] sm:$0xff]  ;;  %v169_v8 = vld [vmem:[%s3242_s25 + $0x50] sm:$0xff] }
  0x17   : > { %166 = vst [vmem:[%s3247_s26 + $0x3c] sm:$0xff] %v165_v6  ;;  %168 = vst [vmem:[%s3247_s26 + $0x44] sm:$0xff] %v167_v7  ;;  %v171_v9 = vld [vmem:[%s3242_s25 + $0x58] sm:$0xff]  ;;  %v173_v10 = vld [vmem:[%s3242_s25 + $0x64] sm:$0xff] }
  0x18   : > { %170 = vst [vmem:[%s3247_s26 + $0x50] sm:$0xff] %v169_v8  ;;  %v175_v11 = vld [vmem:[%s3242_s25 + $0x6c] sm:$0xff]  ;;  %172 = vst [vmem:[%s3247_s26 + $0x58] sm:$0xff] %v171_v9  ;;  %v177_v12 = vld [vmem:[%s3242_s25 + $0x78] sm:$0xff] }
  0x19   : > { %174 = vst [vmem:[%s3247_s26 + $0x64] sm:$0xff] %v173_v10  ;;  %176 = vst [vmem:[%s3247_s26 + $0x6c] sm:$0xff] %v175_v11  ;;  %v179_v13 = vld [vmem:[%s3242_s25 + $0x80] sm:$0xff]  ;;  %v181_v14 = vld [vmem:[%s3242_s25 + $0x8c] sm:$0xff] }
  0x1a   : > { %178 = vst [vmem:[%s3247_s26 + $0x78] sm:$0xff] %v177_v12  ;;  %180 = vst [vmem:[%s3247_s26 + $0x80] sm:$0xff] %v179_v13  ;;  %v183_v15 = vld [vmem:[%s3242_s25 + $0x94] sm:$0xff]  ;;  %v185_v16 = vld [vmem:[%s3242_s25 + $0xa0] sm:$0xff] }
  0x1b   : > { %182 = vst [vmem:[%s3247_s26 + $0x8c] sm:$0xff] %v181_v14  ;;  %v187_v17 = vld [vmem:[%s3242_s25 + $0xa8] sm:$0xff]  ;;  %184 = vst [vmem:[%s3247_s26 + $0x94] sm:$0xff] %v183_v15  ;;  %v189_v18 = vld [vmem:[%s3242_s25 + $0xb4] sm:$0xff] }
  0x1c   : > { %186 = vst [vmem:[%s3247_s26 + $0xa0] sm:$0xff] %v185_v16  ;;  %188 = vst [vmem:[%s3247_s26 + $0xa8] sm:$0xff] %v187_v17  ;;  %v191_v19 = vld [vmem:[%s3242_s25 + $0xbc] sm:$0xff]  ;;  %v193_v20 = vld [vmem:[%s3242_s25 + $0xc8] sm:$0xff] }
  0x1d   : > { %190 = vst [vmem:[%s3247_s26 + $0xb4] sm:$0xff] %v189_v18  ;;  %192 = vst [vmem:[%s3247_s26 + $0xbc] sm:$0xff] %v191_v19  ;;  %v195_v21 = vld [vmem:[%s3242_s25 + $0xd0] sm:$0xff]  ;;  %v197_v22 = vld [vmem:[%s3242_s25 + $0xdc] sm:$0xff] }
  0x1e   : > { %194 = vst [vmem:[%s3247_s26 + $0xc8] sm:$0xff] %v193_v20  ;;  %v199_v23 = vld [vmem:[%s3242_s25 + $0xe4] sm:$0xff]  ;;  %196 = vst [vmem:[%s3247_s26 + $0xd0] sm:$0xff] %v195_v21  ;;  %v201_v24 = vld [vmem:[%s3242_s25 + $0xf0] sm:$0xff] }
  0x1f   : > { %198 = vst [vmem:[%s3247_s26 + $0xdc] sm:$0xff] %v197_v22  ;;  %200 = vst [vmem:[%s3247_s26 + $0xe4] sm:$0xff] %v199_v23  ;;  %v203_v25 = vld [vmem:[%s3242_s25 + $0xf8] sm:$0xff]  ;;  %v205_v26 = vld [vmem:[%s3242_s25 + $0x104] sm:$0xff] }
  0x20   : > { %202 = vst [vmem:[%s3247_s26 + $0xf0] sm:$0xff] %v201_v24  ;;  %204 = vst [vmem:[%s3247_s26 + $0xf8] sm:$0xff] %v203_v25  ;;  %v207_v27 = vld [vmem:[%s3242_s25 + $0x10c] sm:$0xff]  ;;  %v209_v28 = vld [vmem:[%s3242_s25 + $0x118] sm:$0xff] }
  0x21   : > { %206 = vst [vmem:[%s3247_s26 + $0x104] sm:$0xff] %v205_v26  ;;  %v211_v29 = vld [vmem:[%s3242_s25 + $0x120] sm:$0xff]  ;;  %208 = vst [vmem:[%s3247_s26 + $0x10c] sm:$0xff] %v207_v27  ;;  %v213_v30 = vld [vmem:[%s3242_s25 + $0x12c] sm:$0xff] }
  0x22   : > { %210 = vst [vmem:[%s3247_s26 + $0x118] sm:$0xff] %v209_v28  ;;  %212 = vst [vmem:[%s3247_s26 + $0x120] sm:$0xff] %v211_v29  ;;  %v215_v31 = vld [vmem:[%s3242_s25 + $0x134] sm:$0xff]  ;;  %v217_v32 = vld [vmem:[%s3242_s25 + $0x140] sm:$0xff] }
  0x23   : > { %214 = vst [vmem:[%s3247_s26 + $0x12c] sm:$0xff] %v213_v30  ;;  %216 = vst [vmem:[%s3247_s26 + $0x134] sm:$0xff] %v215_v31  ;;  %v219_v33 = vld [vmem:[%s3242_s25 + $0x148] sm:$0xff]  ;;  %v221_v34 = vld [vmem:[%s3242_s25 + $0x154] sm:$0xff] }
  0x24   : > { %218 = vst [vmem:[%s3247_s26 + $0x140] sm:$0xff] %v217_v32  ;;  %v223_v35 = vld [vmem:[%s3242_s25 + $0x15c] sm:$0xff]  ;;  %220 = vst [vmem:[%s3247_s26 + $0x148] sm:$0xff] %v219_v33  ;;  %v225_v36 = vld [vmem:[%s3242_s25 + $0x2d0] sm:$0xff] }
  0x25   : > { %222 = vst [vmem:[%s3247_s26 + $0x154] sm:$0xff] %v221_v34  ;;  %224 = vst [vmem:[%s3247_s26 + $0x15c] sm:$0xff] %v223_v35  ;;  %v227_v37 = vld [vmem:[%s3242_s25 + $0x2d8] sm:$0xff]  ;;  %v229_v38 = vld [vmem:[%s3242_s25 + $0x2e4] sm:$0xff] }
  0x26   : > { %226 = vst [vmem:[%s3247_s26 + $0x168] sm:$0xff] %v225_v36  ;;  %228 = vst [vmem:[%s3247_s26 + $0x170] sm:$0xff] %v227_v37  ;;  %v231_v39 = vld [vmem:[%s3242_s25 + $0x2ec] sm:$0xff]  ;;  %v233_v40 = vld [vmem:[%s3242_s25 + $0x2f8] sm:$0xff] }
  0x27   : > { %230 = vst [vmem:[%s3247_s26 + $0x17c] sm:$0xff] %v229_v38  ;;  %v235_v41 = vld [vmem:[%s3242_s25 + $0x300] sm:$0xff]  ;;  %232 = vst [vmem:[%s3247_s26 + $0x184] sm:$0xff] %v231_v39  ;;  %v237_v42 = vld [vmem:[%s3242_s25 + $0x30c] sm:$0xff] }
  0x28   : > { %234 = vst [vmem:[%s3247_s26 + $0x190] sm:$0xff] %v233_v40  ;;  %236 = vst [vmem:[%s3247_s26 + $0x198] sm:$0xff] %v235_v41  ;;  %v239_v43 = vld [vmem:[%s3242_s25 + $0x314] sm:$0xff]  ;;  %v241_v44 = vld [vmem:[%s3242_s25 + $0x320] sm:$0xff] }
  0x29   : > { %238 = vst [vmem:[%s3247_s26 + $0x1a4] sm:$0xff] %v237_v42  ;;  %240 = vst [vmem:[%s3247_s26 + $0x1ac] sm:$0xff] %v239_v43  ;;  %v243_v45 = vld [vmem:[%s3242_s25 + $0x328] sm:$0xff]  ;;  %v245_v46 = vld [vmem:[%s3242_s25 + $0x334] sm:$0xff] }
  0x2a   : > { %242 = vst [vmem:[%s3247_s26 + $0x1b8] sm:$0xff] %v241_v44  ;;  %v247_v47 = vld [vmem:[%s3242_s25 + $0x33c] sm:$0xff]  ;;  %244 = vst [vmem:[%s3247_s26 + $0x1c0] sm:$0xff] %v243_v45  ;;  %v249_v48 = vld [vmem:[%s3242_s25 + $0x348] sm:$0xff] }
  0x2b   : > { %246 = vst [vmem:[%s3247_s26 + $0x1cc] sm:$0xff] %v245_v46  ;;  %248 = vst [vmem:[%s3247_s26 + $0x1d4] sm:$0xff] %v247_v47  ;;  %v251_v49 = vld [vmem:[%s3242_s25 + $0x350] sm:$0xff]  ;;  %v253_v50 = vld [vmem:[%s3242_s25 + $0x35c] sm:$0xff] }
  0x2c   : > { %250 = vst [vmem:[%s3247_s26 + $0x1e0] sm:$0xff] %v249_v48  ;;  %252 = vst [vmem:[%s3247_s26 + $0x1e8] sm:$0xff] %v251_v49  ;;  %v255_v51 = vld [vmem:[%s3242_s25 + $0x364] sm:$0xff]  ;;  %v257_v52 = vld [vmem:[%s3242_s25 + $0x370] sm:$0xff] }
  0x2d   : > { %254 = vst [vmem:[%s3247_s26 + $0x1f4] sm:$0xff] %v253_v50  ;;  %v259_v53 = vld [vmem:[%s3242_s25 + $0x378] sm:$0xff]  ;;  %256 = vst [vmem:[%s3247_s26 + $0x1fc] sm:$0xff] %v255_v51  ;;  %v261_v54 = vld [vmem:[%s3242_s25 + $0x384] sm:$0xff] }
  0x2e   : > { %258 = vst [vmem:[%s3247_s26 + $0x208] sm:$0xff] %v257_v52  ;;  %260 = vst [vmem:[%s3247_s26 + $0x210] sm:$0xff] %v259_v53  ;;  %v263_v55 = vld [vmem:[%s3242_s25 + $0x38c] sm:$0xff]  ;;  %v265_v56 = vld [vmem:[%s3242_s25 + $0x398] sm:$0xff] }
  0x2f   : > { %262 = vst [vmem:[%s3247_s26 + $0x21c] sm:$0xff] %v261_v54  ;;  %264 = vst [vmem:[%s3247_s26 + $0x224] sm:$0xff] %v263_v55  ;;  %v267_v57 = vld [vmem:[%s3242_s25 + $0x3a0] sm:$0xff]  ;;  %v269_v58 = vld [vmem:[%s3242_s25 + $0x3ac] sm:$0xff] }
  0x30   : > { %266 = vst [vmem:[%s3247_s26 + $0x230] sm:$0xff] %v265_v56  ;;  %v271_v59 = vld [vmem:[%s3242_s25 + $0x3b4] sm:$0xff]  ;;  %268 = vst [vmem:[%s3247_s26 + $0x238] sm:$0xff] %v267_v57  ;;  %v273_v60 = vld [vmem:[%s3242_s25 + $0x3c0] sm:$0xff] }
  0x31   : > { %270 = vst [vmem:[%s3247_s26 + $0x244] sm:$0xff] %v269_v58  ;;  %272 = vst [vmem:[%s3247_s26 + $0x24c] sm:$0xff] %v271_v59  ;;  %v275_v61 = vld [vmem:[%s3242_s25 + $0x3c8] sm:$0xff]  ;;  %v277_v62 = vld [vmem:[%s3242_s25 + $0x3d4] sm:$0xff] }
  0x32   : > { %274 = vst [vmem:[%s3247_s26 + $0x258] sm:$0xff] %v273_v60  ;;  %276 = vst [vmem:[%s3247_s26 + $0x260] sm:$0xff] %v275_v61  ;;  %v279_v63 = vld [vmem:[%s3242_s25 + $0x3dc] sm:$0xff]  ;;  %v281_v0 = vld [vmem:[%s3242_s25 + $0x3e8] sm:$0xff] }
  0x33   : > { %278 = vst [vmem:[%s3247_s26 + $0x26c] sm:$0xff] %v277_v62  ;;  %v283_v1 = vld [vmem:[%s3242_s25 + $0x3f0] sm:$0xff]  ;;  %280 = vst [vmem:[%s3247_s26 + $0x274] sm:$0xff] %v279_v63  ;;  %v285_v2 = vld [vmem:[%s3242_s25 + $0x3fc] sm:$0xff] }
  0x34   : > { %282 = vst [vmem:[%s3247_s26 + $0x280] sm:$0xff] %v281_v0  ;;  %284 = vst [vmem:[%s3247_s26 + $0x288] sm:$0xff] %v283_v1  ;;  %v287_v3 = vld [vmem:[%s3242_s25 + $0x404] sm:$0xff]  ;;  %v289_v4 = vld [vmem:[%s3242_s25 + $0x410] sm:$0xff] }
  0x35   : > { %286 = vst [vmem:[%s3247_s26 + $0x294] sm:$0xff] %v285_v2  ;;  %288 = vst [vmem:[%s3247_s26 + $0x29c] sm:$0xff] %v287_v3  ;;  %v291_v5 = vld [vmem:[%s3242_s25 + $0x418] sm:$0xff]  ;;  %v293_v6 = vld [vmem:[%s3242_s25 + $0x424] sm:$0xff] }
  0x36   : > { %290 = vst [vmem:[%s3247_s26 + $0x2a8] sm:$0xff] %v289_v4  ;;  %v295_v7 = vld [vmem:[%s3242_s25 + $0x42c] sm:$0xff]  ;;  %292 = vst [vmem:[%s3247_s26 + $0x2b0] sm:$0xff] %v291_v5  ;;  %v2265_v9 = vld [vmem:[%s3242_s25 + $0x24] sm:$0xf] }
  0x37   : > { %294 = vst [vmem:[%s3247_s26 + $0x2bc] sm:$0xff] %v293_v6  ;;  %296 = vst [vmem:[%s3247_s26 + $0x2c4] sm:$0xff] %v295_v7  ;;  %v2263_v8 = vld [vmem:[%s3242_s25 + $0x10] sm:$0xf]  ;;  %v2267_v10 = vld [vmem:[%s3242_s25 + $0x38] sm:$0xf] }
  0x38   : > { %2264 = vst [vmem:[%s3247_s26 + $0x10] sm:$0xf] %v2263_v8  ;;  %2266 = vst [vmem:[%s3247_s26 + $0x24] sm:$0xf] %v2265_v9  ;;  %v2269_v11 = vld [vmem:[%s3242_s25 + $0x4c] sm:$0xf] }
  0x39   : > { %2268 = vst [vmem:[%s3247_s26 + $0x38] sm:$0xf] %v2267_v10  ;;  %v2271_v12 = vld [vmem:[%s3242_s25 + $0x60] sm:$0xf]  ;;  %v2273_v13 = vld [vmem:[%s3242_s25 + $0x74] sm:$0xf] }
  0x3a   : > { %2270 = vst [vmem:[%s3247_s26 + $0x4c] sm:$0xf] %v2269_v11  ;;  %2272 = vst [vmem:[%s3247_s26 + $0x60] sm:$0xf] %v2271_v12  ;;  %v2275_v14 = vld [vmem:[%s3242_s25 + $0x88] sm:$0xf] }
  0x3b   : > { %2274 = vst [vmem:[%s3247_s26 + $0x74] sm:$0xf] %v2273_v13  ;;  %v2277_v15 = vld [vmem:[%s3242_s25 + $0x9c] sm:$0xf]  ;;  %v2279_v16 = vld [vmem:[%s3242_s25 + $0xb0] sm:$0xf] }
  0x3c   : > { %2276 = vst [vmem:[%s3247_s26 + $0x88] sm:$0xf] %v2275_v14  ;;  %2278 = vst [vmem:[%s3247_s26 + $0x9c] sm:$0xf] %v2277_v15  ;;  %v2281_v17 = vld [vmem:[%s3242_s25 + $0xc4] sm:$0xf] }
  0x3d   : > { %2280 = vst [vmem:[%s3247_s26 + $0xb0] sm:$0xf] %v2279_v16  ;;  %v2283_v18 = vld [vmem:[%s3242_s25 + $0xd8] sm:$0xf]  ;;  %v2285_v19 = vld [vmem:[%s3242_s25 + $0xec] sm:$0xf] }
  0x3e   : > { %2282 = vst [vmem:[%s3247_s26 + $0xc4] sm:$0xf] %v2281_v17  ;;  %2284 = vst [vmem:[%s3247_s26 + $0xd8] sm:$0xf] %v2283_v18  ;;  %v2287_v20 = vld [vmem:[%s3242_s25 + $0x100] sm:$0xf] }
  0x3f   : > { %2286 = vst [vmem:[%s3247_s26 + $0xec] sm:$0xf] %v2285_v19  ;;  %v2289_v21 = vld [vmem:[%s3242_s25 + $0x114] sm:$0xf]  ;;  %v2291_v22 = vld [vmem:[%s3242_s25 + $0x128] sm:$0xf] }
  0x40   : > { %2288 = vst [vmem:[%s3247_s26 + $0x100] sm:$0xf] %v2287_v20  ;;  %2290 = vst [vmem:[%s3247_s26 + $0x114] sm:$0xf] %v2289_v21  ;;  %v2293_v23 = vld [vmem:[%s3242_s25 + $0x13c] sm:$0xf] }
  0x41   : > { %2292 = vst [vmem:[%s3247_s26 + $0x128] sm:$0xf] %v2291_v22  ;;  %v2295_v24 = vld [vmem:[%s3242_s25 + $0x150] sm:$0xf]  ;;  %v2297_v25 = vld [vmem:[%s3242_s25 + $0x164] sm:$0xf] }
  0x42   : > { %2294 = vst [vmem:[%s3247_s26 + $0x13c] sm:$0xf] %v2293_v23  ;;  %2296 = vst [vmem:[%s3247_s26 + $0x150] sm:$0xf] %v2295_v24  ;;  %v2299_v26 = vld [vmem:[%s3242_s25 + $0x2e0] sm:$0xf] }
  0x43   : > { %2298 = vst [vmem:[%s3247_s26 + $0x164] sm:$0xf] %v2297_v25  ;;  %v2301_v27 = vld [vmem:[%s3242_s25 + $0x2f4] sm:$0xf]  ;;  %v2303_v28 = vld [vmem:[%s3242_s25 + $0x308] sm:$0xf] }
  0x44   : > { %2300 = vst [vmem:[%s3247_s26 + $0x178] sm:$0xf] %v2299_v26  ;;  %2302 = vst [vmem:[%s3247_s26 + $0x18c] sm:$0xf] %v2301_v27  ;;  %v2305_v29 = vld [vmem:[%s3242_s25 + $0x31c] sm:$0xf] }
  0x45   : > { %2304 = vst [vmem:[%s3247_s26 + $0x1a0] sm:$0xf] %v2303_v28  ;;  %v2307_v30 = vld [vmem:[%s3242_s25 + $0x330] sm:$0xf]  ;;  %v2309_v31 = vld [vmem:[%s3242_s25 + $0x344] sm:$0xf] }
  0x46   : > { %2306 = vst [vmem:[%s3247_s26 + $0x1b4] sm:$0xf] %v2305_v29  ;;  %2308 = vst [vmem:[%s3247_s26 + $0x1c8] sm:$0xf] %v2307_v30  ;;  %v2311_v32 = vld [vmem:[%s3242_s25 + $0x358] sm:$0xf] }
  0x47   : > { %2310 = vst [vmem:[%s3247_s26 + $0x1dc] sm:$0xf] %v2309_v31  ;;  %v2313_v33 = vld [vmem:[%s3242_s25 + $0x36c] sm:$0xf]  ;;  %v2315_v34 = vld [vmem:[%s3242_s25 + $0x380] sm:$0xf] }
  0x48   : > { %2312 = vst [vmem:[%s3247_s26 + $0x1f0] sm:$0xf] %v2311_v32  ;;  %2314 = vst [vmem:[%s3247_s26 + $0x204] sm:$0xf] %v2313_v33  ;;  %v2317_v35 = vld [vmem:[%s3242_s25 + $0x394] sm:$0xf] }
  0x49   : > { %2316 = vst [vmem:[%s3247_s26 + $0x218] sm:$0xf] %v2315_v34  ;;  %v2319_v36 = vld [vmem:[%s3242_s25 + $0x3a8] sm:$0xf]  ;;  %v2321_v37 = vld [vmem:[%s3242_s25 + $0x3bc] sm:$0xf] }
  0x4a   : > { %2318 = vst [vmem:[%s3247_s26 + $0x22c] sm:$0xf] %v2317_v35  ;;  %2320 = vst [vmem:[%s3247_s26 + $0x240] sm:$0xf] %v2319_v36  ;;  %v2323_v38 = vld [vmem:[%s3242_s25 + $0x3d0] sm:$0xf] }
  0x4b   : > { %2322 = vst [vmem:[%s3247_s26 + $0x254] sm:$0xf] %v2321_v37  ;;  %v2325_v39 = vld [vmem:[%s3242_s25 + $0x3e4] sm:$0xf]  ;;  %v2327_v40 = vld [vmem:[%s3242_s25 + $0x3f8] sm:$0xf] }
  0x4c   : > { %2324 = vst [vmem:[%s3247_s26 + $0x268] sm:$0xf] %v2323_v38  ;;  %2326 = vst [vmem:[%s3247_s26 + $0x27c] sm:$0xf] %v2325_v39  ;;  %v2329_v41 = vld [vmem:[%s3242_s25 + $0x40c] sm:$0xf] }
  0x4d   : > { %2328 = vst [vmem:[%s3247_s26 + $0x290] sm:$0xf] %v2327_v40  ;;  %v2331_v42 = vld [vmem:[%s3242_s25 + $0x420] sm:$0xf]  ;;  %v2333_v43 = vld [vmem:[%s3242_s25 + $0x434] sm:$0xf] }
  0x4e   : > { %2330 = vst [vmem:[%s3247_s26 + $0x2a4] sm:$0xf] %v2329_v41  ;;  %2332 = vst [vmem:[%s3247_s26 + $0x2b8] sm:$0xf] %v2331_v42 }
  0x4f   : > { %2334 = vst [vmem:[%s3247_s26 + $0x2cc] sm:$0xf] %v2333_v43 }
  0x50 PF: > { %p2335_p5 = scmp.ge.s32.totalorder %s3183_s14, 1  ;;  %p380_p6 = scmp.lt.s32.totalorder %s3183_s14, 3 }
  0x52   : > { %p381_p7 = pnand %p2335_p5, %p380_p6 }
  0x53   : > { %v3467_v44 = vld [vmem:[%s4200_s1 + $0x40] sm:$0xff] (!%p381_p7)   ;;  %v3490_v48 = vld [vmem:[%s4200_s1 + $0x48] sm:$0xff] (!%p381_p7)   ;;  %v3514_v52 = vld [vmem:[%s4200_s1 + $0x50] sm:$0xff] (!%p381_p7)   ;;  %s387_s4 = sand.u32 (!%p381_p7), 1, %s3175_s12   ;;  %v3185_v14 = vmov (!%p381_p7), 0.0   ;;  %vm3186_vm0 = vmmov (!%p381_p7), 0  }
  0x54   : > { %384 = sbr.rel (%p381_p7) target bundleno = 672 (0x2a0), region = 54  ;;  %v3472_v45 = vld [vmem:[%s4200_s1 + $0xc0] sm:$0xff] (!%p381_p7)   ;;  %2574 = vmatprep.subr.bf16.mxu0 (!%p381_p7), %v3467_v44  ;;  %v3496_v49 = vld [vmem:[%s4200_s1 + $0xc8] sm:$0xff] (!%p381_p7)   ;;  %v3520_v53 = vld [vmem:[%s4200_s1 + $0xd0] sm:$0xff] (!%p381_p7)   ;;  %vm985_vm1 = vcmask (!%p381_p7), 523264   ;;  %vm2173_vm2 = vcmask (!%p381_p7), 519168  }
  0x55   : > { %v3478_v46 = vld [vmem:[%s4200_s1] sm:$0xff] (!%p381_p7)   ;;  %2644 = vmatprep.subr.bf16.mxu1 (!%p381_p7), %v3472_v45  ;;  %v3502_v50 = vld [vmem:[%s4200_s1 + $0x8] sm:$0xff] (!%p381_p7)   ;;  %v3526_v54 = vld [vmem:[%s4200_s1 + $0x10] sm:$0xff] (!%p381_p7)   ;;  %s2970_s12 = smul.u32 (!%p381_p7), 720, %s387_s4 }
  0x56   : > { %v3484_v47 = vld [vmem:[%s4200_s1 + $0x80] sm:$0xff] (!%p381_p7)   ;;  %2575 = vmatpush3.bf16.msra.mxu0 (!%p381_p7), %v3478_v46  ;;  %v3508_v51 = vld [vmem:[%s4200_s1 + $0x88] sm:$0xff] (!%p381_p7)   ;;  %v3532_v55 = vld [vmem:[%s4200_s1 + $0x90] sm:$0xff] (!%p381_p7)   ;;  %s411_s11 = smul.u32 (!%p381_p7), 18, %s2258_s15 }
  0x57   : > { %2645 = vmatpush3.bf16.msra.mxu1 (!%p381_p7), %v3484_v47  ;;  %2576 = vmatprep.subr.bf16.mxu0 (!%p381_p7), %v3490_v48  ;;  %v3538_v56 = vld [vmem:[%s4200_s1 + $0x58] sm:$0xff] (!%p381_p7)   ;;  %v3562_v60 = vld [vmem:[%s4200_s1 + $0x60] sm:$0xff] (!%p381_p7)   ;;  %v3586_v0 = vld [vmem:[%s4200_s1 + $0x68] sm:$0xff] (!%p381_p7)   ;;  %s3656_s29 = scalar_lea.vmem (!%p381_p7), [#allocation2], %s2970_s12  ;;  %s3187_s12 = smov (!%p381_p7), 64  }
  0x58   : > { %2646 = vmatprep.subr.bf16.mxu1 (!%p381_p7), %v3496_v49  ;;  %v3544_v57 = vld [vmem:[%s4200_s1 + $0xd8] sm:$0xff] (!%p381_p7)   ;;  %v3568_v61 = vld [vmem:[%s4200_s1 + $0xe0] sm:$0xff] (!%p381_p7)   ;;  %v3592_v1 = vld [vmem:[%s4200_s1 + $0xe8] sm:$0xff] (!%p381_p7)   ;;  %p412_p8 = scmp.lt.s32.totalorder (!%p381_p7), %s411_s11, 35 }
  0x59   : > { %v3550_v58 = vld [vmem:[%s4200_s1 + $0x18] sm:$0xff] (!%p381_p7)   ;;  %v3574_v62 = vld [vmem:[%s4200_s1 + $0x20] sm:$0xff] (!%p381_p7)   ;;  %v3598_v2 = vld [vmem:[%s4200_s1 + $0x28] sm:$0xff] (!%p381_p7)  }
  0x5a   : > { %2577 = vmatpush3.bf16.msra.mxu0 (!%p381_p7), %v3502_v50  ;;  %v3556_v59 = vld [vmem:[%s4200_s1 + $0x98] sm:$0xff] (!%p381_p7)   ;;  %v3580_v63 = vld [vmem:[%s4200_s1 + $0xa0] sm:$0xff] (!%p381_p7)   ;;  %v3605_v3 = vld [vmem:[%s4200_s1 + $0xa8] sm:$0xff] (!%p381_p7)  }
  0x5b   : > { %2647 = vmatpush3.bf16.msra.mxu1 %v3508_v51  ;;  %2578 = vmatprep.subr.bf16.mxu0 %v3514_v52  ;;  %v3611_v4 = vld [vmem:[%s4200_s1 + $0x70] sm:$0xff]   ;;  %v3635_v8 = vld [vmem:[%s4200_s1 + $0x78] sm:$0xff]   ;;  %v3668_v17 = vld [vmem:[%s4200_s1 + $0x100] sm:$0xff]   ;;  %s4207_s11 = smov (!%p412_p8, %s411_s11), 35 }
  0x5c   : > { %2648 = vmatprep.subr.bf16.mxu1 %v3520_v53  ;;  %v3617_v5 = vld [vmem:[%s4200_s1 + $0xf0] sm:$0xff]   ;;  %v3641_v9 = vld [vmem:[%s4200_s1 + $0xf8] sm:$0xff]   ;;  %v3682_v23 = vld [vmem:[%s4200_s1 + $0x108] sm:$0xff]   ;;  %s2336_s20 = sshll.u32 %s4207_s11, 2 }
  0x5d   : > { %v3623_v6 = vld [vmem:[%s4200_s1 + $0x30] sm:$0xff]   ;;  %v3647_v10 = vld [vmem:[%s4200_s1 + $0x38] sm:$0xff]   ;;  %s4118_s15 = scalar_lea.vmem %s4202_s3, %s2336_s20 }
  0x5e   : > { %2579 = vmatpush3.bf16.msra.mxu0 %v3526_v54  ;;  %v3629_v7 = vld [vmem:[%s4200_s1 + $0xb0] sm:$0xff]   ;;  %v3653_v11 = vld [vmem:[%s4200_s1 + $0xb8] sm:$0xff]  }
  0x5f   : > { %2649 = vmatpush3.bf16.msra.mxu1 %v3532_v55  ;;  %2580 = vmatprep.subr.bf16.mxu0 %v3538_v56  ;;  %v3031_v12 = vld [vmem:[%s3656_s29] ss:$20 sps:$4 sm:$0xff]   ;;  %v3033_v13 = vld [vmem:[%s3656_s29 + $0x4] ss:$20 sps:$4 sm:$0xff]   ;;  %v3034_v15 = vld [vmem:[%s3656_s29 + $0x8] ss:$20 sps:$4 sm:$0xff]  }
  0x60   : > { %2650 = vmatprep.subr.bf16.mxu1 %v3544_v57  ;;  %v3036_v16 = vld [vmem:[%s3656_s29 + $0xc] ss:$20 sps:$4 sm:$0xff]   ;;  %1045 = vmatprep.mubr.bf16.mxu0 %v3033_v13  ;;  %v3040_v19 = vld [vmem:[%s3656_s29 + $0x34] ss:$20 sps:$4 sm:$0xff]   ;;  %v3043_v21 = vld [vmem:[%s3656_s29 + $0x30] ss:$20 sps:$4 sm:$0xff]  }
  0x61   : > { %1150 = vmatprep.mubr.bf16.mxu1 %v3036_v16  ;;  %v3038_v18 = vld [vmem:[%s3656_s29 + $0x2c] ss:$20 sps:$4 sm:$0xff]   ;;  %v3042_v20 = vld [vmem:[%s3656_s29 + $0x28] ss:$20 sps:$4 sm:$0xff]   ;;  %v3048_v25 = vld [vmem:[%s3656_s29 + $0x50] ss:$20 sps:$4 sm:$0xff]  }
  0x62   : > { %2581 = vmatpush3.bf16.msra.mxu0 %v3550_v58  ;;  %v3044_v22 = vld [vmem:[%s3656_s29 + $0x54] ss:$20 sps:$4 sm:$0xff]   ;;  %v3046_v24 = vld [vmem:[%s3656_s29 + $0x5c] ss:$20 sps:$4 sm:$0xff]   ;;  %v3049_v26 = vld [vmem:[%s3656_s29 + $0x58] ss:$20 sps:$4 sm:$0xff]  }
  0x63   : > { %2651 = vmatpush3.bf16.msra.mxu1 %v3556_v59  ;;  %2582 = vmatprep.subr.bf16.mxu0 %v3562_v60  ;;  %v3696_v27 = vld [vmem:[%s4200_s1 + $0x110] sm:$0xff]   ;;  %v3055_v30 = vld [vmem:[%s3656_s29 + $0x78] ss:$20 sps:$4 sm:$0xff]   ;;  %v3062_v36 = vld [vmem:[%s3656_s29 + $0xa8] ss:$20 sps:$4 sm:$0xff]  }
  0x64   : > { %2652 = vmatprep.subr.bf16.mxu1 %v3568_v61  ;;  %v3051_v28 = vld [vmem:[%s3656_s29 + $0x7c] ss:$20 sps:$4 sm:$0xff]   ;;  %v3053_v29 = vld [vmem:[%s3656_s29 + $0x84] ss:$20 sps:$4 sm:$0xff]   ;;  %v3056_v31 = vld [vmem:[%s3656_s29 + $0x80] ss:$20 sps:$4 sm:$0xff]  }
  0x65   : > { %v3711_v32 = vld [vmem:[%s4200_s1 + $0x118] sm:$0xff]   ;;  %v3061_v35 = vld [vmem:[%s3656_s29 + $0xa0] ss:$20 sps:$4 sm:$0xff]   ;;  %v3069_v40 = vld [vmem:[%s3656_s29 + $0xd0] ss:$20 sps:$4 sm:$0xff]  }
  0x66   : > { %2583 = vmatpush3.bf16.msra.mxu0 %v3574_v62  ;;  %v3057_v33 = vld [vmem:[%s3656_s29 + $0xa4] ss:$20 sps:$4 sm:$0xff]   ;;  %v3059_v34 = vld [vmem:[%s3656_s29 + $0xac] ss:$20 sps:$4 sm:$0xff]   ;;  %v3066_v38 = vld [vmem:[%s3656_s29 + $0xd4] ss:$20 sps:$4 sm:$0xff]  }
  0x67   : > { %2653 = vmatpush3.bf16.msra.mxu1 %v3580_v63  ;;  %2584 = vmatprep.subr.bf16.mxu0 %v3586_v0  ;;  %v3064_v37 = vld [vmem:[%s3656_s29 + $0xcc] ss:$20 sps:$4 sm:$0xff]   ;;  %v3068_v39 = vld [vmem:[%s3656_s29 + $0xc8] ss:$20 sps:$4 sm:$0xff]   ;;  %v3074_v43 = vld [vmem:[%s3656_s29 + $0xf0] ss:$20 sps:$4 sm:$0xff]  }
  0x68   : > { %2654 = vmatprep.subr.bf16.mxu1 %v3592_v1  ;;  %v3070_v41 = vld [vmem:[%s3656_s29 + $0xf4] ss:$20 sps:$4 sm:$0xff]   ;;  %v3072_v42 = vld [vmem:[%s3656_s29 + $0xfc] ss:$20 sps:$4 sm:$0xff]   ;;  %v3122_v13 = vld [vmem:[%s3656_s29 + $0x2ac] ss:$20 sps:$4 sm:$0xff]  }
  0x69   : > { %v3124_v16 = vld [vmem:[%s3656_s29 + $0x2a8] ss:$20 sps:$4 sm:$0xff]  }
  0x6a   : > { %2585 = vmatpush3.bf16.msra.mxu0 %v3598_v2 }
  0x6b   : > { %2655 = vmatpush3.bf16.msra.mxu1 %v3605_v3  ;;  %2586 = vmatprep.subr.bf16.mxu0 %v3611_v4 }
  0x6c   : > { %2656 = vmatprep.subr.bf16.mxu1 %v3617_v5 }
  0x6e   : > { %2587 = vmatpush3.bf16.msra.mxu0 %v3623_v6 }
  0x6f   : > { %2657 = vmatpush3.bf16.msra.mxu1 %v3629_v7  ;;  %2588 = vmatprep.subr.bf16.mxu0 %v3635_v8 }
  0x70   : > { %2658 = vmatprep.subr.bf16.mxu1 %v3641_v9 }
  0x72   : > { %2589 = vmatpush3.bf16.msra.mxu0 %v3647_v10 }
  0x73   : > { %2659 = vmatpush3.bf16.msra.mxu1 %v3653_v11  ;;  %2880 = vmatprep.subr.bf16.mxu0 %v3185_v14 }
  0x74   : > { %2727 = vmatprep.subr.bf16.mxu1 %v3467_v44  ;;  %v3075_v44 = vld [vmem:[%s3656_s29 + $0xf8] ss:$20 sps:$4 sm:$0xff]  }
  0x75   : > { %1046 = vmatmul.mubr.bf16.vlgmr.msra.gmra.mrb[0].mxu0 %v3031_v12  ;;  %v3120_v12 = vld [vmem:[%s3656_s29 + $0x280] ss:$20 sps:$4 sm:$0xff]  }
  0x76   : > { %1151 = vmatmul.mubr.bf16.vlgmr.msra.gmra.mrb[0].mxu1 %v3034_v15  ;;  %2881 = vmatpush3.bf16.msra.mxu0 %v3668_v17  ;;  %v3121_v15 = vld [vmem:[%s3656_s29 + $0x150] ss:$20 sps:$4 sm:$0xff]  }
  0x77   : > { %2728 = vmatpush3.bf16.msra.mxu1 %v3478_v46  ;;  %1053 = vmatprep.mubr.bf16.mxu0 %v3038_v18  ;;  %v3078_v46 = vld [vmem:[%s3656_s29 + $0x124] ss:$20 sps:$4 sm:$0xff]  }
  0x78   : > { %1158 = vmatprep.mubr.bf16.mxu1 %v3040_v19  ;;  %2729 = vmatprep.subr.bf16.mxu1 %v3490_v48  ;;  %v3081_v48 = vld [vmem:[%s3656_s29 + $0x118] ss:$20 sps:$4 sm:$0xff]   ;;  %v3125_v18 = vld [vmem:[%s3656_s29 + $0x170] ss:$20 sps:$4 sm:$0xff]  }
  0x79   : > { %2882 = vmatprep.subr.bf16.mxu0 %v3185_v14  ;;  %v3128_v19 = vld [vmem:[%s3656_s29 + $0x178] ss:$20 sps:$4 sm:$0xff]  }
  0x7a   : > { %2883 = vmatpush3.bf16.msra.mxu0 %v3682_v23 }
  0x7b   : > { %2730 = vmatpush3.bf16.msra.mxu1 %v3502_v50  ;;  %2884 = vmatprep.subr.bf16.mxu0 %v3185_v14  ;;  %v3082_v50 = vld [vmem:[%s3656_s29 + $0x120] ss:$20 sps:$4 sm:$0xff]  }
  0x7c   : > { %2731 = vmatprep.subr.bf16.mxu1 %v3514_v52  ;;  %v3083_v52 = vld [vmem:[%s3656_s29 + $0x144] ss:$20 sps:$4 sm:$0xff]  }
  0x7d   : > { %1054 = vmatmul.mubr.bf16.gmra.mrb[4].mxu0 %v3042_v20  ;;  %v3129_v20 = vld [vmem:[%s3656_s29 + $0x19c] ss:$20 sps:$4 sm:$0xff]  }
  0x7e   : > { %1159 = vmatmul.mubr.bf16.gmra.mrb[4].mxu1 %v3043_v21  ;;  %1061 = vmatprep.mubr.bf16.mxu0 %v3044_v22  ;;  %v3131_v21 = vld [vmem:[%s3656_s29 + $0x198] ss:$20 sps:$4 sm:$0xff]   ;;  %v3132_v22 = vld [vmem:[%s3656_s29 + $0x1a0] ss:$20 sps:$4 sm:$0xff]  }
  0x7f   : > { %1166 = vmatprep.mubr.bf16.mxu1 %v3046_v24  ;;  %2732 = vmatpush3.bf16.msra.mxu1 %v3526_v54  ;;  %v3085_v54 = vld [vmem:[%s3656_s29 + $0x14c] ss:$20 sps:$4 sm:$0xff]  }
  0x80   : > { %2733 = vmatprep.subr.bf16.mxu1 %v3538_v56  ;;  %2885 = vmatpush3.bf16.msra.mxu0 %v3696_v27  ;;  %v3087_v56 = vld [vmem:[%s3656_s29 + $0x140] ss:$20 sps:$4 sm:$0xff]  }
  0x81   : > { %2886 = vmatprep.subr.bf16.mxu0 %v3185_v14  ;;  %v3135_v24 = vld [vmem:[%s3656_s29 + $0x1c0] ss:$20 sps:$4 sm:$0xff]  }
  0x83   : > { %2734 = vmatpush3.bf16.msra.mxu1 %v3550_v58  ;;  %v3088_v58 = vld [vmem:[%s3656_s29 + $0x148] ss:$20 sps:$4 sm:$0xff]  }
  0x84   : > { %2735 = vmatprep.subr.bf16.mxu1 %v3562_v60  ;;  %2887 = vmatpush3.bf16.msra.mxu0 %v3711_v32  ;;  %v3092_v60 = vld [vmem:[%s3656_s29 + $0x16c] ss:$20 sps:$4 sm:$0xff]  }
  0x85   : > { %1062 = vmatmul.mubr.bf16.gmra.mrb[8].mxu0 %v3048_v25  ;;  %2797 = vmatprep.subr.bf16.mxu0 %v3472_v45  ;;  %v3076_v45 = vld [vmem:[%s3656_s29 + $0x11c] ss:$20 sps:$4 sm:$0xff]  }
  0x86   : > { %1167 = vmatmul.mubr.bf16.gmra.mrb[8].mxu1 %v3049_v26  ;;  %1069 = vmatprep.mubr.bf16.mxu0 %v3051_v28  ;;  %v3136_v25 = vld [vmem:[%s3656_s29 + $0x1c8] ss:$20 sps:$4 sm:$0xff]   ;;  %v3137_v26 = vld [vmem:[%s3656_s29 + $0x1ec] ss:$20 sps:$4 sm:$0xff]   ;;  %v3140_v28 = vld [vmem:[%s3656_s29 + $0x1f0] ss:$20 sps:$4 sm:$0xff]  }
  0x87   : > { %1174 = vmatprep.mubr.bf16.mxu1 %v3053_v29  ;;  %2736 = vmatpush3.bf16.msra.mxu1 %v3574_v62  ;;  %v3089_v62 = vld [vmem:[%s3656_s29 + $0x10] ss:$20 sps:$4 sm:$0xff]   ;;  %v3141_v29 = vld [vmem:[%s3656_s29 + $0x214] ss:$20 sps:$4 sm:$0xff]  }
  0x88   : > { %2737 = vmatprep.subr.bf16.mxu1 %v3586_v0  ;;  %v3090_v0 = vld [vmem:[%s3656_s29 + $0x168] ss:$20 sps:$4 sm:$0xff]  }
  0x8b   : > { %2738 = vmatpush3.bf16.msra.mxu1 %v3598_v2  ;;  %v3094_v2 = vld [vmem:[%s3656_s29 + $0x194] ss:$20 sps:$4 sm:$0xff]  }
  0x8c   : > { %2739 = vmatprep.subr.bf16.mxu1 %v3611_v4  ;;  %v3093_v4 = vld [vmem:[%s3656_s29 + $0x38] ss:$20 sps:$4 sm:$0xff]  }
  0x8d   : > { %1070 = vmatmul.mubr.bf16.gmra.mrb[12].mxu0 %v3055_v30  ;;  %v3143_v30 = vld [vmem:[%s3656_s29 + $0x210] ss:$20 sps:$4 sm:$0xff]  }
  0x8e   : > { %1175 = vmatmul.mubr.bf16.gmra.mrb[12].mxu1 %v3056_v31  ;;  %1077 = vmatprep.mubr.bf16.mxu0 %v3057_v33  ;;  %v3144_v31 = vld [vmem:[%s3656_s29 + $0x218] ss:$20 sps:$4 sm:$0xff]  }
  0x8f   : > { %1182 = vmatprep.mubr.bf16.mxu1 %v3059_v34  ;;  %2740 = vmatpush3.bf16.msra.mxu1 %v3623_v6  ;;  %v3096_v6 = vld [vmem:[%s3656_s29 + $0x190] ss:$20 sps:$4 sm:$0xff]   ;;  %v3147_v33 = vld [vmem:[%s3656_s29 + $0x238] ss:$20 sps:$4 sm:$0xff]   ;;  %v3148_v34 = vld [vmem:[%s3656_s29 + $0x240] ss:$20 sps:$4 sm:$0xff]  }
  0x90   : > { %2741 = vmatprep.subr.bf16.mxu1 %v3635_v8  ;;  %v3098_v8 = vld [vmem:[%s3656_s29 + $0x1bc] ss:$20 sps:$4 sm:$0xff]  }
  0x93   : > { %2742 = vmatpush3.bf16.msra.mxu1 %v3647_v10  ;;  %v3118_v10 = vld [vmem:[%s3656_s29 + $0x284] ss:$20 sps:$4 sm:$0xff]  }
  0x94   : > { %2924 = vmatprep.subr.bf16.mxu1 %v3185_v14 }
  0x95   : > { %1078 = vmatmul.mubr.bf16.gmra.mrb[16].mxu0 %v3061_v35  ;;  %v3149_v35 = vld [vmem:[%s3656_s29 + $0x264] ss:$20 sps:$4 sm:$0xff]  }
  0x96   : > { %1183 = vmatmul.mubr.bf16.gmra.mrb[16].mxu1 %v3062_v36  ;;  %1085 = vmatprep.mubr.bf16.mxu0 %v3064_v37  ;;  %v3151_v36 = vld [vmem:[%s3656_s29 + $0x260] ss:$20 sps:$4 sm:$0xff]   ;;  %v3152_v37 = vld [vmem:[%s3656_s29 + $0x268] ss:$20 sps:$4 sm:$0xff]  }
  0x97   : > { %1190 = vmatprep.mubr.bf16.mxu1 %v3066_v38  ;;  %v3153_v38 = vld [vmem:[%s3656_s29 + $0x28c] ss:$20 sps:$4 sm:$0xff]  }
  0x9d   : > { %1086 = vmatmul.mubr.bf16.gmra.mrb[20].mxu0 %v3068_v39  ;;  %v3155_v39 = vld [vmem:[%s3656_s29 + $0x288] ss:$20 sps:$4 sm:$0xff]  }
  0x9e   : > { %1191 = vmatmul.mubr.bf16.gmra.mrb[20].mxu1 %v3069_v40  ;;  %1093 = vmatprep.mubr.bf16.mxu0 %v3070_v41  ;;  %v3156_v40 = vld [vmem:[%s3656_s29 + $0x290] ss:$20 sps:$4 sm:$0xff]   ;;  %v3157_v41 = vld [vmem:[%s3656_s29 + $0x2b4] ss:$20 sps:$4 sm:$0xff]  }
  0x9f   : > { %1198 = vmatprep.mubr.bf16.mxu1 %v3072_v42  ;;  %v3159_v42 = vld [vmem:[%s3656_s29 + $0x2b0] ss:$20 sps:$4 sm:$0xff]  }
  0xa5   : > { %1094 = vmatmul.mubr.bf16.gmra.mrb[24].mxu0 %v3074_v43  ;;  %v3160_v43 = vld [vmem:[%s3656_s29 + $0x2b8] ss:$20 sps:$4 sm:$0xff]  }
  0xa6   : > { %1199 = vmatmul.mubr.bf16.gmra.mrb[24].mxu1 %v3075_v44  ;;  %1101 = vmatprep.mubr.bf16.mxu0 %v3076_v45 }
  0xa7   : > { %1206 = vmatprep.mubr.bf16.mxu1 %v3078_v46 }
  0xad   : > { %1102 = vmatmul.mubr.bf16.gmra.mrb[28].mxu0 %v3081_v48 }
  0xae   : > { %1207 = vmatmul.mubr.bf16.gmra.mrb[28].mxu1 %v3082_v50  ;;  %1109 = vmatprep.mubr.bf16.mxu0 %v3083_v52 }
  0xaf   : > { %1214 = vmatprep.mubr.bf16.mxu1 %v3085_v54 }
  0xb5   : > { %1110 = vmatmul.mubr.bf16.gmra.mrb[32].mxu0 %v3087_v56 }
  0xb6   : > { %1215 = vmatmul.mubr.bf16.gmra.mrb[32].mxu1 %v3088_v58  ;;  %2888 = vmatprep.mubr.msk.bf16.mxu0 %vm3186_vm0, %v3185_v14 }
  0xb7   : > { %1667 = vmatprep.mubr.bf16.mxu1 %v3092_v60 }
  0xbd   : > { %2889 = vmatmul.mubr.msk.bf16.vlgmr.msra.gmra.mrb[36].mxu0 %vm985_vm1, %v3089_v62 }
  0xbe   : > { %2798 = vmatpush3.bf16.msra.mxu0 %v3484_v47  ;;  %1668 = vmatmul.mubr.bf16.vlgmr.msra.gmra.mrb[36].mxu1 %v3090_v0  ;;  %v3097_v47 = vld [vmem:[%s3656_s29 + $0x60] ss:$20 sps:$4 sm:$0xff]  }
  0xbf   : > { %2925 = vmatpush3.bf16.msra.mxu1 %v3668_v17  ;;  %2892 = vmatprep.mubr.msk.bf16.mxu0 %vm3186_vm0, %v3185_v14  ;;  %v3127_v17 = vld [vmem:[%s3656_s29 + $0x174] ss:$20 sps:$4 sm:$0xff]  }
  0xc0   : > { %2799 = vmatprep.subr.bf16.mxu0 %v3496_v49  ;;  %1675 = vmatprep.mubr.bf16.mxu1 %v3094_v2  ;;  %v3100_v49 = vld [vmem:[%s3656_s29 + $0x1b8] ss:$20 sps:$4 sm:$0xff]  }
  0xc1   : > { %2926 = vmatprep.subr.bf16.mxu1 %v3185_v14 }
  0xc2   : > { %2800 = vmatpush3.bf16.msra.mxu0 %v3508_v51  ;;  %v3102_v51 = vld [vmem:[%s3656_s29 + $0x1e4] ss:$20 sps:$4 sm:$0xff]  }
  0xc3   : > { %2801 = vmatprep.subr.bf16.mxu0 %v3520_v53  ;;  %2927 = vmatpush3.bf16.msra.mxu1 %v3682_v23  ;;  %v3101_v53 = vld [vmem:[%s3656_s29 + $0x88] ss:$20 sps:$4 sm:$0xff]   ;;  %v3133_v23 = vld [vmem:[%s3656_s29 + $0x1c4] ss:$20 sps:$4 sm:$0xff]  }
  0xc4   : > { %2928 = vmatprep.subr.bf16.mxu1 %v3185_v14 }
  0xc5   : > { %2893 = vmatmul.mubr.msk.bf16.gmra.mrb[40].mxu0 %vm985_vm1, %v3093_v4 }
  0xc6   : > { %1676 = vmatmul.mubr.bf16.gmra.mrb[40].mxu1 %v3096_v6  ;;  %2896 = vmatprep.mubr.msk.bf16.mxu0 %vm3186_vm0, %v3185_v14 }
  0xc7   : > { %1683 = vmatprep.mubr.bf16.mxu1 %v3098_v8  ;;  %2802 = vmatpush3.bf16.msra.mxu0 %v3532_v55  ;;  %v3104_v55 = vld [vmem:[%s3656_s29 + $0x1e0] ss:$20 sps:$4 sm:$0xff]  }
  0xc8   : > { %2803 = vmatprep.subr.bf16.mxu0 %v3544_v57  ;;  %2929 = vmatpush3.bf16.msra.mxu1 %v3696_v27  ;;  %v3106_v57 = vld [vmem:[%s3656_s29 + $0x20c] ss:$20 sps:$4 sm:$0xff]   ;;  %v3139_v27 = vld [vmem:[%s3656_s29 + $0x1e8] ss:$20 sps:$4 sm:$0xff]  }
  0xc9   : > { %2930 = vmatprep.subr.bf16.mxu1 %v3185_v14 }
  0xcb   : > { %2804 = vmatpush3.bf16.msra.mxu0 %v3556_v59  ;;  %v3105_v59 = vld [vmem:[%s3656_s29 + $0xb0] ss:$20 sps:$4 sm:$0xff]  }
  0xcc   : > { %2805 = vmatprep.subr.bf16.mxu0 %v3568_v61  ;;  %2931 = vmatpush3.bf16.msra.mxu1 %v3711_v32  ;;  %v3108_v61 = vld [vmem:[%s3656_s29 + $0x208] ss:$20 sps:$4 sm:$0xff]  }
  0xcd   : > { %2897 = vmatmul.mubr.msk.bf16.gmra.mrb[44].mxu0 %vm985_vm1, %v3097_v47  ;;  %v3145_v32 = vld [vmem:[%s3656_s29 + $0x23c] ss:$20 sps:$4 sm:$0xff]  }
  0xce   : > { %1684 = vmatmul.mubr.bf16.gmra.mrb[44].mxu1 %v3100_v49  ;;  %2900 = vmatprep.mubr.msk.bf16.mxu0 %vm3186_vm0, %v3185_v14 }
  0xcf   : > { %1691 = vmatprep.mubr.bf16.mxu1 %v3102_v51  ;;  %2806 = vmatpush3.bf16.msra.mxu0 %v3580_v63  ;;  %v3110_v63 = vld [vmem:[%s3656_s29 + $0x234] ss:$20 sps:$4 sm:$0xff]  }
  0xd0   : > { %2807 = vmatprep.subr.bf16.mxu0 %v3592_v1  ;;  %v3109_v1 = vld [vmem:[%s3656_s29 + $0xd8] ss:$20 sps:$4 sm:$0xff]  }
  0xd3   : > { %2808 = vmatpush3.bf16.msra.mxu0 %v3605_v3  ;;  %v3112_v3 = vld [vmem:[%s3656_s29 + $0x230] ss:$20 sps:$4 sm:$0xff]  }
  0xd4   : > { %2809 = vmatprep.subr.bf16.mxu0 %v3617_v5  ;;  %v3114_v5 = vld [vmem:[%s3656_s29 + $0x25c] ss:$20 sps:$4 sm:$0xff]  }
  0xd5   : > { %2901 = vmatmul.mubr.msk.bf16.gmra.mrb[48].mxu0 %vm985_vm1, %v3101_v53 }
  0xd6   : > { %1692 = vmatmul.mubr.bf16.gmra.mrb[48].mxu1 %v3104_v55  ;;  %2904 = vmatprep.mubr.msk.bf16.mxu0 %vm3186_vm0, %v3185_v14 }
  0xd7   : > { %1699 = vmatprep.mubr.bf16.mxu1 %v3106_v57  ;;  %2810 = vmatpush3.bf16.msra.mxu0 %v3629_v7  ;;  %v3113_v7 = vld [vmem:[%s3656_s29 + $0x100] ss:$20 sps:$4 sm:$0xff]  }
  0xd8   : > { %2811 = vmatprep.subr.bf16.mxu0 %v3641_v9  ;;  %v3116_v9 = vld [vmem:[%s3656_s29 + $0x258] ss:$20 sps:$4 sm:$0xff]  }
  0xdb   : > { %2812 = vmatpush3.bf16.msra.mxu0 %v3653_v11  ;;  %v3117_v11 = vld [vmem:[%s3656_s29 + $0x128] ss:$20 sps:$4 sm:$0xff]  }
  0xdd   : > { %2905 = vmatmul.mubr.msk.bf16.gmra.mrb[52].mxu0 %vm985_vm1, %v3105_v59 }
  0xde   : > { %1700 = vmatmul.mubr.bf16.gmra.mrb[52].mxu1 %v3108_v61  ;;  %2908 = vmatprep.mubr.msk.bf16.mxu0 %vm3186_vm0, %v3185_v14 }
  0xdf   : > { %1707 = vmatprep.mubr.bf16.mxu1 %v3110_v63 }
  0xe5   : > { %2909 = vmatmul.mubr.msk.bf16.gmra.mrb[56].mxu0 %vm985_vm1, %v3109_v1 }
  0xe6   : > { %1708 = vmatmul.mubr.bf16.gmra.mrb[56].mxu1 %v3112_v3  ;;  %2912 = vmatprep.mubr.msk.bf16.mxu0 %vm3186_vm0, %v3185_v14 }
  0xe7   : > { %1715 = vmatprep.mubr.bf16.mxu1 %v3114_v5 }
  0xed   : > { %2913 = vmatmul.mubr.msk.bf16.gmra.mrb[60].mxu0 %vm985_vm1, %v3113_v7 }
  0xee   : > { %1716 = vmatmul.mubr.bf16.gmra.mrb[60].mxu1 %v3116_v9  ;;  %2916 = vmatprep.mubr.msk.bf16.mxu0 %vm3186_vm0, %v3185_v14 }
  0xef   : > { %1723 = vmatprep.mubr.bf16.mxu1 %v3118_v10 }
  0xf5   : > { %2917 = vmatmul.mubr.msk.bf16.gmra.mrb[64].mxu0 %vm985_vm1, %v3117_v11 }
  0xf6   : > { %1724 = vmatmul.mubr.bf16.gmra.mrb[64].mxu1 %v3120_v12  ;;  %2920 = vmatprep.mubr.msk.bf16.mxu0 %vm3186_vm0, %v3185_v14 }
  0xf7   : > { %1731 = vmatprep.mubr.bf16.mxu1 %v3122_v13 }
  0xfd   : > { %2921 = vmatmul.mubr.msk.bf16.gmra.mrb[68].mxu0 %vm985_vm1, %v3121_v15 }
  0xfe   : > { %1732 = vmatmul.mubr.bf16.gmra.mrb[68].mxu1 %v3124_v16  ;;  %1772 = vmatprep.mubr.bf16.mxu0 %v3127_v17 }
  0xff   : > { %2932 = vmatprep.mubr.msk.bf16.mxu1 %vm3186_vm0, %v3185_v14 }
 0x105   : > { %1773 = vmatmul.mubr.bf16.vlgmr.msra.gmra.mrb[72].mxu0 %v3125_v18 }
 0x106   : > { %2933 = vmatmul.mubr.msk.bf16.vlgmr.msra.gmra.mrb[72].mxu1 %vm985_vm1, %v3128_v19  ;;  %1780 = vmatprep.mubr.bf16.mxu0 %v3129_v20 }
 0x107   : > { %2936 = vmatprep.mubr.msk.bf16.mxu1 %vm3186_vm0, %v3185_v14 }
 0x10d   : > { %1781 = vmatmul.mubr.bf16.gmra.mrb[76].mxu0 %v3131_v21 }
 0x10e   : > { %2937 = vmatmul.mubr.msk.bf16.gmra.mrb[76].mxu1 %vm985_vm1, %v3132_v22  ;;  %1788 = vmatprep.mubr.bf16.mxu0 %v3133_v23 }
 0x10f   : > { %2940 = vmatprep.mubr.msk.bf16.mxu1 %vm3186_vm0, %v3185_v14 }
 0x115   : > { %1789 = vmatmul.mubr.bf16.gmra.mrb[80].mxu0 %v3135_v24 }
 0x116   : > { %2941 = vmatmul.mubr.msk.bf16.gmra.mrb[80].mxu1 %vm985_vm1, %v3136_v25  ;;  %1796 = vmatprep.mubr.bf16.mxu0 %v3137_v26 }
 0x117   : > { %2944 = vmatprep.mubr.msk.bf16.mxu1 %vm3186_vm0, %v3185_v14 }
 0x11d   : > { %1797 = vmatmul.mubr.bf16.gmra.mrb[84].mxu0 %v3139_v27 }
 0x11e   : > { %2945 = vmatmul.mubr.msk.bf16.gmra.mrb[84].mxu1 %vm985_vm1, %v3140_v28  ;;  %1804 = vmatprep.mubr.bf16.mxu0 %v3141_v29 }
 0x11f   : > { %2948 = vmatprep.mubr.msk.bf16.mxu1 %vm3186_vm0, %v3185_v14 }
 0x125   : > { %1805 = vmatmul.mubr.bf16.gmra.mrb[88].mxu0 %v3143_v30 }
 0x126   : > { %2949 = vmatmul.mubr.msk.bf16.gmra.mrb[88].mxu1 %vm985_vm1, %v3144_v31  ;;  %1812 = vmatprep.mubr.bf16.mxu0 %v3145_v32 }
 0x127   : > { %2952 = vmatprep.mubr.msk.bf16.mxu1 %vm3186_vm0, %v3185_v14 }
 0x12d   : > { %1813 = vmatmul.mubr.bf16.gmra.mrb[92].mxu0 %v3147_v33 }
 0x12e   : > { %2953 = vmatmul.mubr.msk.bf16.gmra.mrb[92].mxu1 %vm985_vm1, %v3148_v34  ;;  %1820 = vmatprep.mubr.bf16.mxu0 %v3149_v35 }
 0x12f   : > { %2956 = vmatprep.mubr.msk.bf16.mxu1 %vm3186_vm0, %v3185_v14 }
 0x135   : > { %1821 = vmatmul.mubr.bf16.gmra.mrb[96].mxu0 %v3151_v36 }
 0x136   : > { %2957 = vmatmul.mubr.msk.bf16.gmra.mrb[96].mxu1 %vm985_vm1, %v3152_v37  ;;  %1828 = vmatprep.mubr.bf16.mxu0 %v3153_v38 }
 0x137   : > { %2960 = vmatprep.mubr.msk.bf16.mxu1 %vm3186_vm0, %v3185_v14 }
 0x13d   : > { %1829 = vmatmul.mubr.bf16.gmra.mrb[100].mxu0 %v3155_v39 }
 0x13e   : > { %2961 = vmatmul.mubr.msk.bf16.gmra.mrb[100].mxu1 %vm985_vm1, %v3156_v40  ;;  %1836 = vmatprep.mubr.bf16.mxu0 %v3157_v41 }
 0x13f   : > { %2964 = vmatprep.mubr.msk.bf16.mxu1 %vm3186_vm0, %v3185_v14 }
 0x145   : > { %1837 = vmatmul.mubr.bf16.gmra.mrb[104].mxu0 %v3159_v42 }
 0x146   : > { %2965 = vmatmul.mubr.msk.bf16.gmra.mrb[104].mxu1 %vm985_vm1, %v3160_v43 }
 0x148   : > { %v2590_v44 = vpop.f32.mrb[0].mxu0 }
 0x149   : > { %v2660_v45 = vpop.f32.mrb[0].mxu1  ;;  %v2591_v46 = vpop.f32.mrb[1].mxu0 }
 0x14a   : > { %v2592_v48 = vadd.f32 %v2591_v46, %v2590_v44  ;;  %v2661_v50 = vpop.f32.mrb[1].mxu1  ;;  %v2593_v52 = vpop.f32.mrb[2].mxu0 }
 0x14b   : > { %v2662_v54 = vadd.f32 %v2661_v50, %v2660_v45  ;;  %v2663_v56 = vpop.f32.mrb[2].mxu1  ;;  %v2594_v58 = vpop.f32.mrb[3].mxu0 }
 0x14c   : > { %v2595_v60 = vadd.f32 %v2594_v58, %v2593_v52  ;;  %v2664_v62 = vpop.f32.mrb[3].mxu1 }
 0x14d   : > { %v2665_v0 = vadd.f32 %v2664_v62, %v2663_v56  ;;  %v3871_v2 = vadd.f32 %v2662_v54, %v2592_v48 }
 0x14f   : > { %v3873_v14 = vadd.f32 %v2665_v0, %v2595_v60 }
 0x150   : > { %v2596_v4 = vpop.f32.mrb[4].mxu0 }
 0x151   : > { %v2666_v6 = vpop.f32.mrb[4].mxu1  ;;  %v2597_v8 = vpop.f32.mrb[5].mxu0 }
 0x152   : > { %v2598_v47 = vadd.f32 %v2597_v8, %v2596_v4  ;;  %v2667_v49 = vpop.f32.mrb[5].mxu1  ;;  %v2599_v51 = vpop.f32.mrb[6].mxu0 }
 0x153   : > { %v2668_v53 = vadd.f32 %v2667_v49, %v2666_v6  ;;  %v2669_v55 = vpop.f32.mrb[6].mxu1  ;;  %v2600_v57 = vpop.f32.mrb[7].mxu0 }
 0x154   : > { %v2601_v59 = vadd.f32 %v2600_v57, %v2599_v51  ;;  %v2670_v61 = vpop.f32.mrb[7].mxu1 }
 0x155   : > { %v2671_v63 = vadd.f32 %v2670_v61, %v2669_v55  ;;  %v3875_v1 = vadd.f32 %v2668_v53, %v2598_v47 }
 0x157   : > { %v3877_v3 = vadd.f32 %v2671_v63, %v2601_v59 }
 0x158   : > { %v2602_v5 = vpop.f32.mrb[8].mxu0 }
 0x159   : > { %v2672_v7 = vpop.f32.mrb[8].mxu1  ;;  %v2603_v9 = vpop.f32.mrb[9].mxu0 }
 0x15a   : > { %v2604_v10 = vadd.f32 %v2603_v9, %v2602_v5  ;;  %v2673_v11 = vpop.f32.mrb[9].mxu1  ;;  %v2605_v12 = vpop.f32.mrb[10].mxu0 }
 0x15b   : > { %v2674_v13 = vadd.f32 %v2673_v11, %v2672_v7  ;;  %v2675_v15 = vpop.f32.mrb[10].mxu1  ;;  %v2606_v16 = vpop.f32.mrb[11].mxu0 }
 0x15c   : > { %v2607_v17 = vadd.f32 %v2606_v16, %v2605_v12  ;;  %v2676_v18 = vpop.f32.mrb[11].mxu1 }
 0x15d   : > { %v2677_v19 = vadd.f32 %v2676_v18, %v2675_v15  ;;  %v3879_v20 = vadd.f32 %v2674_v13, %v2604_v10 }
 0x15f   : > { %v3881_v21 = vadd.f32 %v2677_v19, %v2607_v17 }
 0x160   : > { %v2608_v22 = vpop.f32.mrb[12].mxu0 }
 0x161   : > { %v2678_v23 = vpop.f32.mrb[12].mxu1  ;;  %v2609_v24 = vpop.f32.mrb[13].mxu0 }
 0x162   : > { %v2610_v25 = vadd.f32 %v2609_v24, %v2608_v22  ;;  %v2679_v26 = vpop.f32.mrb[13].mxu1  ;;  %v2611_v27 = vpop.f32.mrb[14].mxu0 }
 0x163   : > { %v2680_v28 = vadd.f32 %v2679_v26, %v2678_v23  ;;  %v2681_v29 = vpop.f32.mrb[14].mxu1  ;;  %v2612_v30 = vpop.f32.mrb[15].mxu0 }
 0x164   : > { %v2613_v31 = vadd.f32 %v2612_v30, %v2611_v27  ;;  %v2682_v32 = vpop.f32.mrb[15].mxu1 }
 0x165   : > { %v2683_v33 = vadd.f32 %v2682_v32, %v2681_v29  ;;  %v3883_v34 = vadd.f32 %v2680_v28, %v2610_v25 }
 0x167   : > { %v3885_v35 = vadd.f32 %v2683_v33, %v2613_v31 }
 0x168   : > { %v2614_v36 = vpop.f32.mrb[16].mxu0 }
 0x169   : > { %v2684_v37 = vpop.f32.mrb[16].mxu1  ;;  %v2615_v38 = vpop.f32.mrb[17].mxu0 }
 0x16a   : > { %v2616_v39 = vadd.f32 %v2615_v38, %v2614_v36  ;;  %v2685_v40 = vpop.f32.mrb[17].mxu1  ;;  %v2617_v41 = vpop.f32.mrb[18].mxu0 }
 0x16b   : > { %v2686_v42 = vadd.f32 %v2685_v40, %v2684_v37  ;;  %v2687_v43 = vpop.f32.mrb[18].mxu1  ;;  %v2618_v44 = vpop.f32.mrb[19].mxu0 }
 0x16c   : > { %v2619_v45 = vadd.f32 %v2618_v44, %v2617_v41  ;;  %v2688_v46 = vpop.f32.mrb[19].mxu1 }
 0x16d   : > { %v2689_v48 = vadd.f32 %v2688_v46, %v2687_v43  ;;  %v3887_v50 = vadd.f32 %v2686_v42, %v2616_v39 }
 0x16f   : > { %v3889_v52 = vadd.f32 %v2689_v48, %v2619_v45 }
 0x170   : > { %v2620_v54 = vpop.f32.mrb[20].mxu0 }
 0x171   : > { %v2690_v56 = vpop.f32.mrb[20].mxu1  ;;  %v2621_v58 = vpop.f32.mrb[21].mxu0 }
 0x172   : > { %v2622_v60 = vadd.f32 %v2621_v58, %v2620_v54  ;;  %v2691_v62 = vpop.f32.mrb[21].mxu1  ;;  %v2623_v0 = vpop.f32.mrb[22].mxu0 }
 0x173   : > { %v2692_v4 = vadd.f32 %v2691_v62, %v2690_v56  ;;  %v2693_v6 = vpop.f32.mrb[22].mxu1  ;;  %v2624_v8 = vpop.f32.mrb[23].mxu0 }
 0x174   : > { %v2625_v47 = vadd.f32 %v2624_v8, %v2623_v0  ;;  %v2694_v49 = vpop.f32.mrb[23].mxu1 }
 0x175   : > { %v2695_v51 = vadd.f32 %v2694_v49, %v2693_v6  ;;  %v3891_v53 = vadd.f32 %v2692_v4, %v2622_v60 }
 0x177   : > { %v3893_v55 = vadd.f32 %v2695_v51, %v2625_v47 }
 0x178   : > { %v2626_v57 = vpop.f32.mrb[24].mxu0 }
 0x179   : > { %v2696_v59 = vpop.f32.mrb[24].mxu1  ;;  %v2627_v61 = vpop.f32.mrb[25].mxu0 }
 0x17a   : > { %v2628_v63 = vadd.f32 %v2627_v61, %v2626_v57  ;;  %v2697_v5 = vpop.f32.mrb[25].mxu1  ;;  %v2629_v7 = vpop.f32.mrb[26].mxu0 }
 0x17b   : > { %v2698_v9 = vadd.f32 %v2697_v5, %v2696_v59  ;;  %v2699_v10 = vpop.f32.mrb[26].mxu1  ;;  %v2630_v11 = vpop.f32.mrb[27].mxu0 }
 0x17c   : > { %v2631_v12 = vadd.f32 %v2630_v11, %v2629_v7  ;;  %v2700_v13 = vpop.f32.mrb[27].mxu1 }
 0x17d   : > { %v2701_v15 = vadd.f32 %v2700_v13, %v2699_v10  ;;  %v3895_v16 = vadd.f32 %v2698_v9, %v2628_v63 }
 0x17f   : > { %v3897_v17 = vadd.f32 %v2701_v15, %v2631_v12 }
 0x180   : > { %v2632_v18 = vpop.f32.mrb[28].mxu0 }
 0x181   : > { %v2702_v19 = vpop.f32.mrb[28].mxu1  ;;  %v2633_v22 = vpop.f32.mrb[29].mxu0 }
 0x182   : > { %v2634_v23 = vadd.f32 %v2633_v22, %v2632_v18  ;;  %v2703_v24 = vpop.f32.mrb[29].mxu1  ;;  %v2635_v25 = vpop.f32.mrb[30].mxu0 }
 0x183   : > { %v2704_v26 = vadd.f32 %v2703_v24, %v2702_v19  ;;  %v2705_v27 = vpop.f32.mrb[30].mxu1  ;;  %v2636_v28 = vpop.f32.mrb[31].mxu0 }
 0x184   : > { %v2637_v29 = vadd.f32 %v2636_v28, %v2635_v25  ;;  %v2706_v30 = vpop.f32.mrb[31].mxu1 }
 0x185   : > { %v2707_v31 = vadd.f32 %v2706_v30, %v2705_v27  ;;  %v3899_v32 = vadd.f32 %v2704_v26, %v2634_v23 }
 0x187   : > { %v3901_v33 = vadd.f32 %v2707_v31, %v2637_v29 }
 0x188   : > { %v2638_v36 = vpop.f32.mrb[32].mxu0 }
 0x189   : > { %v2708_v37 = vpop.f32.mrb[32].mxu1  ;;  %v2639_v38 = vpop.f32.mrb[33].mxu0 }
 0x18a   : > { %v2640_v39 = vadd.f32 %v2639_v38, %v2638_v36  ;;  %v2709_v40 = vpop.f32.mrb[33].mxu1  ;;  %v2641_v41 = vpop.f32.mrb[34].mxu0 }
 0x18b   : > { %v2710_v42 = vadd.f32 %v2709_v40, %v2708_v37  ;;  %v2711_v43 = vpop.f32.mrb[34].mxu1  ;;  %v2642_v44 = vpop.f32.mrb[35].mxu0 }
 0x18c   : > { %v2643_v45 = vadd.f32 %v2642_v44, %v2641_v41  ;;  %v2712_v46 = vpop.f32.mrb[35].mxu1 }
 0x18d   : > { %v2713_v48 = vadd.f32 %v2712_v46, %v2711_v43  ;;  %v3903_v54 = vadd.f32 %v2710_v42, %v2640_v39 }
 0x18f   : > { %v3905_v56 = vadd.f32 %v2713_v48, %v2643_v45 }
 0x190   : > { %v1257_v58 = vpop.f32.mrb[36].mxu0 }
 0x191   : > { %v3908_v60 = vadd.f32 %v1257_v58, %v3871_v2  ;;  %v2890_v62 = vpop.f32.mrb[37].mxu0  ;;  %v2743_v0 = vpop.f32.mrb[36].mxu1 }
 0x192   : > { %v1260_v4 = vpop.f32.mrb[38].mxu0  ;;  %v2744_v6 = vpop.f32.mrb[37].mxu1 }
 0x193   : > { %v3911_v8 = vadd.f32 %v1260_v4, %v3873_v14  ;;  %v2891_v47 = vpop.f32.mrb[39].mxu0  ;;  %v3913_v49 = vadd.f32 %v2744_v6, %v2743_v0  ;;  %v2746_v51 = vpop.f32.mrb[38].mxu1 }
 0x194   : > { %v2747_v57 = vpop.f32.mrb[39].mxu1 }
 0x195   : > { %v3915_v59 = vadd.f32 %v2747_v57, %v2746_v51 }
 0x198   : > { %v1265_v61 = vpop.f32.mrb[40].mxu0 }
 0x199   : > { %v3918_v63 = vadd.f32 %v1265_v61, %v3875_v1  ;;  %v2894_v2 = vpop.f32.mrb[41].mxu0  ;;  %v2749_v5 = vpop.f32.mrb[40].mxu1 }
 0x19a   : > { %v1268_v7 = vpop.f32.mrb[42].mxu0  ;;  %v2750_v9 = vpop.f32.mrb[41].mxu1 }
 0x19b   : > { %v3921_v10 = vadd.f32 %v1268_v7, %v3877_v3  ;;  %v2895_v14 = vpop.f32.mrb[43].mxu0  ;;  %v3923_v11 = vadd.f32 %v2750_v9, %v2749_v5  ;;  %v2752_v12 = vpop.f32.mrb[42].mxu1 }
 0x19c   : > { %v2753_v13 = vpop.f32.mrb[43].mxu1 }
 0x19d   : > { %v3925_v15 = vadd.f32 %v2753_v13, %v2752_v12 }
 0x1a0   : > { %v1273_v18 = vpop.f32.mrb[44].mxu0 }
 0x1a1   : > { %v3928_v19 = vadd.f32 %v1273_v18, %v3879_v20  ;;  %v2898_v1 = vpop.f32.mrb[45].mxu0  ;;  %v2755_v22 = vpop.f32.mrb[44].mxu1 }
 0x1a2   : > { %v1276_v23 = vpop.f32.mrb[46].mxu0  ;;  %v2756_v24 = vpop.f32.mrb[45].mxu1 }
 0x1a3   : > { %v3931_v25 = vadd.f32 %v1276_v23, %v3881_v21  ;;  %v2899_v3 = vpop.f32.mrb[47].mxu0  ;;  %v3933_v26 = vadd.f32 %v2756_v24, %v2755_v22  ;;  %v2758_v27 = vpop.f32.mrb[46].mxu1 }
 0x1a4   : > { %v2759_v28 = vpop.f32.mrb[47].mxu1 }
 0x1a5   : > { %v3935_v29 = vadd.f32 %v2759_v28, %v2758_v27 }
 0x1a8   : > { %v1281_v30 = vpop.f32.mrb[48].mxu0 }
 0x1a9   : > { %v3938_v31 = vadd.f32 %v1281_v30, %v3883_v34  ;;  %v2902_v20 = vpop.f32.mrb[49].mxu0  ;;  %v2761_v36 = vpop.f32.mrb[48].mxu1 }
 0x1aa   : > { %v1284_v37 = vpop.f32.mrb[50].mxu0  ;;  %v2762_v38 = vpop.f32.mrb[49].mxu1 }
 0x1ab   : > { %v3941_v39 = vadd.f32 %v1284_v37, %v3885_v35  ;;  %v2903_v21 = vpop.f32.mrb[51].mxu0  ;;  %v3943_v40 = vadd.f32 %v2762_v38, %v2761_v36  ;;  %v2764_v41 = vpop.f32.mrb[50].mxu1 }
 0x1ac   : > { %v2765_v42 = vpop.f32.mrb[51].mxu1 }
 0x1ad   : > { %v3945_v43 = vadd.f32 %v2765_v42, %v2764_v41 }
 0x1b0   : > { %v1289_v44 = vpop.f32.mrb[52].mxu0 }
 0x1b1   : > { %v3948_v45 = vadd.f32 %v1289_v44, %v3887_v50  ;;  %v2906_v34 = vpop.f32.mrb[53].mxu0  ;;  %v2767_v46 = vpop.f32.mrb[52].mxu1 }
 0x1b2   : > { %v1292_v48 = vpop.f32.mrb[54].mxu0  ;;  %v2768_v58 = vpop.f32.mrb[53].mxu1 }
 0x1b3   : > { %v3951_v62 = vadd.f32 %v1292_v48, %v3889_v52  ;;  %v2907_v35 = vpop.f32.mrb[55].mxu0  ;;  %v3953_v0 = vadd.f32 %v2768_v58, %v2767_v46  ;;  %v2770_v4 = vpop.f32.mrb[54].mxu1 }
 0x1b4   : > { %v2771_v6 = vpop.f32.mrb[55].mxu1 }
 0x1b5   : > { %v3955_v47 = vadd.f32 %v2771_v6, %v2770_v4 }
 0x1b8   : > { %v1297_v51 = vpop.f32.mrb[56].mxu0 }
 0x1b9   : > { %v3958_v57 = vadd.f32 %v1297_v51, %v3891_v53  ;;  %v2910_v50 = vpop.f32.mrb[57].mxu0  ;;  %v2773_v61 = vpop.f32.mrb[56].mxu1 }
 0x1ba   : > { %v1300_v2 = vpop.f32.mrb[58].mxu0  ;;  %v2774_v5 = vpop.f32.mrb[57].mxu1 }
 0x1bb   : > { %v3961_v7 = vadd.f32 %v1300_v2, %v3893_v55  ;;  %v2911_v52 = vpop.f32.mrb[59].mxu0  ;;  %v3963_v9 = vadd.f32 %v2774_v5, %v2773_v61  ;;  %v2776_v14 = vpop.f32.mrb[58].mxu1 }
 0x1bc   : > { %v2777_v12 = vpop.f32.mrb[59].mxu1 }
 0x1bd   : > { %v3965_v13 = vadd.f32 %v2777_v12, %v2776_v14 }
 0x1c0   : > { %v1305_v18 = vpop.f32.mrb[60].mxu0 }
 0x1c1   : > { %v3968_v1 = vadd.f32 %v1305_v18, %v3895_v16  ;;  %v2914_v53 = vpop.f32.mrb[61].mxu0  ;;  %v2779_v22 = vpop.f32.mrb[60].mxu1 }
 0x1c2   : > { %v1308_v23 = vpop.f32.mrb[62].mxu0  ;;  %v2780_v24 = vpop.f32.mrb[61].mxu1 }
 0x1c3   : > { %v3971_v3 = vadd.f32 %v1308_v23, %v3897_v17  ;;  %v2915_v55 = vpop.f32.mrb[63].mxu0  ;;  %v3973_v27 = vadd.f32 %v2780_v24, %v2779_v22  ;;  %v2782_v28 = vpop.f32.mrb[62].mxu1 }
 0x1c4   : > { %v2783_v30 = vpop.f32.mrb[63].mxu1 }
 0x1c5   : > { %v3975_v20 = vadd.f32 %v2783_v30, %v2782_v28 }
 0x1c8   : > { %v1313_v36 = vpop.f32.mrb[64].mxu0 }
 0x1c9   : > { %v3978_v37 = vadd.f32 %v1313_v36, %v3899_v32  ;;  %v2918_v16 = vpop.f32.mrb[65].mxu0  ;;  %v2785_v38 = vpop.f32.mrb[64].mxu1 }
 0x1ca   : > { %v1316_v21 = vpop.f32.mrb[66].mxu0  ;;  %v2786_v41 = vpop.f32.mrb[65].mxu1 }
 0x1cb   : > { %v3981_v42 = vadd.f32 %v1316_v21, %v3901_v33  ;;  %v2919_v17 = vpop.f32.mrb[67].mxu0  ;;  %v3983_v44 = vadd.f32 %v2786_v41, %v2785_v38  ;;  %v2788_v34 = vpop.f32.mrb[66].mxu1 }
 0x1cc   : > { %v2789_v46 = vpop.f32.mrb[67].mxu1 }
 0x1cd   : > { %v3985_v48 = vadd.f32 %v2789_v46, %v2788_v34 }
 0x1d0   : > { %v1321_v58 = vpop.f32.mrb[68].mxu0 }
 0x1d1   : > { %v3988_v35 = vadd.f32 %v1321_v58, %v3903_v54  ;;  %v2922_v32 = vpop.f32.mrb[69].mxu0  ;;  %v2791_v4 = vpop.f32.mrb[68].mxu1 }
 0x1d2   : > { %v1324_v6 = vpop.f32.mrb[70].mxu0  ;;  %v2792_v51 = vpop.f32.mrb[69].mxu1 }
 0x1d3   : > { %v3991_v50 = vadd.f32 %v1324_v6, %v3905_v56  ;;  %v2923_v33 = vpop.f32.mrb[71].mxu0  ;;  %v3993_v61 = vadd.f32 %v2792_v51, %v2791_v4  ;;  %v2794_v2 = vpop.f32.mrb[70].mxu1 }
 0x1d4   : > { %v2795_v5 = vpop.f32.mrb[71].mxu1 }
 0x1d5   : > { %v3995_v52 = vadd.f32 %v2795_v5, %v2794_v2 }
 0x1d8   : > { %v2813_v14 = vpop.f32.mrb[72].mxu0 }
 0x1d9   : > { %v2814_v12 = vpop.f32.mrb[73].mxu0  ;;  %v1879_v18 = vpop.f32.mrb[72].mxu1 }
 0x1da   : > { %v2815_v53 = vadd.f32 %v2814_v12, %v2813_v14  ;;  %v2816_v54 = vpop.f32.mrb[74].mxu0  ;;  %v2934_v22 = vpop.f32.mrb[73].mxu1 }
 0x1db   : > { %v2817_v23 = vpop.f32.mrb[75].mxu0  ;;  %v1882_v24 = vpop.f32.mrb[74].mxu1 }
 0x1dc   : > { %v2818_v55 = vadd.f32 %v2817_v23, %v2816_v54  ;;  %v1775_v28 = vadd.f32 %v2815_v53, %v3913_v49  ;;  %v2935_v56 = vpop.f32.mrb[75].mxu1 }
 0x1de   : > { %v1880_v30 = vadd.f32 %v1879_v18, %v1775_v28  ;;  %v1778_v36 = vadd.f32 %v2818_v55, %v3915_v59 }
 0x1e0   : > { %v1883_v16 = vadd.f32 %v1882_v24, %v1778_v36  ;;  %v2819_v38 = vpop.f32.mrb[76].mxu0  ;;  %v4000_v21 = vmax.f32 %v3908_v60, %v1880_v30 }
 0x1e1   : > { %v2820_v41 = vpop.f32.mrb[77].mxu0  ;;  %v1887_v17 = vpop.f32.mrb[76].mxu1 }
 0x1e2   : > { %v4003_v34 = vmax.f32 %v3911_v8, %v1883_v16  ;;  %v2821_v46 = vadd.f32 %v2820_v41, %v2819_v38  ;;  %v2822_v58 = vpop.f32.mrb[78].mxu0  ;;  %1986 = vrot.lane.b32.xlu0 %v4000_v21, %s3187_s12  ;;  %v2938_v49 = vpop.f32.mrb[77].mxu1 }
 0x1e3   : > { %v2823_v32 = vpop.f32.mrb[79].mxu0  ;;  %v1890_v4 = vpop.f32.mrb[78].mxu1 }
 0x1e4   : > { %v2824_v59 = vadd.f32 %v2823_v32, %v2822_v58  ;;  %v1783_v6 = vadd.f32 %v2821_v46, %v3923_v11  ;;  %v2939_v51 = vpop.f32.mrb[79].mxu1 }
 0x1e6   : > { %v1888_v60 = vadd.f32 %v1887_v17, %v1783_v6  ;;  %v1786_v33 = vadd.f32 %v2824_v59, %v3925_v15  ;;  %1988 = vrot.lane.b32.xlu0 %v4003_v34, %s3187_s12 }
 0x1e8   : > { %v1891_v8 = vadd.f32 %v1890_v4, %v1786_v33  ;;  %v2825_v2 = vpop.f32.mrb[80].mxu0  ;;  %v4012_v5 = vmax.f32 %v3918_v63, %v1888_v60 }
 0x1e9   : > { %v2826_v14 = vpop.f32.mrb[81].mxu0  ;;  %v1895_v12 = vpop.f32.mrb[80].mxu1 }
 0x1ea   : > { %v4015_v18 = vmax.f32 %v3921_v10, %v1891_v8  ;;  %v2827_v53 = vadd.f32 %v2826_v14, %v2825_v2  ;;  %v2828_v54 = vpop.f32.mrb[82].mxu0  ;;  %1990 = vrot.lane.b32.xlu1 %v4012_v5, %s3187_s12  ;;  %v2942_v11 = vpop.f32.mrb[81].mxu1 }
 0x1eb   : > { %v2829_v15 = vpop.f32.mrb[83].mxu0  ;;  %v1898_v22 = vpop.f32.mrb[82].mxu1 }
 0x1ec   : > { %v2830_v23 = vadd.f32 %v2829_v15, %v2828_v54  ;;  %v1791_v24 = vadd.f32 %v2827_v53, %v3933_v26  ;;  %v2943_v55 = vpop.f32.mrb[83].mxu1 }
 0x1ee   : > { %v1896_v28 = vadd.f32 %v1895_v12, %v1791_v24  ;;  %v1794_v63 = vadd.f32 %v2830_v23, %v3935_v29  ;;  %1992 = vrot.lane.b32.xlu1 %v4015_v18, %s3187_s12 }
 0x1f0   : > { %v4024_v10 = vmax.f32 %v3928_v19, %v1896_v28  ;;  %v1899_v56 = vadd.f32 %v1898_v22, %v1794_v63  ;;  %v2831_v30 = vpop.f32.mrb[84].mxu0 }
 0x1f1   : > { %v2832_v36 = vpop.f32.mrb[85].mxu0  ;;  %v1903_v16 = vpop.f32.mrb[84].mxu1 }
 0x1f2   : > { %v4027_v38 = vmax.f32 %v3931_v25, %v1899_v56  ;;  %v2833_v41 = vadd.f32 %v2832_v36, %v2831_v30  ;;  %v2834_v17 = vpop.f32.mrb[86].mxu0  ;;  %1994 = vrot.lane.b32.xlu0 %v4024_v10, %s3187_s12  ;;  %v2946_v26 = vpop.f32.mrb[85].mxu1 }
 0x1f3   : > { %v2835_v29 = vpop.f32.mrb[87].mxu0  ;;  %v1906_v46 = vpop.f32.mrb[86].mxu1 }
 0x1f4   : > { %v2836_v58 = vadd.f32 %v2835_v29, %v2834_v17  ;;  %v1799_v49 = vadd.f32 %v2833_v41, %v3943_v40  ;;  %1996 = vrot.lane.b32.xlu1 %v4027_v38, %s3187_s12  ;;  %v2947_v19 = vpop.f32.mrb[87].mxu1 }
 0x1f6   : > { %v1904_v32 = vadd.f32 %v1903_v16, %v1799_v49  ;;  %v1802_v4 = vadd.f32 %v2836_v58, %v3945_v43 }
 0x1f8   : > { %v4036_v25 = vmax.f32 %v3938_v31, %v1904_v32  ;;  %v1907_v59 = vadd.f32 %v1906_v46, %v1802_v4  ;;  %v2837_v6 = vpop.f32.mrb[88].mxu0 }
 0x1f9   : > { %v2838_v51 = vpop.f32.mrb[89].mxu0  ;;  %v1911_v60 = vpop.f32.mrb[88].mxu1 }
 0x1fa   : > { %v4039_v33 = vmax.f32 %v3941_v39, %v1907_v59  ;;  %v2839_v8 = vadd.f32 %v2838_v51, %v2837_v6  ;;  %v2840_v2 = vpop.f32.mrb[90].mxu0  ;;  %1998 = vrot.lane.b32.xlu0 %v4036_v25, %s3187_s12  ;;  %v2950_v40 = vpop.f32.mrb[89].mxu1 }
 0x1fb   : > { %v2841_v14 = vpop.f32.mrb[91].mxu0  ;;  %v1914_v12 = vpop.f32.mrb[90].mxu1 }
 0x1fc   : > { %v2842_v53 = vadd.f32 %v2841_v14, %v2840_v2  ;;  %v1807_v43 = vadd.f32 %v2839_v8, %v3953_v0  ;;  %2000 = vrot.lane.b32.xlu1 %v4039_v33, %s3187_s12  ;;  %v2951_v31 = vpop.f32.mrb[91].mxu1 }
 0x1fe   : > { %v1912_v54 = vadd.f32 %v1911_v60, %v1807_v43  ;;  %v1810_v11 = vadd.f32 %v2842_v53, %v3955_v47 }
 0x200   : > { %v4048_v39 = vmax.f32 %v3948_v45, %v1912_v54  ;;  %v1915_v15 = vadd.f32 %v1914_v12, %v1810_v11  ;;  %v2843_v22 = vpop.f32.mrb[92].mxu0 }
 0x201   : > { %v2844_v23 = vpop.f32.mrb[93].mxu0  ;;  %v1919_v24 = vpop.f32.mrb[92].mxu1 }
 0x202   : > { %v4051_v55 = vmax.f32 %v3951_v62, %v1915_v15  ;;  %v2845_v28 = vadd.f32 %v2844_v23, %v2843_v22  ;;  %v2846_v63 = vpop.f32.mrb[94].mxu0  ;;  %2002 = vrot.lane.b32.xlu0 %v4048_v39, %s3187_s12  ;;  %v2954_v0 = vpop.f32.mrb[93].mxu1 }
 0x203   : > { %v2847_v56 = vpop.f32.mrb[95].mxu0  ;;  %v1922_v30 = vpop.f32.mrb[94].mxu1 }
 0x204   : > { %v2848_v36 = vadd.f32 %v2847_v56, %v2846_v63  ;;  %v1815_v47 = vadd.f32 %v2845_v28, %v3963_v9  ;;  %2004 = vrot.lane.b32.xlu1 %v4051_v55, %s3187_s12  ;;  %v2955_v45 = vpop.f32.mrb[95].mxu1 }
 0x206   : > { %v1920_v16 = vadd.f32 %v1919_v24, %v1815_v47  ;;  %v1818_v41 = vadd.f32 %v2848_v36, %v3965_v13 }
 0x208   : > { %v4060_v62 = vmax.f32 %v3958_v57, %v1920_v16  ;;  %v1923_v17 = vadd.f32 %v1922_v30, %v1818_v41  ;;  %v2849_v26 = vpop.f32.mrb[96].mxu0 }
 0x209   : > { %v2850_v29 = vpop.f32.mrb[97].mxu0  ;;  %v1927_v46 = vpop.f32.mrb[96].mxu1 }
 0x20a   : > { %v4063_v58 = vmax.f32 %v3961_v7, %v1923_v17  ;;  %v2851_v49 = vadd.f32 %v2850_v29, %v2849_v26  ;;  %v2852_v19 = vpop.f32.mrb[98].mxu0  ;;  %2006 = vrot.lane.b32.xlu0 %v4060_v62, %s3187_s12  ;;  %v2958_v9 = vpop.f32.mrb[97].mxu1 }
 0x20b   : > { %v2853_v32 = vpop.f32.mrb[99].mxu0  ;;  %v1930_v4 = vpop.f32.mrb[98].mxu1 }
 0x20c   : > { %v2854_v59 = vadd.f32 %v2853_v32, %v2852_v19  ;;  %v1823_v13 = vadd.f32 %v2851_v49, %v3973_v27  ;;  %2008 = vrot.lane.b32.xlu1 %v4063_v58, %s3187_s12  ;;  %v2959_v57 = vpop.f32.mrb[99].mxu1 }
 0x20e   : > { %v1928_v6 = vadd.f32 %v1927_v46, %v1823_v13  ;;  %v1826_v51 = vadd.f32 %v2854_v59, %v3975_v20 }
 0x210   : > { %v4072_v7 = vmax.f32 %v3968_v1, %v1928_v6  ;;  %v1931_v60 = vadd.f32 %v1930_v4, %v1826_v51  ;;  %v2855_v8 = vpop.f32.mrb[100].mxu0 }
 0x211   : > { %v2856_v2 = vpop.f32.mrb[101].mxu0  ;;  %v1935_v40 = vpop.f32.mrb[100].mxu1 }
 0x212   : > { %v4075_v14 = vmax.f32 %v3971_v3, %v1931_v60  ;;  %v2857_v12 = vadd.f32 %v2856_v2, %v2855_v8  ;;  %v2858_v53 = vpop.f32.mrb[102].mxu0  ;;  %2010 = vrot.lane.b32.xlu0 %v4072_v7, %s3187_s12  ;;  %v2962_v27 = vpop.f32.mrb[101].mxu1 }
 0x213   : > { %v2859_v43 = vpop.f32.mrb[103].mxu0  ;;  %v1938_v31 = vpop.f32.mrb[102].mxu1 }
 0x214   : > { %v2860_v54 = vadd.f32 %v2859_v43, %v2858_v53  ;;  %v1831_v20 = vadd.f32 %v2857_v12, %v3983_v44  ;;  %2012 = vrot.lane.b32.xlu1 %v4075_v14, %s3187_s12  ;;  %v2963_v1 = vpop.f32.mrb[103].mxu1 }
 0x216   : > { %v1936_v11 = vadd.f32 %v1935_v40, %v1831_v20  ;;  %v1834_v15 = vadd.f32 %v2860_v54, %v3985_v48 }
 0x218   : > { %v4084_v3 = vmax.f32 %v3978_v37, %v1936_v11  ;;  %v1939_v22 = vadd.f32 %v1938_v31, %v1834_v15  ;;  %v2861_v23 = vpop.f32.mrb[104].mxu0 }
 0x219   : > { %v2862_v24 = vpop.f32.mrb[105].mxu0  ;;  %v1943_v28 = vpop.f32.mrb[104].mxu1 }
 0x21a   : > { %v4087_v63 = vmax.f32 %v3981_v42, %v1939_v22  ;;  %v2863_v0 = vadd.f32 %v2862_v24, %v2861_v23  ;;  %v2864_v56 = vpop.f32.mrb[106].mxu0  ;;  %2014 = vrot.lane.b32.xlu0 %v4084_v3, %s3187_s12  ;;  %v2966_v44 = vpop.f32.mrb[105].mxu1 }
 0x21b   : > { %v2865_v30 = vpop.f32.mrb[107].mxu0  ;;  %v1946_v36 = vpop.f32.mrb[106].mxu1 }
 0x21c   : > { %v2866_v48 = vadd.f32 %v2865_v30, %v2864_v56  ;;  %v1839_v37 = vadd.f32 %v2863_v0, %v3993_v61  ;;  %2016 = vrot.lane.b32.xlu1 %v4087_v63, %s3187_s12  ;;  %v2967_v47 = vpop.f32.mrb[107].mxu1  ;;  %v4110_v61 = vld [vmem:[%s4201_s2] ss:$0 sm:$0xff] }
 0x21e   : > { %v1944_v45 = vadd.f32 %v1943_v28, %v1839_v37  ;;  %v1842_v42 = vadd.f32 %v2866_v48, %v3995_v52 }
 0x220   : > { %v4096_v16 = vmax.f32 %v3988_v35, %v1944_v45  ;;  %v1947_v41 = vadd.f32 %v1946_v36, %v1842_v42 }
 0x222   : > { %v4099_v17 = vmax.f32 %v3991_v50, %v1947_v41  ;;  %2018 = vrot.lane.b32.xlu0 %v4096_v16, %s3187_s12 }
 0x224   : > { %2020 = vrot.lane.b32.xlu1 %v4099_v17, %s3187_s12 }
 0x254   : > { %v1987_v35 = vpop.permute.xlu0 %1986 }
 0x255   : > { %v2040_v52 = vmax.f32 %v4000_v21, %v1987_v35 }
 0x257   : > { %v2065_v50 = vadd.f32 %v4110_v61, %v2040_v52 }
 0x258   : > { %v1989_v26 = vpop.permute.xlu0 %1988 }
 0x259   : > { %v2083_v29 = vmax.f32 %v2065_v50, 0.0  ;;  %v2041_v46 = vmax.f32 %v4003_v34, %v1989_v26 }
 0x25b   : > { %v2556_v49 = vpack.c.bf16 %v2083_v29, %v2083_v29  ;;  %v2066_v19 = vadd.f32 %v4110_v61, %v2041_v46 }
 0x25c   : > { %v1991_v21 = vpop.permute.xlu1 %1990 }
 0x25d   : > { %2174 = vst.msk [vmem:[%s4118_s15] sm:$0xf] %vm2173_vm2, %v2556_v49  ;;  %v2084_v9 = vmax.f32 %v2066_v19, 0.0  ;;  %v2042_v32 = vmax.f32 %v4012_v5, %v1991_v21 }
 0x25f   : > { %v2557_v4 = vpack.c.bf16 %v2084_v9, %v2084_v9  ;;  %v2067_v34 = vadd.f32 %v4110_v61, %v2042_v32 }
 0x260   : > { %v1993_v59 = vpop.permute.xlu1 %1992 }
 0x261   : > { %2175 = vst.msk [vmem:[%s4118_s15 + $0x4] sm:$0xf] %vm2173_vm2, %v2557_v4  ;;  %v2085_v13 = vmax.f32 %v2067_v34, 0.0  ;;  %v2043_v57 = vmax.f32 %v4015_v18, %v1993_v59 }
 0x263   : > { %v2558_v6 = vpack.c.bf16 %v2085_v13, %v2085_v13  ;;  %v2068_v51 = vadd.f32 %v4110_v61, %v2043_v57 }
 0x264   : > { %v1995_v60 = vpop.permute.xlu0 %1994 }
 0x265   : > { %2176 = vst.msk [vmem:[%s4118_s15 + $0x8] sm:$0xf] %vm2173_vm2, %v2558_v6  ;;  %v2086_v8 = vmax.f32 %v2068_v51, 0.0  ;;  %v2044_v5 = vmax.f32 %v4024_v10, %v1995_v60 }
 0x266   : > { %v1997_v2 = vpop.permute.xlu1 %1996 }
 0x267   : > { %v2559_v40 = vpack.c.bf16 %v2086_v8, %v2086_v8  ;;  %v2069_v12 = vadd.f32 %v4110_v61, %v2044_v5  ;;  %v2045_v53 = vmax.f32 %v4027_v38, %v1997_v2 }
 0x269   : > { %2177 = vst.msk [vmem:[%s4118_s15 + $0xc] sm:$0xf] %vm2173_vm2, %v2559_v40  ;;  %v2087_v18 = vmax.f32 %v2069_v12, 0.0  ;;  %v2070_v27 = vadd.f32 %v4110_v61, %v2045_v53 }
 0x26b   : > { %v2560_v43 = vpack.c.bf16 %v2087_v18, %v2087_v18  ;;  %v2088_v31 = vmax.f32 %v2070_v27, 0.0 }
 0x26c   : > { %v1999_v54 = vpop.permute.xlu0 %1998 }
 0x26d   : > { %2178 = vst.msk [vmem:[%s4118_s15 + $0x10] sm:$0xf] %vm2173_vm2, %v2560_v43  ;;  %v2561_v20 = vpack.c.bf16 %v2088_v31, %v2088_v31  ;;  %v2046_v10 = vmax.f32 %v4036_v25, %v1999_v54 }
 0x26e   : > { %v2001_v1 = vpop.permute.xlu1 %2000 }
 0x26f   : > { %2179 = vst.msk [vmem:[%s4118_s15 + $0x14] sm:$0xf] %vm2173_vm2, %v2561_v20  ;;  %v2071_v38 = vadd.f32 %v4110_v61, %v2046_v10  ;;  %v2047_v11 = vmax.f32 %v4039_v33, %v2001_v1 }
 0x271   : > { %v2089_v15 = vmax.f32 %v2071_v38, 0.0  ;;  %v2072_v22 = vadd.f32 %v4110_v61, %v2047_v11 }
 0x273   : > { %v2562_v23 = vpack.c.bf16 %v2089_v15, %v2089_v15  ;;  %v2090_v24 = vmax.f32 %v2072_v22, 0.0 }
 0x274   : > { %v2003_v28 = vpop.permute.xlu0 %2002 }
 0x275   : > { %2180 = vst.msk [vmem:[%s4118_s15 + $0x18] sm:$0xf] %vm2173_vm2, %v2562_v23  ;;  %v2563_v0 = vpack.c.bf16 %v2090_v24, %v2090_v24  ;;  %v2048_v25 = vmax.f32 %v4048_v39, %v2003_v28 }
 0x276   : > { %v2005_v56 = vpop.permute.xlu1 %2004 }
 0x277   : > { %2181 = vst.msk [vmem:[%s4118_s15 + $0x1c] sm:$0xf] %vm2173_vm2, %v2563_v0  ;;  %v2073_v44 = vadd.f32 %v4110_v61, %v2048_v25  ;;  %v2049_v33 = vmax.f32 %v4051_v55, %v2005_v56 }
 0x279   : > { %v2091_v30 = vmax.f32 %v2073_v44, 0.0  ;;  %v2074_v36 = vadd.f32 %v4110_v61, %v2049_v33 }
 0x27b   : > { %v2564_v48 = vpack.c.bf16 %v2091_v30, %v2091_v30  ;;  %v2092_v37 = vmax.f32 %v2074_v36, 0.0 }
 0x27c   : > { %v2007_v47 = vpop.permute.xlu0 %2006 }
 0x27d   : > { %2182 = vst.msk [vmem:[%s4118_s15 + $0x20] sm:$0xf] %vm2173_vm2, %v2564_v48  ;;  %v2565_v45 = vpack.c.bf16 %v2092_v37, %v2092_v37  ;;  %v2050_v39 = vmax.f32 %v4060_v62, %v2007_v47 }
 0x27e   : > { %v2009_v42 = vpop.permute.xlu1 %2008 }
 0x27f   : > { %2183 = vst.msk [vmem:[%s4118_s15 + $0x24] sm:$0xf] %vm2173_vm2, %v2565_v45  ;;  %v2075_v41 = vadd.f32 %v4110_v61, %v2050_v39  ;;  %v2051_v55 = vmax.f32 %v4063_v58, %v2009_v42 }
 0x281   : > { %v2093_v35 = vmax.f32 %v2075_v41, 0.0  ;;  %v2076_v52 = vadd.f32 %v4110_v61, %v2051_v55 }
 0x283   : > { %v2566_v50 = vpack.c.bf16 %v2093_v35, %v2093_v35  ;;  %v2094_v26 = vmax.f32 %v2076_v52, 0.0 }
 0x284   : > { %v2011_v29 = vpop.permute.xlu0 %2010 }
 0x285   : > { %2184 = vst.msk [vmem:[%s4118_s15 + $0x28] sm:$0xf] %vm2173_vm2, %v2566_v50  ;;  %v2567_v46 = vpack.c.bf16 %v2094_v26, %v2094_v26  ;;  %v2052_v62 = vmax.f32 %v4072_v7, %v2011_v29 }
 0x286   : > { %v2013_v49 = vpop.permute.xlu1 %2012 }
 0x287   : > { %2185 = vst.msk [vmem:[%s4118_s15 + $0x2c] sm:$0xf] %vm2173_vm2, %v2567_v46  ;;  %v2077_v19 = vadd.f32 %v4110_v61, %v2052_v62  ;;  %v2053_v58 = vmax.f32 %v4075_v14, %v2013_v49 }
 0x289   : > { %v2095_v21 = vmax.f32 %v2077_v19, 0.0  ;;  %v2078_v9 = vadd.f32 %v4110_v61, %v2053_v58 }
 0x28b   : > { %v2568_v32 = vpack.c.bf16 %v2095_v21, %v2095_v21  ;;  %v2096_v4 = vmax.f32 %v2078_v9, 0.0 }
 0x28c   : > { %v2015_v34 = vpop.permute.xlu0 %2014 }
 0x28d   : > { %2186 = vst.msk [vmem:[%s4118_s15 + $0x30] sm:$0xf] %vm2173_vm2, %v2568_v32  ;;  %v2569_v59 = vpack.c.bf16 %v2096_v4, %v2096_v4  ;;  %v2054_v7 = vmax.f32 %v4084_v3, %v2015_v34 }
 0x28e   : > { %v2017_v13 = vpop.permute.xlu1 %2016 }
 0x28f   : > { %2187 = vst.msk [vmem:[%s4118_s15 + $0x34] sm:$0xf] %vm2173_vm2, %v2569_v59  ;;  %v2079_v57 = vadd.f32 %v4110_v61, %v2054_v7  ;;  %v2055_v14 = vmax.f32 %v4087_v63, %v2017_v13 }
 0x291   : > { %v2097_v6 = vmax.f32 %v2079_v57, 0.0  ;;  %v2080_v51 = vadd.f32 %v4110_v61, %v2055_v14 }
 0x293   : > { %v2570_v60 = vpack.c.bf16 %v2097_v6, %v2097_v6  ;;  %v2098_v8 = vmax.f32 %v2080_v51, 0.0 }
 0x294   : > { %v2019_v5 = vpop.permute.xlu0 %2018 }
 0x295   : > { %2188 = vst.msk [vmem:[%s4118_s15 + $0x38] sm:$0xf] %vm2173_vm2, %v2570_v60  ;;  %v2571_v2 = vpack.c.bf16 %v2098_v8, %v2098_v8  ;;  %v2056_v3 = vmax.f32 %v4096_v16, %v2019_v5 }
 0x296   : > { %v2021_v40 = vpop.permute.xlu1 %2020 }
 0x297   : > { %2189 = vst.msk [vmem:[%s4118_s15 + $0x3c] sm:$0xf] %vm2173_vm2, %v2571_v2  ;;  %v2081_v12 = vadd.f32 %v4110_v61, %v2056_v3  ;;  %v2057_v63 = vmax.f32 %v4099_v17, %v2021_v40 }
 0x299   : > { %v2099_v53 = vmax.f32 %v2081_v12, 0.0  ;;  %v2082_v18 = vadd.f32 %v4110_v61, %v2057_v63 }
 0x29b   : > { %v2572_v27 = vpack.c.bf16 %v2099_v53, %v2099_v53  ;;  %v2100_v43 = vmax.f32 %v2082_v18, 0.0 }
 0x29d   : > { %2190 = vst.msk [vmem:[%s4118_s15 + $0x40] sm:$0xf] %vm2173_vm2, %v2572_v27  ;;  %v2573_v31 = vpack.c.bf16 %v2100_v43, %v2100_v43 }
 0x29f   : > { %2191 = vst.msk [vmem:[%s4118_s15 + $0x44] sm:$0xf] %vm2173_vm2, %v2573_v31 }
 0x2a0 PF: > { %p10_p9 = scmp.ge.s32.totalorder %s3225_s16, 4   ;;  %s4203_s12 = smov %s3179_s13 }
 0x2a1   : > { %s4204_s13 = smov %s3234_s19  ;;  %s4205_s14 = smov %s3225_s16 }
 0x2a2   :  { %12 = sbr.rel (!%p10_p9) target bundleno = 2 (0x2), region = 100 }

// kernel: emotion_cnn_forward.5
= control target key start
LH: loop header
LB: loop body
LE: loop exit
PB: predicated region body
PF: predicated region fallthrough
CT: control target
= control target key end

     0   :  { %10 = vsyncpa [#allocation4], 0  ;;  %s2079_s18 = smov 0   ;;  %s2081_s19 = smov 0   ;;  %s2294_s0 = inlined_call_operand.vmem [shape: bf16[2,9216], index: 0, kind: input, shape index: {}]   ;;  %s2295_s1 = inlined_call_operand.vmem [shape: bf16[9216,128], index: 1, kind: input, shape index: {}]   ;;  %s2296_s2 = inlined_call_operand.vmem [shape: f32[1,128], index: 2, kind: input, shape index: {}]   ;;  %s2297_s3 = inlined_call_operand.vmem [shape: bf16[128,7], index: 3, kind: input, shape index: {}]   ;;  %s2298_s4 = inlined_call_operand.vmem [shape: f32[1,7], index: 4, kind: input, shape index: {}]   ;;  %s2299_s5 = inlined_call_operand.hbm [shape: f32[2,7], index: 5, kind: output, shape index: {}]  }
   0x1   :  { %s2083_s20 = smov 0  }
   0x2 LB: > { %s1571_s21 = sadd.s32 4294967295, %s2042_s20   ;;  %s25_s22 = sadd.s32 1, %s2038_s19  ;;  %s2042_s20 = sphi %s2083_s20, %s16_s20   ;;  %s2038_s19 = sphi %s2081_s19, %s2302_s19   ;;  %s2034_s18 = sphi %s2079_s18, %s2301_s18  }
   0x3   : > { %p26_p0 = scmp.ge.s32.totalorder %s25_s22, 6  ;;  %p1574_p1 = scmp.ge.s32.totalorder %s2042_s20, 1 }
   0x4   : > { %p217_p2 = scmp.lt.s32.totalorder %s2042_s20, 7 }
   0x5   : > { %s2304_s22 = smov (%p26_p0, %s25_s22), 0 }
   0x6   : > { %p218_p3 = pnand %p1574_p1, %p217_p2 }
   0x7   : > { %s248_s23 = smul.u32 (!%p218_p3), 12, %s2034_s18  ;;  %p1576_p6 = scmp.ne.s32.totalorder (!%p218_p3), %s2034_s18, 0 }
   0x8   : > { %221 = sbr.rel (%p218_p3) target bundleno = 597 (0x255), region = 40 }
   0x9   : > { %s257_s24 = smul.u32 (!%p218_p3), 192, %s2034_s18  ;;  %p251_p4 = scmp.lt.s32.totalorder (!%p218_p3), %s248_s23, 71 }
   0xb   : > { %p258_p5 = scmp.lt.s32.totalorder (!%p218_p3), %s257_s24, 1151 }
   0xf   : > { %s2306_s23 = smov (!%p251_p4, %s248_s23), 71  ;;  %s2308_s24 = smov (!%p258_p5, %s257_s24), 1151 }
  0x10   : > { %s2105_s27 = scalar_lea.vmem %s2294_s0, %s2306_s23  ;;  %s1575_s28 = sshll.u32 %s2308_s24, 2  ;;  %v2044_v0 = vmov (!%p1576_p6), 0.0  }
  0x11   : > { %s2110_s6 = scalar_lea.vmem %s2295_s1, %s1575_s28  ;;  %267 = sbr.rel (%p1576_p6) target bundleno = 24 (0x18), region = 44  ;;  %268 = vst [vmem:[#allocation2] sm:$0x3] (!%p1576_p6), %v2044_v0 }
  0x18 PF: > { %v1885_v1 = vld [vmem:[%s2110_s6 + $0x40] sm:$0xff]   ;;  %v1889_v5 = vld [vmem:[%s2110_s6 + $0x48] sm:$0xff]   ;;  %v1893_v9 = vld [vmem:[%s2110_s6 + $0x50] sm:$0xff]   ;;  %v470_v29 = vlaneseq  ;;  %v2045_v37 = vmov 1966171168   ;;  %p1674_p7 = scmp.ne.s32.totalorder %s2034_s18, 5 }
  0x19   : > { %v1886_v2 = vld [vmem:[%s2110_s6 + $0xc0] sm:$0xff]   ;;  %1689 = vmatprep.subr.bf16.mxu0 %v1885_v1  ;;  %v1890_v6 = vld [vmem:[%s2110_s6 + $0xc8] sm:$0xff]   ;;  %v1894_v10 = vld [vmem:[%s2110_s6 + $0xd0] sm:$0xff]   ;;  %v468_v38 = vunpack.c.l.s4 %v2045_v37  ;;  %vm2047_vm0 = vmmov (!%p1674_p7), 0   ;;  %vm1495_vm1 = vcmask (!%p1674_p7), 50176  }
  0x1a   : > { %v1887_v3 = vld [vmem:[%s2110_s6] sm:$0xff]   ;;  %1711 = vmatprep.subr.bf16.mxu1 %v1886_v2  ;;  %v1891_v7 = vld [vmem:[%s2110_s6 + $0x8] sm:$0xff]   ;;  %v1895_v11 = vld [vmem:[%s2110_s6 + $0x10] sm:$0xff]   ;;  %v471_v34 = vshrl.u32 %v470_v29, 7 }
  0x1b   : > { %v1888_v4 = vld [vmem:[%s2110_s6 + $0x80] sm:$0xff]   ;;  %1690 = vmatpush3.bf16.msra.mxu0 %v1887_v3  ;;  %v1892_v8 = vld [vmem:[%s2110_s6 + $0x88] sm:$0xff]   ;;  %v1896_v12 = vld [vmem:[%s2110_s6 + $0x90] sm:$0xff]   ;;  %v469_v41 = vunpack.c.0.s8 %v468_v38 }
  0x1c   : > { %1712 = vmatpush3.bf16.msra.mxu1 %v1888_v4  ;;  %1691 = vmatprep.subr.bf16.mxu0 %v1889_v5  ;;  %v1897_v13 = vld [vmem:[%s2110_s6 + $0x58] sm:$0xff]   ;;  %v1901_v17 = vld [vmem:[%s2110_s6 + $0x60] sm:$0xff]   ;;  %v1905_v21 = vld [vmem:[%s2110_s6 + $0x68] sm:$0xff]  }
  0x1d   : > { %1713 = vmatprep.subr.bf16.mxu1 %v1890_v6  ;;  %v1898_v14 = vld [vmem:[%s2110_s6 + $0xd8] sm:$0xff]   ;;  %v1902_v18 = vld [vmem:[%s2110_s6 + $0xe0] sm:$0xff]   ;;  %v1906_v22 = vld [vmem:[%s2110_s6 + $0xe8] sm:$0xff]   ;;  %v2148_v42 = vsub.s32 %v469_v41, %v471_v34 }
  0x1e   : > { %v1899_v15 = vld [vmem:[%s2110_s6 + $0x18] sm:$0xff]   ;;  %v1903_v19 = vld [vmem:[%s2110_s6 + $0x20] sm:$0xff]   ;;  %v1907_v23 = vld [vmem:[%s2110_s6 + $0x28] sm:$0xff]  }
  0x1f   : > { %1692 = vmatpush3.bf16.msra.mxu0 %v1891_v7  ;;  %v1900_v16 = vld [vmem:[%s2110_s6 + $0x98] sm:$0xff]   ;;  %v1904_v20 = vld [vmem:[%s2110_s6 + $0xa0] sm:$0xff]   ;;  %v1908_v24 = vld [vmem:[%s2110_s6 + $0xa8] sm:$0xff]  }
  0x20   : > { %1714 = vmatpush3.bf16.msra.mxu1 %v1892_v8  ;;  %1693 = vmatprep.subr.bf16.mxu0 %v1893_v9  ;;  %v1909_v25 = vld [vmem:[%s2110_s6 + $0x70] sm:$0xff]   ;;  %v1913_v30 = vld [vmem:[%s2110_s6 + $0x78] sm:$0xff]   ;;  %v270_v35 = vld [vmem:[%s2105_s27] sm:$0xff] }
  0x21   : > { %1715 = vmatprep.subr.bf16.mxu1 %v1894_v10  ;;  %v1910_v26 = vld [vmem:[%s2110_s6 + $0xf0] sm:$0xff]   ;;  %v1914_v31 = vld [vmem:[%s2110_s6 + $0xf8] sm:$0xff]   ;;  %v1918_v36 = vld [vmem:[%s2110_s6 + $0x140] sm:$0xff]   ;;  %v466_v40 = vcombine.high %v270_v35, %v270_v35  ;;  %v473_v43 = vrot.slane %v270_v35, %v2148_v42 }
  0x22   : > { %v1911_v27 = vld [vmem:[%s2110_s6 + $0x30] sm:$0xff]   ;;  %v1915_v32 = vld [vmem:[%s2110_s6 + $0x38] sm:$0xff]   ;;  %v1919_v39 = vld [vmem:[%s2110_s6 + $0x1c0] sm:$0xff]  }
  0x23   : > { %1694 = vmatpush3.bf16.msra.mxu0 %v1895_v11  ;;  %v1912_v28 = vld [vmem:[%s2110_s6 + $0xb0] sm:$0xff]   ;;  %v1916_v33 = vld [vmem:[%s2110_s6 + $0xb8] sm:$0xff]   ;;  %v2152_v44 = vrot.slane %v466_v40, %v2148_v42  ;;  %v481_v45 = vcombine.high %v473_v43, %v473_v43  ;;  %v489_v46 = vrot.slane %v473_v43, %v2148_v42  ;;  %v1920_v49 = vld [vmem:[%s2110_s6 + $0x100] sm:$0xff]  }
  0x24   : > { %1716 = vmatpush3.bf16.msra.mxu1 %v1896_v12  ;;  %1695 = vmatprep.subr.bf16.mxu0 %v1897_v13  ;;  %v1922_v52 = vld [vmem:[%s2110_s6 + $0x148] sm:$0xff]   ;;  %v1921_v54 = vld [vmem:[%s2110_s6 + $0x180] sm:$0xff]   ;;  %v1926_v58 = vld [vmem:[%s2110_s6 + $0x150] sm:$0xff]  }
  0x25   : > { %1717 = vmatprep.subr.bf16.mxu1 %v1898_v14  ;;  %v482_v47 = vcombine.high %v2152_v44, %v2152_v44  ;;  %v503_v48 = vrot.slane %v481_v45, %v2148_v42  ;;  %v511_v51 = vcombine.high %v489_v46, %v489_v46  ;;  %v1923_v55 = vld [vmem:[%s2110_s6 + $0x1c8] sm:$0xff]   ;;  %v1927_v60 = vld [vmem:[%s2110_s6 + $0x1d0] sm:$0xff]   ;;  %v1930_v62 = vld [vmem:[%s2110_s6 + $0x158] sm:$0xff]  }
  0x26   : > { %v1924_v57 = vld [vmem:[%s2110_s6 + $0x108] sm:$0xff]   ;;  %v1928_v61 = vld [vmem:[%s2110_s6 + $0x110] sm:$0xff]   ;;  %v1931_v0 = vld [vmem:[%s2110_s6 + $0x1d8] sm:$0xff]  }
  0x27   : > { %1696 = vmatpush3.bf16.msra.mxu0 %v1899_v15  ;;  %v510_v50 = vrot.slane %v482_v47, %v2148_v42  ;;  %1159 = vmatprep.mubr.bf16.mxu0 %v503_v48  ;;  %v513_v53 = vcombine.high %v503_v48, %v503_v48  ;;  %v1925_v59 = vld [vmem:[%s2110_s6 + $0x188] sm:$0xff]   ;;  %v1929_v63 = vld [vmem:[%s2110_s6 + $0x190] sm:$0xff]   ;;  %v1932_v1 = vld [vmem:[%s2110_s6 + $0x118] sm:$0xff]  }
  0x28   : > { %1718 = vmatpush3.bf16.msra.mxu1 %v1900_v16  ;;  %1697 = vmatprep.subr.bf16.mxu0 %v1901_v17  ;;  %v1934_v2 = vld [vmem:[%s2110_s6 + $0x160] sm:$0xff]   ;;  %v1933_v3 = vld [vmem:[%s2110_s6 + $0x198] sm:$0xff]   ;;  %v1938_v6 = vld [vmem:[%s2110_s6 + $0x168] sm:$0xff]  }
  0x29   : > { %1719 = vmatprep.subr.bf16.mxu1 %v1902_v18  ;;  %v514_v56 = vcombine.high %v510_v50, %v510_v50  ;;  %1199 = vmatprep.mubr.bf16.mxu1 %v513_v53  ;;  %v1935_v4 = vld [vmem:[%s2110_s6 + $0x1e0] sm:$0xff]   ;;  %v1939_v8 = vld [vmem:[%s2110_s6 + $0x1e8] sm:$0xff]   ;;  %v1942_v10 = vld [vmem:[%s2110_s6 + $0x170] sm:$0xff]   ;;  %v496_v18 = vrot.slane %v2152_v44, %v2148_v42 }
  0x2a   : > { %v1936_v5 = vld [vmem:[%s2110_s6 + $0x120] sm:$0xff]   ;;  %v1940_v9 = vld [vmem:[%s2110_s6 + $0x128] sm:$0xff]   ;;  %v1943_v12 = vld [vmem:[%s2110_s6 + $0x1f0] sm:$0xff]  }
  0x2b   : > { %1698 = vmatpush3.bf16.msra.mxu0 %v1903_v19  ;;  %v1937_v7 = vld [vmem:[%s2110_s6 + $0x1a0] sm:$0xff]   ;;  %v1941_v11 = vld [vmem:[%s2110_s6 + $0x1a8] sm:$0xff]   ;;  %v1944_v13 = vld [vmem:[%s2110_s6 + $0x130] sm:$0xff]  }
  0x2c   : > { %1720 = vmatpush3.bf16.msra.mxu1 %v1904_v20  ;;  %1699 = vmatprep.subr.bf16.mxu0 %v1905_v21  ;;  %v1946_v14 = vld [vmem:[%s2110_s6 + $0x178] sm:$0xff]   ;;  %v1945_v15 = vld [vmem:[%s2110_s6 + $0x1b0] sm:$0xff]   ;;  %v1950_v19 = vld [vmem:[%s2110_s6 + $0x240] sm:$0xff]  }
  0x2d   : > { %1721 = vmatprep.subr.bf16.mxu1 %v1906_v22  ;;  %v1947_v16 = vld [vmem:[%s2110_s6 + $0x1f8] sm:$0xff]   ;;  %v1951_v21 = vld [vmem:[%s2110_s6 + $0x2c0] sm:$0xff]   ;;  %v1957_v29 = vld [vmem:[%s2110_s6 + $0x288] sm:$0xff]  }
  0x2e   : > { %v1948_v17 = vld [vmem:[%s2110_s6 + $0x138] sm:$0xff]   ;;  %v1952_v22 = vld [vmem:[%s2110_s6 + $0x200] sm:$0xff]   ;;  %v1970_v40 = vld [vmem:[%s2110_s6 + $0x268] sm:$0xff]  }
  0x2f   : > { %1700 = vmatpush3.bf16.msra.mxu0 %v1907_v23  ;;  %v1949_v20 = vld [vmem:[%s2110_s6 + $0x1b8] sm:$0xff]   ;;  %v512_v23 = vcombine.high %v496_v18, %v496_v18  ;;  %v1967_v38 = vld [vmem:[%s2110_s6 + $0x2e0] sm:$0xff]   ;;  %v1971_v43 = vld [vmem:[%s2110_s6 + $0x2e8] sm:$0xff]  }
  0x30   : > { %1722 = vmatpush3.bf16.msra.mxu1 %v1908_v24  ;;  %1701 = vmatprep.subr.bf16.mxu0 %v1909_v25  ;;  %v1954_v24 = vld [vmem:[%s2110_s6 + $0x248] sm:$0xff]   ;;  %v1953_v25 = vld [vmem:[%s2110_s6 + $0x280] sm:$0xff]   ;;  %v1963_v34 = vld [vmem:[%s2110_s6 + $0x2d8] sm:$0xff]  }
  0x31   : > { %1723 = vmatprep.subr.bf16.mxu1 %v1910_v26  ;;  %v1955_v26 = vld [vmem:[%s2110_s6 + $0x2c8] sm:$0xff]   ;;  %v1964_v35 = vld [vmem:[%s2110_s6 + $0x218] sm:$0xff]   ;;  %v1969_v41 = vld [vmem:[%s2110_s6 + $0x2a0] sm:$0xff]  }
  0x32   : > { %v1965_v37 = vld [vmem:[%s2110_s6 + $0x298] sm:$0xff]   ;;  %v1972_v44 = vld [vmem:[%s2110_s6 + $0x228] sm:$0xff]   ;;  %v1974_v45 = vld [vmem:[%s2110_s6 + $0x270] sm:$0xff]  }
  0x33   : > { %1702 = vmatpush3.bf16.msra.mxu0 %v1911_v27  ;;  %v1956_v27 = vld [vmem:[%s2110_s6 + $0x208] sm:$0xff]   ;;  %v1977_v53 = vld [vmem:[%s2110_s6 + $0x2b0] sm:$0xff]  }
  0x34   : > { %1724 = vmatpush3.bf16.msra.mxu1 %v1912_v28  ;;  %1703 = vmatprep.subr.bf16.mxu0 %v1913_v30  ;;  %v1958_v28 = vld [vmem:[%s2110_s6 + $0x250] sm:$0xff]   ;;  %v1973_v47 = vld [vmem:[%s2110_s6 + $0x2a8] sm:$0xff]  }
  0x35   : > { %1725 = vmatprep.subr.bf16.mxu1 %v1914_v31  ;;  %v1959_v30 = vld [vmem:[%s2110_s6 + $0x2d0] sm:$0xff]  }
  0x36   : > { %v1960_v31 = vld [vmem:[%s2110_s6 + $0x210] sm:$0xff]  }
  0x37   : > { %1704 = vmatpush3.bf16.msra.mxu0 %v1915_v32  ;;  %v1962_v32 = vld [vmem:[%s2110_s6 + $0x258] sm:$0xff]  }
  0x38   : > { %1726 = vmatpush3.bf16.msra.mxu1 %v1916_v33  ;;  %1733 = vmatprep.subr.bf16.mxu0 %v1918_v36  ;;  %v1961_v33 = vld [vmem:[%s2110_s6 + $0x290] sm:$0xff]   ;;  %v1966_v36 = vld [vmem:[%s2110_s6 + $0x260] sm:$0xff]  }
  0x39   : > { %1755 = vmatprep.subr.bf16.mxu1 %v1919_v39  ;;  %v1968_v39 = vld [vmem:[%s2110_s6 + $0x220] sm:$0xff]  }
  0x3a   : > { %1160 = vmatmul.mubr.bf16.vlgmr.msra.gmra.mrb[0].mxu0 %v489_v46  ;;  %v1577_v46 = vld.sshfl [vmem:[%s2105_s27 + $0x8] sm:$0x33 pattern:$0x75316420] }
  0x3b   : > { %1734 = vmatpush3.bf16.msra.mxu0 %v1920_v49  ;;  %1200 = vmatmul.mubr.bf16.vlgmr.msra.gmra.mrb[0].mxu1 %v511_v51  ;;  %v522_v48 = vcombine.high %v1577_v46, %v1577_v46  ;;  %v1975_v49 = vld [vmem:[%s2110_s6 + $0x2f0] sm:$0xff]  }
  0x3c   : > { %1735 = vmatprep.subr.bf16.mxu0 %v1922_v52  ;;  %1756 = vmatpush3.bf16.msra.mxu1 %v1921_v54  ;;  %v1978_v52 = vld [vmem:[%s2110_s6 + $0x278] sm:$0xff]  }
  0x3d   : > { %1239 = vmatprep.mubr.bf16.mxu0 %v510_v50  ;;  %1757 = vmatprep.subr.bf16.mxu1 %v1923_v55  ;;  %v1976_v50 = vld [vmem:[%s2110_s6 + $0x230] sm:$0xff]   ;;  %v536_v51 = vrot.slane %v522_v48, %v2148_v42  ;;  %v1979_v55 = vld [vmem:[%s2110_s6 + $0x2f8] sm:$0xff]  }
  0x3e   : > { %1279 = vmatprep.mubr.bf16.mxu1 %v514_v56  ;;  %v1980_v56 = vld [vmem:[%s2110_s6 + $0x238] sm:$0xff]  }
  0x3f   : > { %1736 = vmatpush3.bf16.msra.mxu0 %v1924_v57  ;;  %v538_v54 = vcombine.high %v536_v51, %v536_v51  ;;  %v529_v57 = vrot.slane %v1577_v46, %v2148_v42 }
  0x40   : > { %1737 = vmatprep.subr.bf16.mxu0 %v1926_v58  ;;  %1758 = vmatpush3.bf16.msra.mxu1 %v1925_v59  ;;  %v1981_v58 = vld [vmem:[%s2110_s6 + $0x2b8] sm:$0xff]  }
  0x41   : > { %1759 = vmatprep.subr.bf16.mxu1 %v1927_v60  ;;  %v537_v59 = vcombine.high %v529_v57, %v529_v57 }
  0x43   : > { %1738 = vmatpush3.bf16.msra.mxu0 %v1928_v61 }
  0x44   : > { %1739 = vmatprep.subr.bf16.mxu0 %v1930_v62  ;;  %1760 = vmatpush3.bf16.msra.mxu1 %v1929_v63 }
  0x45   : > { %1761 = vmatprep.subr.bf16.mxu1 %v1931_v0 }
  0x47   : > { %1740 = vmatpush3.bf16.msra.mxu0 %v1932_v1 }
  0x48   : > { %1741 = vmatprep.subr.bf16.mxu0 %v1934_v2  ;;  %1762 = vmatpush3.bf16.msra.mxu1 %v1933_v3 }
  0x49   : > { %1763 = vmatprep.subr.bf16.mxu1 %v1935_v4 }
  0x4b   : > { %1742 = vmatpush3.bf16.msra.mxu0 %v1936_v5 }
  0x4c   : > { %1743 = vmatprep.subr.bf16.mxu0 %v1938_v6  ;;  %1764 = vmatpush3.bf16.msra.mxu1 %v1937_v7 }
  0x4d   : > { %1765 = vmatprep.subr.bf16.mxu1 %v1939_v8 }
  0x4f   : > { %1744 = vmatpush3.bf16.msra.mxu0 %v1940_v9 }
  0x50   : > { %1745 = vmatprep.subr.bf16.mxu0 %v1942_v10  ;;  %1766 = vmatpush3.bf16.msra.mxu1 %v1941_v11 }
  0x51   : > { %1767 = vmatprep.subr.bf16.mxu1 %v1943_v12 }
  0x53   : > { %1746 = vmatpush3.bf16.msra.mxu0 %v1944_v13 }
  0x54   : > { %1747 = vmatprep.subr.bf16.mxu0 %v1946_v14  ;;  %1768 = vmatpush3.bf16.msra.mxu1 %v1945_v15 }
  0x55   : > { %1769 = vmatprep.subr.bf16.mxu1 %v1947_v16 }
  0x57   : > { %1748 = vmatpush3.bf16.msra.mxu0 %v1948_v17 }
  0x58   : > { %1777 = vmatprep.subr.bf16.mxu0 %v1950_v19  ;;  %1770 = vmatpush3.bf16.msra.mxu1 %v1949_v20 }
  0x59   : > { %1799 = vmatprep.subr.bf16.mxu1 %v1951_v21 }
  0x5a   : > { %1240 = vmatmul.mubr.bf16.vlgmr.msra.gmra.mrb[4].mxu0 %v496_v18 }
  0x5b   : > { %1778 = vmatpush3.bf16.msra.mxu0 %v1952_v22  ;;  %1280 = vmatmul.mubr.bf16.vlgmr.msra.gmra.mrb[4].mxu1 %v512_v23 }
  0x5c   : > { %1779 = vmatprep.subr.bf16.mxu0 %v1954_v24  ;;  %1800 = vmatpush3.bf16.msra.mxu1 %v1953_v25 }
  0x5d   : > { %1801 = vmatprep.subr.bf16.mxu1 %v1955_v26  ;;  %1319 = vmatprep.mubr.bf16.mxu0 %v536_v51 }
  0x5e   : > { %1359 = vmatprep.mubr.bf16.mxu1 %v538_v54 }
  0x5f   : > { %1780 = vmatpush3.bf16.msra.mxu0 %v1956_v27 }
  0x60   : > { %1781 = vmatprep.subr.bf16.mxu0 %v1958_v28  ;;  %1802 = vmatpush3.bf16.msra.mxu1 %v1957_v29  ;;  %v269_v28 = vld [vmem:[#allocation2] sm:$0x3] }
  0x61   : > { %1803 = vmatprep.subr.bf16.mxu1 %v1959_v30 }
  0x63   : > { %1782 = vmatpush3.bf16.msra.mxu0 %v1960_v31 }
  0x64   : > { %1783 = vmatprep.subr.bf16.mxu0 %v1962_v32  ;;  %1804 = vmatpush3.bf16.msra.mxu1 %v1961_v33  ;;  %v1982_v32 = vld [vmem:[%s2297_s3] sm:$0xff] (!%p1674_p7)   ;;  %v2046_v33 = vmov (!%p1674_p7), 0.0  }
  0x65   : > { %1805 = vmatprep.subr.bf16.mxu1 %v1963_v34  ;;  %v1983_v34 = vld [vmem:[%s2297_s3 + $0x8] sm:$0xff] (!%p1674_p7)  }
  0x67   : > { %1784 = vmatpush3.bf16.msra.mxu0 %v1964_v35  ;;  %v1984_v35 = vld [vmem:[%s2297_s3 + $0x10] sm:$0xff] (!%p1674_p7)  }
  0x68   : > { %1785 = vmatprep.subr.bf16.mxu0 %v1966_v36  ;;  %1806 = vmatpush3.bf16.msra.mxu1 %v1965_v37  ;;  %v1985_v36 = vld [vmem:[%s2297_s3 + $0x18] sm:$0xff] (!%p1674_p7)   ;;  %v1986_v37 = vld [vmem:[%s2297_s3 + $0x20] sm:$0xff] (!%p1674_p7)  }
  0x69   : > { %1807 = vmatprep.subr.bf16.mxu1 %v1967_v38  ;;  %v1987_v38 = vld [vmem:[%s2297_s3 + $0x28] sm:$0xff] (!%p1674_p7)  }
  0x6b   : > { %1786 = vmatpush3.bf16.msra.mxu0 %v1968_v39 }
  0x6c   : > { %1787 = vmatprep.subr.bf16.mxu0 %v1970_v40  ;;  %1808 = vmatpush3.bf16.msra.mxu1 %v1969_v41  ;;  %v1675_v40 = vld [vmem:[%s2296_s2] ss:$0 sm:$0xff] (!%p1674_p7) }
  0x6d   : > { %1809 = vmatprep.subr.bf16.mxu1 %v1971_v43  ;;  %v1988_v43 = vld [vmem:[%s2297_s3 + $0x30] sm:$0xff] (!%p1674_p7)  }
  0x6f   : > { %1788 = vmatpush3.bf16.msra.mxu0 %v1972_v44 }
  0x70   : > { %1789 = vmatprep.subr.bf16.mxu0 %v1974_v45  ;;  %1810 = vmatpush3.bf16.msra.mxu1 %v1973_v47  ;;  %v1989_v45 = vld [vmem:[%s2297_s3 + $0x38] sm:$0xff] (!%p1674_p7)   ;;  %v1676_v47 = vld [vmem:[%s2298_s4] ss:$0 sm:$0xff] (!%p1674_p7) }
  0x71   : > { %1811 = vmatprep.subr.bf16.mxu1 %v1975_v49 }
  0x73   : > { %1790 = vmatpush3.bf16.msra.mxu0 %v1976_v50 }
  0x74   : > { %1791 = vmatprep.subr.bf16.mxu0 %v1978_v52  ;;  %1812 = vmatpush3.bf16.msra.mxu1 %v1977_v53 }
  0x75   : > { %1813 = vmatprep.subr.bf16.mxu1 %v1979_v55 }
  0x77   : > { %1792 = vmatpush3.bf16.msra.mxu0 %v1980_v56 }
  0x78   : > { %1814 = vmatpush3.bf16.msra.mxu1 %v1981_v58  ;;  %1830 = vmatprep.subr.bf16.mxu0 (!%p1674_p7), %v2046_v33 }
  0x7a   : > { %1320 = vmatmul.mubr.bf16.vlgmr.msra.gmra.mrb[8].mxu0 %v529_v57 }
  0x7b   : > { %1360 = vmatmul.mubr.bf16.vlgmr.msra.gmra.mrb[8].mxu1 %v537_v59  ;;  %1831 = vmatpush3.bf16.msra.mxu0 (!%p1674_p7), %v1982_v32 }
  0x7c   : > { %1846 = vmatprep.mubr.msk.bf16.mxu0 (!%p1674_p7), %vm2047_vm0, %v2046_v33  ;;  %1832 = vmatprep.subr.bf16.mxu0 (!%p1674_p7), %v2046_v33 }
  0x7f   : > { %1833 = vmatpush3.bf16.msra.mxu0 (!%p1674_p7), %v1983_v34 }
  0x80   : > { %1834 = vmatprep.subr.bf16.mxu0 (!%p1674_p7), %v2046_v33 }
  0x83   : > { %1835 = vmatpush3.bf16.msra.mxu0 (!%p1674_p7), %v1984_v35 }
  0x84   : > { %1836 = vmatprep.subr.bf16.mxu0 (!%p1674_p7), %v2046_v33 }
  0x87   : > { %1837 = vmatpush3.bf16.msra.mxu0 (!%p1674_p7), %v1985_v36 }
  0x88   : > { %1838 = vmatprep.subr.bf16.mxu0 (!%p1674_p7), %v2046_v33 }
  0x8b   : > { %1839 = vmatpush3.bf16.msra.mxu0 (!%p1674_p7), %v1986_v37 }
  0x8c   : > { %1840 = vmatprep.subr.bf16.mxu0 (!%p1674_p7), %v2046_v33 }
  0x8f   : > { %1841 = vmatpush3.bf16.msra.mxu0 (!%p1674_p7), %v1987_v38 }
  0x90   : > { %1842 = vmatprep.subr.bf16.mxu0 (!%p1674_p7), %v2046_v33 }
  0x93   : > { %1843 = vmatpush3.bf16.msra.mxu0 (!%p1674_p7), %v1988_v43 }
  0x94   : > { %1844 = vmatprep.subr.bf16.mxu0 (!%p1674_p7), %v2046_v33 }
  0x97   : > { %1845 = vmatpush3.bf16.msra.mxu0 (!%p1674_p7), %v1989_v45 }
 0x10d   : > { %v1705_v60 = vpop.f32.mrb[0].mxu0 }
 0x10e   : > { %v1706_v61 = vpop.f32.mrb[1].mxu0  ;;  %v1727_v62 = vpop.f32.mrb[0].mxu1 }
 0x10f   : > { %v1707_v63 = vadd.f32 %v1706_v61, %v1705_v60  ;;  %v1708_v0 = vpop.f32.mrb[2].mxu0  ;;  %v1728_v1 = vpop.f32.mrb[1].mxu1 }
 0x110   : > { %v1709_v2 = vpop.f32.mrb[3].mxu0  ;;  %v1729_v3 = vadd.f32 %v1728_v1, %v1727_v62  ;;  %v1730_v4 = vpop.f32.mrb[2].mxu1 }
 0x111   : > { %v1731_v5 = vpop.f32.mrb[3].mxu1 }
 0x112   : > { %v1202_v6 = vadd.f32 %v1729_v3, %v1707_v63 }
 0x12d   : > { %v1749_v42 = vpop.f32.mrb[4].mxu0 }
 0x12e   : > { %v1750_v7 = vpop.f32.mrb[5].mxu0  ;;  %v1771_v8 = vpop.f32.mrb[4].mxu1 }
 0x12f   : > { %v1751_v9 = vadd.f32 %v1750_v7, %v1749_v42  ;;  %v1752_v10 = vpop.f32.mrb[6].mxu0  ;;  %v1772_v11 = vpop.f32.mrb[5].mxu1 }
 0x130   : > { %v1753_v12 = vpop.f32.mrb[7].mxu0  ;;  %v1773_v14 = vadd.f32 %v1772_v11, %v1771_v8  ;;  %v1774_v15 = vpop.f32.mrb[6].mxu1 }
 0x131   : > { %v1242_v13 = vadd.f32 %v1751_v9, %v1202_v6  ;;  %v1775_v16 = vpop.f32.mrb[7].mxu1 }
 0x133   : > { %v1282_v17 = vadd.f32 %v1773_v14, %v1242_v13 }
 0x14d   : > { %v1793_v18 = vpop.f32.mrb[8].mxu0 }
 0x14e   : > { %v1794_v19 = vpop.f32.mrb[9].mxu0  ;;  %v1815_v20 = vpop.f32.mrb[8].mxu1 }
 0x14f   : > { %v1795_v21 = vadd.f32 %v1794_v19, %v1793_v18  ;;  %v1796_v22 = vpop.f32.mrb[10].mxu0  ;;  %v1816_v23 = vpop.f32.mrb[9].mxu1 }
 0x150   : > { %v1797_v24 = vpop.f32.mrb[11].mxu0  ;;  %v1817_v26 = vadd.f32 %v1816_v23, %v1815_v20  ;;  %v1818_v27 = vpop.f32.mrb[10].mxu1 }
 0x151   : > { %v1322_v25 = vadd.f32 %v1795_v21, %v1282_v17  ;;  %v1819_v29 = vpop.f32.mrb[11].mxu1  ;;  %1372 = sbr.rel (%p1674_p7) target bundleno = 572 (0x23c), region = 48 }
 0x153   : > { %v1362_v30 = vadd.f32 %v1817_v26, %v1322_v25 }
 0x155   : > { %v1367_v31 = vadd.f32 %v1362_v30, %v269_v28 }
 0x157   : > { %1368 = vst [vmem:[#allocation2] sm:$0x3] %v1367_v31 }
 0x15e   : > { %v1373_v39 = vld [vmem:[#allocation2] sm:$0x3] }
 0x15f   : > { %v1381_v41 = vadd.f32 %v1675_v40, %v1373_v39 }
 0x161   : > { %v1382_v44 = vmax.f32 %v1381_v41, 0.0 }
 0x163   : > { %v1383_v46 = vpack.c.bf16 %v1382_v44, %v1382_v44 }
 0x165   : > { %1847 = vmatmul.mubr.bf16.vlgmr.msra.gmra.mrb[0].mxu0 %v1383_v46 }
 0x238   : > { %v1489_v48 = vpop.f32.mrb[0].mxu0 }
 0x239   : > { %v1490_v49 = vadd.f32 %v1676_v47, %v1489_v48  ;;  %v1848_v50 = vpop.f32.mrb[1].mxu0 }
 0x23a   : > { %v1492_v51 = vpop.f32.mrb[2].mxu0 }
 0x23b   : > { %1496 = vst.msk [vmem:[#allocation3] sm:$0x3] %vm1495_vm1, %v1490_v49  ;;  %v1849_v52 = vpop.f32.mrb[3].mxu0 }
 0x23c PF: > { %p2259_p8 = scmp.eq.s32.totalorder %s1571_s21, 5  ;;  %s2048_s7 = smov [#allocation3]  }
 0x23d   : > { %s1506_s8 = sshll.u32 %s2048_s7, 4  ;;  %s1507_s8 = int_to_ptr.vmem [resolvable:$true] %s1506_s8 }
 0x23e   : > { %s1990_s9 = scalar_lea.vmem %s1507_s8, 32  ;;  %p1997_p12 = scmp.lt.s32.totalorder %s1507_s8, %s1507_s8 }
 0x23f   : > { %p1991_p9 = scmp.ne.s32.totalorder %s1507_s8, %s1990_s9  ;;  %p1998_p13 = scmp.lt.s32.totalorder %s1990_s9, %s1990_s9 }
 0x241   : > { %p1992_p10 = pnand %p1991_p9, %p2259_p8  ;;  %p1999_p0 = por %p1998_p13, %p1997_p12 }
 0x243   : > { %p1993_p11 = pneg %p1992_p10 }
 0x245   : > { %p2000_p1 = pnand %p1999_p0, %p1993_p11 }
 0x247   : > { %2003 = shalt.err (!%p2000_p1)
}
 0x248   : > { %s2004_s21 = scalar_lea.hbm %s2299_s5, 32 }
 0x249   : > { %p2005_p2 = scmp.ne.s32.totalorder %s2299_s5, %s2004_s21  ;;  %p2010_p5 = scmp.lt.u32.totalorder %s2004_s21, %s2299_s5 }
 0x24b   : > { %p2006_p3 = pnand %p2005_p2, %p2259_p8 }
 0x24d   : > { %p2007_p4 = pneg %p2006_p3 }
 0x24f   : > { %p2012_p6 = pnand %p2010_p5, %p2007_p4 }
 0x251   : > { %2015 = shalt.err (!%p2012_p6)
}
 0x252   : > { %1851 = dma.vmem_to_hbm [thread:$0]  (%p2259_p8), %s1507_s8, 32, %s2299_s5, [#allocation4]  }
 0x253   : > { %2029 = dma.done.wait (%p2259_p8), [#allocation4], 32  }
 0x254   : > { %2031 = vsyncadd (%p2259_p8), [#allocation4], 4294967264 }
 0x255 PF: > { %s16_s20 = sadd.s32 1, %s2042_s20   ;;  %s2301_s18 = smov %s2038_s19 }
 0x256   : > { %p13_p7 = scmp.ge.s32.totalorder %s16_s20, 8   ;;  %s2302_s19 = smov %s2304_s22 }
 0x258   :  { %15 = sbr.rel (!%p13_p7) target bundleno = 2 (0x2), region = 79 }
 0x25f   :  { %1519 = vsyncpa [#allocation4], 1 }
 0x260   :  { %1521 = vsyncpa [#allocation4 + $0x1], 1 }

</bundles_post_ra>
